<compile_context>
chip_gen: v7x
topology: tpu7x:2x2x1
jax: 0.10.0
libtpu: 0.0.40
codegen_flags: <defaults>
</compile_context>

<pallas_src>
import functools

import jax
import jax.numpy as jnp
from jax.experimental import pallas as pl
from jax.experimental.pallas import tpu as pltpu


def _round_up(x, m):
    return ((x + m - 1) // m) * m


# ---------------------------------------------------------------------------
# Fused conv-matmul (+ optional train-mode BatchNorm) + LeakyReLU kernel
# ---------------------------------------------------------------------------
def _conv_fused_kernel(a_ref, b_ref, g_ref, beta_ref, o_ref, acc_ref, *,
                       use_bn, n_rows, slope, eps):
    k = pl.program_id(1)

    @pl.when(k == 0)
    def _init():
        acc_ref[...] = jnp.zeros_like(acc_ref)

    # bf16 x bf16 -> f32 accumulate on the MXU.
    acc_ref[...] += jnp.dot(a_ref[...], b_ref[...],
                            preferred_element_type=jnp.float32)

    @pl.when(k == pl.num_programs(1) - 1)
    def _finalize():
        acc = acc_ref[...]                              # f32 [M, tn]
        if use_bn:
            # Padded rows of `acc` are exactly zero (zero patch rows), so the
            # sums below are sums over valid rows; divide by the real count.
            inv_m = jnp.float32(1.0 / n_rows)
            mean = jnp.sum(acc, axis=0, keepdims=True) * inv_m
            var = jnp.sum(acc * acc, axis=0, keepdims=True) * inv_m - mean * mean
            var = jnp.maximum(var, 0.0)
            scale = g_ref[...] * jax.lax.rsqrt(var + eps)
            shift = beta_ref[...] - mean * scale
            y = acc * scale + shift
        else:
            y = acc
        o_ref[...] = jnp.where(y >= 0, y, slope * y).astype(o_ref.dtype)


def conv_block_fused(patches, w_mat, gamma, beta, *, use_bn, slope=0.2,
                     eps=1e-5, tn=128, tk_max=2048):
    """Fused Conv(as matmul) [+ BatchNorm(train stats)] + LeakyReLU.

    patches: [M, K] f32 rows (M = N*Ho*Wo, NHWC patch order)
    w_mat:   [K, Cout]
    Returns f32 [M, Np] where Np = round_up(Cout, tn); caller reads [:, :Cout].

    Note: the BN fusion keeps the full M extent in one block (stats need all
    rows); fine for the small activations of this model (M <= 512 at batch 2).
    """
    M, K = patches.shape
    K2, Cout = w_mat.shape
    assert K == K2
    Np = _round_up(Cout, tn)
    tk = K if K <= tk_max else tk_max
    Kp = _round_up(K, tk)

    # bf16 MXU operands (f32 accumulator inside the kernel).
    a = patches.astype(jnp.bfloat16)
    if Kp != K:
        a = jnp.pad(a, ((0, 0), (0, Kp - K)))
    if Kp == K and Np == Cout:
        b = w_mat.astype(jnp.bfloat16)
    else:
        b = jnp.zeros((Kp, Np), jnp.bfloat16).at[:K, :Cout].set(
            w_mat.astype(jnp.bfloat16))
    if Np == Cout:
        g = gamma.reshape(1, Cout).astype(jnp.float32)
        bt = beta.reshape(1, Cout).astype(jnp.float32)
    else:
        g = jnp.zeros((1, Np), jnp.float32).at[0, :Cout].set(
            gamma.astype(jnp.float32))
        bt = jnp.zeros((1, Np), jnp.float32).at[0, :Cout].set(
            beta.astype(jnp.float32))

    out = pl.pallas_call(
        functools.partial(_conv_fused_kernel, use_bn=use_bn, n_rows=M,
                          slope=slope, eps=eps),
        out_shape=jax.ShapeDtypeStruct((M, Np), jnp.float32),
        grid_spec=pltpu.PrefetchScalarGridSpec(
            num_scalar_prefetch=0,
            grid=(Np // tn, Kp // tk),                 # (out-channel, reduction)
            in_specs=[
                pl.BlockSpec((M, tk), lambda j, k: (0, k)),
                pl.BlockSpec((tk, tn), lambda j, k: (k, j)),
                pl.BlockSpec((1, tn), lambda j, k: (0, j)),
                pl.BlockSpec((1, tn), lambda j, k: (0, j)),
            ],
            out_specs=pl.BlockSpec((M, tn), lambda j, k: (0, j)),
            scratch_shapes=[pltpu.VMEM((M, tn), jnp.float32)],
        ),
        compiler_params=pltpu.CompilerParams(
            dimension_semantics=("parallel", "arbitrary")),
    )(a, b, g, bt)
    return out


# ---------------------------------------------------------------------------
# Final 256->1 conv as a fused per-row VPU reduction (+ bias)
# ---------------------------------------------------------------------------
def _final_dot_kernel(p_ref, w_ref, bias_ref, o_ref):
    acc = jnp.sum(p_ref[...] * w_ref[...], axis=-1, keepdims=True)
    o_ref[...] = acc + bias_ref[0]


def final_conv_fused(patches, w_vec, bias):
    """patches: [M, K] f32, w_vec: [K], bias: [1] -> [M, 1] f32."""
    M, K = patches.shape
    return pl.pallas_call(
        _final_dot_kernel,
        out_shape=jax.ShapeDtypeStruct((M, 1), jnp.float32),
        grid=(1,),
        in_specs=[
            pl.BlockSpec((M, K), lambda i: (0, 0)),
            pl.BlockSpec((1, K), lambda i: (0, 0)),
            pl.BlockSpec(memory_space=pltpu.MemorySpace.SMEM),
        ],
        out_specs=pl.BlockSpec((M, 1), lambda i: (0, 0)),
    )(patches.astype(jnp.float32),
      w_vec.reshape(1, K).astype(jnp.float32),
      bias.astype(jnp.float32))


# ---------------------------------------------------------------------------
# NHWC im2col glue (plain JAX; builds the matmul operand directly)
# ---------------------------------------------------------------------------
def im2col_nhwc(x, kh, kw, stride, pad):
    """x: [N, H, W, C] -> ([N*Ho*Wo, kh*kw*C], Ho, Wo); cols ordered (kh, kw, C)."""
    if pad > 0:
        x = jnp.pad(x, ((0, 0), (pad, pad), (pad, pad), (0, 0)))
    N, H, W, C = x.shape
    Ho = (H - kh) // stride + 1
    Wo = (W - kw) // stride + 1
    cols = []
    for i in range(kh):
        for j in range(kw):
            cols.append(x[:, i:i + stride * Ho:stride,
                          j:j + stride * Wo:stride, :])
    patches = jnp.concatenate(cols, axis=-1)            # [N, Ho, Wo, kh*kw*C]
    return patches.reshape(N * Ho * Wo, kh * kw * C), Ho, Wo


def weight_to_matrix(w):
    """PyTorch [Cout, Cin, kh, kw] -> [kh*kw*Cin, Cout] matching im2col cols."""
    Cout, Cin, kh, kw = w.shape
    return jnp.transpose(w, (2, 3, 1, 0)).reshape(kh * kw * Cin, Cout)


# ---------------------------------------------------------------------------
# Discriminator32 forward
# ---------------------------------------------------------------------------
def discriminator32_forward(img_nchw, params):
    N = img_nchw.shape[0]
    x = jnp.transpose(img_nchw, (0, 2, 3, 1))           # NCHW -> NHWC, once

    # Block 1: Conv(3->64, k4 s2 p1, no bias) + LeakyReLU(0.2)   (no norm)
    w = params["w1"]
    C = w.shape[0]
    patches, Ho, Wo = im2col_nhwc(x, 4, 4, 2, 1)
    dummy = jnp.zeros((C,), jnp.float32)
    y = conv_block_fused(patches, weight_to_matrix(w), dummy, dummy,
                         use_bn=False)
    x = y[:, :C].reshape(N, Ho, Wo, C)

    # Blocks 2 & 3: Conv + BatchNorm2d(train-mode stats) + LeakyReLU(0.2),
    # all fused into a single Pallas kernel per layer.
    for wk, gk, bk in (("w2", "g2", "b2"), ("w3", "g3", "b3")):
        w = params[wk]
        C = w.shape[0]
        patches, Ho, Wo = im2col_nhwc(x, 4, 4, 2, 1)
        y = conv_block_fused(patches, weight_to_matrix(w),
                             params[gk], params[bk], use_bn=True)
        x = y[:, :C].reshape(N, Ho, Wo, C)

    # Final: Conv(256->1, k4 s2 p0, with bias), no activation — fused VPU dot.
    patches, Ho, Wo = im2col_nhwc(x, 4, 4, 2, 0)        # [N, 4096]
    y = final_conv_fused(patches, weight_to_matrix(params["w4"])[:, 0],
                         params["b4"])
    return y.reshape(N, 1, 1, 1)                        # NCHW [N, 1, 1, 1]


def init_params(key, num_features=64):
    ks = jax.random.split(key, 5)
    nf = num_features
    return {
        "w1": jax.random.normal(ks[0], (nf, 3, 4, 4), jnp.float32) * 0.02,
        "w2": jax.random.normal(ks[1], (nf * 2, nf, 4, 4), jnp.float32) * 0.02,
        "g2": jnp.ones((nf * 2,), jnp.float32),
        "b2": jnp.zeros((nf * 2,), jnp.float32),
        "w3": jax.random.normal(ks[2], (nf * 4, nf * 2, 4, 4), jnp.float32) * 0.02,
        "g3": jnp.ones((nf * 4,), jnp.float32),
        "b3": jnp.zeros((nf * 4,), jnp.float32),
        "w4": jax.random.normal(ks[3], (1, nf * 4, 4, 4), jnp.float32) * 0.02,
        "b4": jnp.zeros((1,), jnp.float32),
    }


if __name__ == "__main__":
    key = jax.random.PRNGKey(0)
    k_img, k_par = jax.random.split(key)
    # Spatial size must be 32 so the final 4x4/s2/p0 conv yields 1x1.
    img = jax.random.normal(k_img, (2, 3, 32, 32), jnp.float32)
    params = init_params(k_par, num_features=64)

    fwd = jax.jit(discriminator32_forward)
    out = jax.block_until_ready(fwd(img, params))
    assert out.shape == (2, 1, 1, 1), out.shape
    assert bool(jnp.all(jnp.isfinite(out)))
    print("KERNEL_OK")
</pallas_src>

<mosaic_0001>
module attributes {stable_mosaic.version = 11 : i64} {
  func.func @_conv_fused_kernel(%arg0: i32, %arg1: i32, %arg2: memref<512x48xbf16, #tpu.memory_space<vmem>>, %arg3: memref<48x128xbf16, #tpu.memory_space<vmem>>, %arg4: memref<1x128xf32, #tpu.memory_space<vmem>>, %arg5: memref<1x128xf32, #tpu.memory_space<vmem>>, %arg6: memref<512x128xf32, #tpu.memory_space<vmem>>, %arg7: memref<512x128xf32, #tpu.memory_space<vmem>>) attributes {dimension_semantics = [#tpu.dimension_semantics<parallel>, #tpu.dimension_semantics<arbitrary>], iteration_bounds = array<i64: 1, 1>, scalar_prefetch = 0 : i64, scratch_operands = 1 : i64, tpu.core_type = #tpu.core_type<tc>, window_params = [{transform_indices = @transform_0, window_bounds = array<i64: 512, 48>}, {transform_indices = @transform_1, window_bounds = array<i64: 48, 128>}, {transform_indices = @transform_2, window_bounds = array<i64: 1, 128>}, {transform_indices = @transform_3, window_bounds = array<i64: 1, 128>}, {transform_indices = @transform_4, window_bounds = array<i64: 512, 128>}]} {
    %c0_i32 = arith.constant 0 : i32
    %0 = arith.cmpi eq, %arg1, %c0_i32 : i32
    %1 = arith.extui %0 : i1 to i32
    %c0_i32_0 = arith.constant 0 : i32
    %2 = arith.cmpi ne, %1, %c0_i32_0 : i32
    scf.if %2 {
      %cst_10 = arith.constant 0.000000e+00 : f32
      %12 = vector.broadcast %cst_10 : f32 to vector<512x128xf32>
      %c0_11 = arith.constant 0 : index
      %c0_12 = arith.constant 0 : index
      %13 = vector.load %arg7[%c0_11, %c0_12] : memref<512x128xf32, #tpu.memory_space<vmem>>, vector<512x128xf32>
      tpu.vector_store %arg7[%c0_11, %c0_12], %12 {strides = array<i32>} : memref<512x128xf32, #tpu.memory_space<vmem>>, vector<512x128xf32>,
    } else {
    }
    %c0 = arith.constant 0 : index
    %c0_1 = arith.constant 0 : index
    %3 = vector.load %arg7[%c0, %c0_1] : memref<512x128xf32, #tpu.memory_space<vmem>>, vector<512x128xf32>
    %c0_2 = arith.constant 0 : index
    %c0_3 = arith.constant 0 : index
    %4 = vector.load %arg2[%c0_2, %c0_3] : memref<512x48xbf16, #tpu.memory_space<vmem>>, vector<512x48xbf16>
    %c0_4 = arith.constant 0 : index
    %c0_5 = arith.constant 0 : index
    %5 = vector.load %arg3[%c0_4, %c0_5] : memref<48x128xbf16, #tpu.memory_space<vmem>>, vector<48x128xbf16>
    %cst = arith.constant dense<0.000000e+00> : vector<512x128xf32>
    %6 = tpu.matmul %4, %5, %cst {dimension_numbers = #tpu.dot_dimension_numbers<[1], [0], [0], [1], [0, 0, 1, 1], [], []>} : vector<512x48xbf16>, vector<48x128xbf16>, vector<512x128xf32> -> vector<512x128xf32>
    %7 = arith.addf %3, %6 : vector<512x128xf32>
    %c0_6 = arith.constant 0 : index
    %c0_7 = arith.constant 0 : index
    %8 = vector.load %arg7[%c0_6, %c0_7] : memref<512x128xf32, #tpu.memory_space<vmem>>, vector<512x128xf32>
    tpu.vector_store %arg7[%c0_6, %c0_7], %7 {strides = array<i32>} : memref<512x128xf32, #tpu.memory_space<vmem>>, vector<512x128xf32>,
    %c0_i32_8 = arith.constant 0 : i32
    %9 = arith.cmpi eq, %arg1, %c0_i32_8 : i32
    %10 = arith.extui %9 : i1 to i32
    %c0_i32_9 = arith.constant 0 : i32
    %11 = arith.cmpi ne, %10, %c0_i32_9 : i32
    scf.if %11 {
      %c0_10 = arith.constant 0 : index
      %c0_11 = arith.constant 0 : index
      %12 = vector.load %arg7[%c0_10, %c0_11] : memref<512x128xf32, #tpu.memory_space<vmem>>, vector<512x128xf32>
      %cst_12 = arith.constant 0.000000e+00 : f32
      %13 = vector.broadcast %cst_12 : f32 to vector<512x128xf32>
      %14 = arith.cmpf oge, %12, %13 : vector<512x128xf32>
      %cst_13 = arith.constant 2.000000e-01 : f32
      %15 = vector.broadcast %cst_13 : f32 to vector<512x128xf32>
      %16 = arith.mulf %15, %12 : vector<512x128xf32>
      %17 = arith.select %14, %12, %16 : vector<512x128xi1>, vector<512x128xf32>
      %c0_14 = arith.constant 0 : index
      %c0_15 = arith.constant 0 : index
      %18 = vector.load %arg6[%c0_14, %c0_15] : memref<512x128xf32, #tpu.memory_space<vmem>>, vector<512x128xf32>
      tpu.vector_store %arg6[%c0_14, %c0_15], %17 {strides = array<i32>} : memref<512x128xf32, #tpu.memory_space<vmem>>, vector<512x128xf32>,
    } else {
    }
    return
  }
  func.func @transform_0(%arg0: i32, %arg1: i32) -> (i32, i32) {
    %c0_i32 = arith.constant 0 : i32
    %c0_i32_0 = arith.constant 0 : i32
    return %c0_i32, %arg1 : i32, i32
  }
  func.func @transform_1(%arg0: i32, %arg1: i32) -> (i32, i32) {
    %c0_i32 = arith.constant 0 : i32
    return %arg1, %arg0 : i32, i32
  }
  func.func @transform_2(%arg0: i32, %arg1: i32) -> (i32, i32) {
    %c0_i32 = arith.constant 0 : i32
    %c0_i32_0 = arith.constant 0 : i32
    return %c0_i32, %arg0 : i32, i32
  }
  func.func @transform_3(%arg0: i32, %arg1: i32) -> (i32, i32) {
    %c0_i32 = arith.constant 0 : i32
    %c0_i32_0 = arith.constant 0 : i32
    return %c0_i32, %arg0 : i32, i32
  }
  func.func @transform_4(%arg0: i32, %arg1: i32) -> (i32, i32) {
    %c0_i32 = arith.constant 0 : i32
    %c0_i32_0 = arith.constant 0 : i32
    return %c0_i32, %arg0 : i32, i32
  }
}

module attributes {stable_mosaic.version = 11 : i64} {
  func.func @_conv_fused_kernel(%arg0: i32, %arg1: i32, %arg2: memref<128x1024xbf16, #tpu.memory_space<vmem>>, %arg3: memref<1024x128xbf16, #tpu.memory_space<vmem>>, %arg4: memref<1x128xf32, #tpu.memory_space<vmem>>, %arg5: memref<1x128xf32, #tpu.memory_space<vmem>>, %arg6: memref<128x128xf32, #tpu.memory_space<vmem>>, %arg7: memref<128x128xf32, #tpu.memory_space<vmem>>) attributes {dimension_semantics = [#tpu.dimension_semantics<parallel>, #tpu.dimension_semantics<arbitrary>], iteration_bounds = array<i64: 1, 1>, scalar_prefetch = 0 : i64, scratch_operands = 1 : i64, tpu.core_type = #tpu.core_type<tc>, window_params = [{transform_indices = @transform_0, window_bounds = array<i64: 128, 1024>}, {transform_indices = @transform_1, window_bounds = array<i64: 1024, 128>}, {transform_indices = @transform_2, window_bounds = array<i64: 1, 128>}, {transform_indices = @transform_3, window_bounds = array<i64: 1, 128>}, {transform_indices = @transform_4, window_bounds = array<i64: 128, 128>}]} {
    %c0_i32 = arith.constant 0 : i32
    %0 = arith.cmpi eq, %arg1, %c0_i32 : i32
    %1 = arith.extui %0 : i1 to i32
    %c0_i32_0 = arith.constant 0 : i32
    %2 = arith.cmpi ne, %1, %c0_i32_0 : i32
    scf.if %2 {
      %cst_10 = arith.constant 0.000000e+00 : f32
      %12 = vector.broadcast %cst_10 : f32 to vector<128x128xf32>
      %c0_11 = arith.constant 0 : index
      %c0_12 = arith.constant 0 : index
      %13 = vector.load %arg7[%c0_11, %c0_12] : memref<128x128xf32, #tpu.memory_space<vmem>>, vector<128x128xf32>
      tpu.vector_store %arg7[%c0_11, %c0_12], %12 {strides = array<i32>} : memref<128x128xf32, #tpu.memory_space<vmem>>, vector<128x128xf32>,
    } else {
    }
    %c0 = arith.constant 0 : index
    %c0_1 = arith.constant 0 : index
    %3 = vector.load %arg7[%c0, %c0_1] : memref<128x128xf32, #tpu.memory_space<vmem>>, vector<128x128xf32>
    %c0_2 = arith.constant 0 : index
    %c0_3 = arith.constant 0 : index
    %4 = vector.load %arg2[%c0_2, %c0_3] : memref<128x1024xbf16, #tpu.memory_space<vmem>>, vector<128x1024xbf16>
    %c0_4 = arith.constant 0 : index
    %c0_5 = arith.constant 0 : index
    %5 = vector.load %arg3[%c0_4, %c0_5] : memref<1024x128xbf16, #tpu.memory_space<vmem>>, vector<1024x128xbf16>
    %cst = arith.constant dense<0.000000e+00> : vector<128x128xf32>
    %6 = tpu.matmul %4, %5, %cst {dimension_numbers = #tpu.dot_dimension_numbers<[1], [0], [0], [1], [0, 0, 1, 1], [], []>} : vector<128x1024xbf16>, vector<1024x128xbf16>, vector<128x128xf32> -> vector<128x128xf32>
    %7 = arith.addf %3, %6 : vector<128x128xf32>
    %c0_6 = arith.constant 0 : index
    %c0_7 = arith.constant 0 : index
    %8 = vector.load %arg7[%c0_6, %c0_7] : memref<128x128xf32, #tpu.memory_space<vmem>>, vector<128x128xf32>
    tpu.vector_store %arg7[%c0_6, %c0_7], %7 {strides = array<i32>} : memref<128x128xf32, #tpu.memory_space<vmem>>, vector<128x128xf32>,
    %c0_i32_8 = arith.constant 0 : i32
    %9 = arith.cmpi eq, %arg1, %c0_i32_8 : i32
    %10 = arith.extui %9 : i1 to i32
    %c0_i32_9 = arith.constant 0 : i32
    %11 = arith.cmpi ne, %10, %c0_i32_9 : i32
    scf.if %11 {
      %c0_10 = arith.constant 0 : index
      %c0_11 = arith.constant 0 : index
      %12 = vector.load %arg7[%c0_10, %c0_11] : memref<128x128xf32, #tpu.memory_space<vmem>>, vector<128x128xf32>
      %cst_12 = arith.constant dense<0.000000e+00> : vector<128xf32>
      %13 = vector.multi_reduction <add>, %12, %cst_12 [0] : vector<128x128xf32> to vector<128xf32>
      %14 = vector.shape_cast %13 : vector<128xf32> to vector<1x128xf32>
      %cst_13 = arith.constant 7.812500e-03 : f32
      %15 = vector.broadcast %cst_13 : f32 to vector<1x128xf32>
      %16 = arith.mulf %14, %15 : vector<1x128xf32>
      %17 = arith.mulf %12, %12 : vector<128x128xf32>
      %cst_14 = arith.constant dense<0.000000e+00> : vector<128xf32>
      %18 = vector.multi_reduction <add>, %17, %cst_14 [0] : vector<128x128xf32> to vector<128xf32>
      %19 = vector.shape_cast %18 : vector<128xf32> to vector<1x128xf32>
      %cst_15 = arith.constant 7.812500e-03 : f32
      %20 = vector.broadcast %cst_15 : f32 to vector<1x128xf32>
      %21 = arith.mulf %19, %20 : vector<1x128xf32>
      %22 = arith.mulf %16, %16 : vector<1x128xf32>
      %23 = arith.subf %21, %22 : vector<1x128xf32>
      %cst_16 = arith.constant 0.000000e+00 : f32
      %24 = vector.broadcast %cst_16 : f32 to vector<1x128xf32>
      %25 = arith.maximumf %23, %24 : vector<1x128xf32>
      %c0_17 = arith.constant 0 : index
      %c0_18 = arith.constant 0 : index
      %26 = vector.load %arg4[%c0_17, %c0_18] : memref<1x128xf32, #tpu.memory_space<vmem>>, vector<1x128xf32>
      %cst_19 = arith.constant 9.99999974E-6 : f32
      %27 = vector.broadcast %cst_19 : f32 to vector<1x128xf32>
      %28 = arith.addf %25, %27 : vector<1x128xf32>
      %29 = math.rsqrt %28 : vector<1x128xf32>
      %30 = arith.mulf %26, %29 : vector<1x128xf32>
      %c0_20 = arith.constant 0 : index
      %c0_21 = arith.constant 0 : index
      %31 = vector.load %arg5[%c0_20, %c0_21] : memref<1x128xf32, #tpu.memory_space<vmem>>, vector<1x128xf32>
      %32 = arith.mulf %16, %30 : vector<1x128xf32>
      %33 = arith.subf %31, %32 : vector<1x128xf32>
      %34 = vector.broadcast %30 : vector<1x128xf32> to vector<128x128xf32>
      %35 = arith.mulf %12, %34 : vector<128x128xf32>
      %36 = vector.broadcast %33 : vector<1x128xf32> to vector<128x128xf32>
      %37 = arith.addf %35, %36 : vector<128x128xf32>
      %cst_22 = arith.constant 0.000000e+00 : f32
      %38 = vector.broadcast %cst_22 : f32 to vector<128x128xf32>
      %39 = arith.cmpf oge, %37, %38 : vector<128x128xf32>
      %cst_23 = arith.constant 2.000000e-01 : f32
      %40 = vector.broadcast %cst_23 : f32 to vector<128x128xf32>
      %41 = arith.mulf %40, %37 : vector<128x128xf32>
      %42 = arith.select %39, %37, %41 : vector<128x128xi1>, vector<128x128xf32>
      %c0_24 = arith.constant 0 : index
      %c0_25 = arith.constant 0 : index
      %43 = vector.load %arg6[%c0_24, %c0_25] : memref<128x128xf32, #tpu.memory_space<vmem>>, vector<128x128xf32>
      tpu.vector_store %arg6[%c0_24, %c0_25], %42 {strides = array<i32>} : memref<128x128xf32, #tpu.memory_space<vmem>>, vector<128x128xf32>,
    } else {
    }
    return
  }
  func.func @transform_0(%arg0: i32, %arg1: i32) -> (i32, i32) {
    %c0_i32 = arith.constant 0 : i32
    %c0_i32_0 = arith.constant 0 : i32
    return %c0_i32, %arg1 : i32, i32
  }
  func.func @transform_1(%arg0: i32, %arg1: i32) -> (i32, i32) {
    %c0_i32 = arith.constant 0 : i32
    return %arg1, %arg0 : i32, i32
  }
  func.func @transform_2(%arg0: i32, %arg1: i32) -> (i32, i32) {
    %c0_i32 = arith.constant 0 : i32
    %c0_i32_0 = arith.constant 0 : i32
    return %c0_i32, %arg0 : i32, i32
  }
  func.func @transform_3(%arg0: i32, %arg1: i32) -> (i32, i32) {
    %c0_i32 = arith.constant 0 : i32
    %c0_i32_0 = arith.constant 0 : i32
    return %c0_i32, %arg0 : i32, i32
  }
  func.func @transform_4(%arg0: i32, %arg1: i32) -> (i32, i32) {
    %c0_i32 = arith.constant 0 : i32
    %c0_i32_0 = arith.constant 0 : i32
    return %c0_i32, %arg0 : i32, i32
  }
}

module attributes {stable_mosaic.version = 11 : i64} {
  func.func @_conv_fused_kernel(%arg0: i32, %arg1: i32, %arg2: memref<32x2048xbf16, #tpu.memory_space<vmem>>, %arg3: memref<2048x128xbf16, #tpu.memory_space<vmem>>, %arg4: memref<1x128xf32, #tpu.memory_space<vmem>>, %arg5: memref<1x128xf32, #tpu.memory_space<vmem>>, %arg6: memref<32x128xf32, #tpu.memory_space<vmem>>, %arg7: memref<32x128xf32, #tpu.memory_space<vmem>>) attributes {dimension_semantics = [#tpu.dimension_semantics<parallel>, #tpu.dimension_semantics<arbitrary>], iteration_bounds = array<i64: 2, 1>, scalar_prefetch = 0 : i64, scratch_operands = 1 : i64, tpu.core_type = #tpu.core_type<tc>, window_params = [{transform_indices = @transform_0, window_bounds = array<i64: 32, 2048>}, {transform_indices = @transform_1, window_bounds = array<i64: 2048, 128>}, {transform_indices = @transform_2, window_bounds = array<i64: 1, 128>}, {transform_indices = @transform_3, window_bounds = array<i64: 1, 128>}, {transform_indices = @transform_4, window_bounds = array<i64: 32, 128>}]} {
    %c0_i32 = arith.constant 0 : i32
    %0 = arith.cmpi eq, %arg1, %c0_i32 : i32
    %1 = arith.extui %0 : i1 to i32
    %c0_i32_0 = arith.constant 0 : i32
    %2 = arith.cmpi ne, %1, %c0_i32_0 : i32
    scf.if %2 {
      %cst_10 = arith.constant 0.000000e+00 : f32
      %12 = vector.broadcast %cst_10 : f32 to vector<32x128xf32>
      %c0_11 = arith.constant 0 : index
      %c0_12 = arith.constant 0 : index
      %13 = vector.load %arg7[%c0_11, %c0_12] : memref<32x128xf32, #tpu.memory_space<vmem>>, vector<32x128xf32>
      tpu.vector_store %arg7[%c0_11, %c0_12], %12 {strides = array<i32>} : memref<32x128xf32, #tpu.memory_space<vmem>>, vector<32x128xf32>,
    } else {
    }
    %c0 = arith.constant 0 : index
    %c0_1 = arith.constant 0 : index
    %3 = vector.load %arg7[%c0, %c0_1] : memref<32x128xf32, #tpu.memory_space<vmem>>, vector<32x128xf32>
    %c0_2 = arith.constant 0 : index
    %c0_3 = arith.constant 0 : index
    %4 = vector.load %arg2[%c0_2, %c0_3] : memref<32x2048xbf16, #tpu.memory_space<vmem>>, vector<32x2048xbf16>
    %c0_4 = arith.constant 0 : index
    %c0_5 = arith.constant 0 : index
    %5 = vector.load %arg3[%c0_4, %c0_5] : memref<2048x128xbf16, #tpu.memory_space<vmem>>, vector<2048x128xbf16>
    %cst = arith.constant dense<0.000000e+00> : vector<32x128xf32>
    %6 = tpu.matmul %4, %5, %cst {dimension_numbers = #tpu.dot_dimension_numbers<[1], [0], [0], [1], [0, 0, 1, 1], [], []>} : vector<32x2048xbf16>, vector<2048x128xbf16>, vector<32x128xf32> -> vector<32x128xf32>
    %7 = arith.addf %3, %6 : vector<32x128xf32>
    %c0_6 = arith.constant 0 : index
    %c0_7 = arith.constant 0 : index
    %8 = vector.load %arg7[%c0_6, %c0_7] : memref<32x128xf32, #tpu.memory_space<vmem>>, vector<32x128xf32>
    tpu.vector_store %arg7[%c0_6, %c0_7], %7 {strides = array<i32>} : memref<32x128xf32, #tpu.memory_space<vmem>>, vector<32x128xf32>,
    %c0_i32_8 = arith.constant 0 : i32
    %9 = arith.cmpi eq, %arg1, %c0_i32_8 : i32
    %10 = arith.extui %9 : i1 to i32
    %c0_i32_9 = arith.constant 0 : i32
    %11 = arith.cmpi ne, %10, %c0_i32_9 : i32
    scf.if %11 {
      %c0_10 = arith.constant 0 : index
      %c0_11 = arith.constant 0 : index
      %12 = vector.load %arg7[%c0_10, %c0_11] : memref<32x128xf32, #tpu.memory_space<vmem>>, vector<32x128xf32>
      %cst_12 = arith.constant dense<0.000000e+00> : vector<128xf32>
      %13 = vector.multi_reduction <add>, %12, %cst_12 [0] : vector<32x128xf32> to vector<128xf32>
      %14 = vector.shape_cast %13 : vector<128xf32> to vector<1x128xf32>
      %cst_13 = arith.constant 3.125000e-02 : f32
      %15 = vector.broadcast %cst_13 : f32 to vector<1x128xf32>
      %16 = arith.mulf %14, %15 : vector<1x128xf32>
      %17 = arith.mulf %12, %12 : vector<32x128xf32>
      %cst_14 = arith.constant dense<0.000000e+00> : vector<128xf32>
      %18 = vector.multi_reduction <add>, %17, %cst_14 [0] : vector<32x128xf32> to vector<128xf32>
      %19 = vector.shape_cast %18 : vector<128xf32> to vector<1x128xf32>
      %cst_15 = arith.constant 3.125000e-02 : f32
      %20 = vector.broadcast %cst_15 : f32 to vector<1x128xf32>
      %21 = arith.mulf %19, %20 : vector<1x128xf32>
      %22 = arith.mulf %16, %16 : vector<1x128xf32>
      %23 = arith.subf %21, %22 : vector<1x128xf32>
      %cst_16 = arith.constant 0.000000e+00 : f32
      %24 = vector.broadcast %cst_16 : f32 to vector<1x128xf32>
      %25 = arith.maximumf %23, %24 : vector<1x128xf32>
      %c0_17 = arith.constant 0 : index
      %c0_18 = arith.constant 0 : index
      %26 = vector.load %arg4[%c0_17, %c0_18] : memref<1x128xf32, #tpu.memory_space<vmem>>, vector<1x128xf32>
      %cst_19 = arith.constant 9.99999974E-6 : f32
      %27 = vector.broadcast %cst_19 : f32 to vector<1x128xf32>
      %28 = arith.addf %25, %27 : vector<1x128xf32>
      %29 = math.rsqrt %28 : vector<1x128xf32>
      %30 = arith.mulf %26, %29 : vector<1x128xf32>
      %c0_20 = arith.constant 0 : index
      %c0_21 = arith.constant 0 : index
      %31 = vector.load %arg5[%c0_20, %c0_21] : memref<1x128xf32, #tpu.memory_space<vmem>>, vector<1x128xf32>
      %32 = arith.mulf %16, %30 : vector<1x128xf32>
      %33 = arith.subf %31, %32 : vector<1x128xf32>
      %34 = vector.broadcast %30 : vector<1x128xf32> to vector<32x128xf32>
      %35 = arith.mulf %12, %34 : vector<32x128xf32>
      %36 = vector.broadcast %33 : vector<1x128xf32> to vector<32x128xf32>
      %37 = arith.addf %35, %36 : vector<32x128xf32>
      %cst_22 = arith.constant 0.000000e+00 : f32
      %38 = vector.broadcast %cst_22 : f32 to vector<32x128xf32>
      %39 = arith.cmpf oge, %37, %38 : vector<32x128xf32>
      %cst_23 = arith.constant 2.000000e-01 : f32
      %40 = vector.broadcast %cst_23 : f32 to vector<32x128xf32>
      %41 = arith.mulf %40, %37 : vector<32x128xf32>
      %42 = arith.select %39, %37, %41 : vector<32x128xi1>, vector<32x128xf32>
      %c0_24 = arith.constant 0 : index
      %c0_25 = arith.constant 0 : index
      %43 = vector.load %arg6[%c0_24, %c0_25] : memref<32x128xf32, #tpu.memory_space<vmem>>, vector<32x128xf32>
      tpu.vector_store %arg6[%c0_24, %c0_25], %42 {strides = array<i32>} : memref<32x128xf32, #tpu.memory_space<vmem>>, vector<32x128xf32>,
    } else {
    }
    return
  }
  func.func @transform_0(%arg0: i32, %arg1: i32) -> (i32, i32) {
    %c0_i32 = arith.constant 0 : i32
    %c0_i32_0 = arith.constant 0 : i32
    return %c0_i32, %arg1 : i32, i32
  }
  func.func @transform_1(%arg0: i32, %arg1: i32) -> (i32, i32) {
    %c0_i32 = arith.constant 0 : i32
    return %arg1, %arg0 : i32, i32
  }
  func.func @transform_2(%arg0: i32, %arg1: i32) -> (i32, i32) {
    %c0_i32 = arith.constant 0 : i32
    %c0_i32_0 = arith.constant 0 : i32
    return %c0_i32, %arg0 : i32, i32
  }
  func.func @transform_3(%arg0: i32, %arg1: i32) -> (i32, i32) {
    %c0_i32 = arith.constant 0 : i32
    %c0_i32_0 = arith.constant 0 : i32
    return %c0_i32, %arg0 : i32, i32
  }
  func.func @transform_4(%arg0: i32, %arg1: i32) -> (i32, i32) {
    %c0_i32 = arith.constant 0 : i32
    %c0_i32_0 = arith.constant 0 : i32
    return %c0_i32, %arg0 : i32, i32
  }
}

module attributes {stable_mosaic.version = 11 : i64} {
  func.func @_final_dot_kernel(%arg0: i32, %arg1: memref<2x4096xf32, #tpu.memory_space<vmem>>, %arg2: memref<1x4096xf32, #tpu.memory_space<vmem>>, %arg3: memref<1xf32, #tpu.memory_space<smem>>, %arg4: memref<2x1xf32, #tpu.memory_space<vmem>>) attributes {dimension_semantics = [#tpu.dimension_semantics<arbitrary>], iteration_bounds = array<i64: 1>, scalar_prefetch = 0 : i64, scratch_operands = 0 : i64, tpu.core_type = #tpu.core_type<tc>, window_params = [{pipeline_mode = #tpu.pipeline_mode<synchronous>, transform_indices = @transform_0, window_bounds = array<i64: 2, 4096>}, {pipeline_mode = #tpu.pipeline_mode<synchronous>, transform_indices = @transform_1, window_bounds = array<i64: 1, 4096>}, {transform_indices = @transform_2, window_bounds = array<i64: 1>}, {pipeline_mode = #tpu.pipeline_mode<synchronous>, transform_indices = @transform_3, window_bounds = array<i64: 2, 1>}]} {
    %c0 = arith.constant 0 : index
    %c0_0 = arith.constant 0 : index
    %0 = vector.load %arg1[%c0, %c0_0] : memref<2x4096xf32, #tpu.memory_space<vmem>>, vector<2x4096xf32>
    %c0_1 = arith.constant 0 : index
    %c0_2 = arith.constant 0 : index
    %1 = vector.load %arg2[%c0_1, %c0_2] : memref<1x4096xf32, #tpu.memory_space<vmem>>, vector<1x4096xf32>
    %2 = vector.broadcast %1 : vector<1x4096xf32> to vector<2x4096xf32>
    %3 = arith.mulf %0, %2 : vector<2x4096xf32>
    %cst = arith.constant dense<0.000000e+00> : vector<2xf32>
    %4 = vector.multi_reduction <add>, %3, %cst [1] : vector<2x4096xf32> to vector<2xf32>
    %5 = vector.shape_cast %4 : vector<2xf32> to vector<2x1xf32>
    %c0_3 = arith.constant 0 : index
    %6 = memref.load %arg3[%c0_3] : memref<1xf32, #tpu.memory_space<smem>>
    %7 = vector.broadcast %6 : f32 to vector<2x1xf32>
    %8 = arith.addf %5, %7 : vector<2x1xf32>
    %c0_4 = arith.constant 0 : index
    %c0_5 = arith.constant 0 : index
    %9 = vector.load %arg4[%c0_4, %c0_5] : memref<2x1xf32, #tpu.memory_space<vmem>>, vector<2x1xf32>
    tpu.vector_store %arg4[%c0_4, %c0_5], %8 {strides = array<i32>} : memref<2x1xf32, #tpu.memory_space<vmem>>, vector<2x1xf32>,
    return
  }
  func.func @transform_0(%arg0: i32) -> (i32, i32) {
    %c0_i32 = arith.constant 0 : i32
    %c0_i32_0 = arith.constant 0 : i32
    %c0_i32_1 = arith.constant 0 : i32
    return %c0_i32, %c0_i32_0 : i32, i32
  }
  func.func @transform_1(%arg0: i32) -> (i32, i32) {
    %c0_i32 = arith.constant 0 : i32
    %c0_i32_0 = arith.constant 0 : i32
    %c0_i32_1 = arith.constant 0 : i32
    return %c0_i32, %c0_i32_0 : i32, i32
  }
  func.func @transform_2(%arg0: i32) -> i32 {
    %c0_i32 = arith.constant 0 : i32
    %c0_i32_0 = arith.constant 0 : i32
    return %c0_i32 : i32
  }
  func.func @transform_3(%arg0: i32) -> (i32, i32) {
    %c0_i32 = arith.constant 0 : i32
    %c0_i32_0 = arith.constant 0 : i32
    %c0_i32_1 = arith.constant 0 : i32
    return %c0_i32, %c0_i32_0 : i32, i32
  }
}

</mosaic_0001>

<bundles_post_ra>
// kernel: discriminator32_forward.4
= control target key start
LH: loop header
LB: loop body
LE: loop exit
PB: predicated region body
PF: predicated region fallthrough
CT: control target
= control target key end

     0   :  { %vm398_vm0 = vcmask 392192   ;;  %s1806_s1 = inlined_call_operand.vmem [shape: bf16[48,128], index: 1, kind: input, shape index: {}]   ;;  %s1807_s2 = inlined_call_operand.vmem [shape: f32[1,128], index: 2, kind: input, shape index: {}, may-alias: {2,3}]   ;;  %s1808_s3 = inlined_call_operand.vmem [shape: f32[1,128], index: 3, kind: input, shape index: {}, may-alias: {2,3}]   ;;  %s1809_s0 = inlined_call_operand.vmem [shape: bf16[512,48], index: 0, kind: input, shape index: {}]   ;;  %s1810_s4 = inlined_call_operand.vmem [shape: f32[512,128], index: 4, kind: output, shape index: {}]  }
   0x1   :  { %v1417_v0 = vld [vmem:[%s1806_s1] sm:$0xff]   ;;  %v1418_v1 = vld [vmem:[%s1806_s1 + $0x8] sm:$0xff]   ;;  %v1419_v2 = vld [vmem:[%s1806_s1 + $0x10] sm:$0xff]  }
   0x2   :  { %1341 = vmatprep.subr.bf16.mxu0 %v1417_v0  ;;  %1411 = vmatprep.subr.bf16.mxu1 %v1417_v0  ;;  %v1420_v3 = vld [vmem:[%s1809_s0] sm:$0xff]   ;;  %v1422_v5 = vld [vmem:[%s1809_s0 + $0x8] sm:$0xff]   ;;  %v1424_v7 = vld [vmem:[%s1809_s0 + $0x10] sm:$0xff]  }
   0x3   :  { %1342 = vmatpush3.bf16.msra.mxu0 %v1417_v0  ;;  %1414 = vmatpush3.bf16.msra.mxu1 %v1417_v0  ;;  %v1421_v4 = vld [vmem:[%s1809_s0 + $0x80] sm:$0xff]   ;;  %v1423_v6 = vld [vmem:[%s1809_s0 + $0x88] sm:$0xff]   ;;  %v1425_v8 = vld [vmem:[%s1809_s0 + $0x90] sm:$0xff]  }
   0x4   :  { %1343 = vmatprep.subr.bf16.mxu0 %v1418_v1  ;;  %1412 = vmatprep.subr.bf16.mxu1 %v1418_v1  ;;  %v1426_v9 = vld [vmem:[%s1809_s0 + $0x18] sm:$0xff]   ;;  %v1428_v11 = vld [vmem:[%s1809_s0 + $0x20] sm:$0xff]   ;;  %v1430_v13 = vld [vmem:[%s1809_s0 + $0x28] sm:$0xff]  }
   0x5   :  { %1347 = vmatprep.mubr.msk.bf16.mxu0 %vm398_vm0, %v1420_v3  ;;  %1379 = vmatprep.mubr.msk.bf16.mxu1 %vm398_vm0, %v1421_v4  ;;  %v1427_v10 = vld [vmem:[%s1809_s0 + $0x98] sm:$0xff]   ;;  %v1429_v12 = vld [vmem:[%s1809_s0 + $0xa0] sm:$0xff]   ;;  %v1431_v14 = vld [vmem:[%s1809_s0 + $0xa8] sm:$0xff]  }
   0x6   :  { %v1432_v15 = vld [vmem:[%s1809_s0 + $0x30] sm:$0xff]   ;;  %v1434_v17 = vld [vmem:[%s1809_s0 + $0x38] sm:$0xff]   ;;  %v1436_v19 = vld [vmem:[%s1809_s0 + $0x40] sm:$0xff]  }
   0x7   :  { %1344 = vmatpush3.bf16.msra.mxu0 %v1418_v1  ;;  %1415 = vmatpush3.bf16.msra.mxu1 %v1418_v1  ;;  %v1433_v16 = vld [vmem:[%s1809_s0 + $0xb0] sm:$0xff]   ;;  %v1435_v18 = vld [vmem:[%s1809_s0 + $0xb8] sm:$0xff]   ;;  %v1437_v20 = vld [vmem:[%s1809_s0 + $0xc0] sm:$0xff]  }
   0x8   :  { %1345 = vmatprep.subr.bf16.mxu0 %v1419_v2  ;;  %1413 = vmatprep.subr.bf16.mxu1 %v1419_v2  ;;  %v1438_v21 = vld [vmem:[%s1809_s0 + $0x48] sm:$0xff]   ;;  %v1440_v23 = vld [vmem:[%s1809_s0 + $0x50] sm:$0xff]   ;;  %v1442_v25 = vld [vmem:[%s1809_s0 + $0x58] sm:$0xff]  }
   0x9   :  { %v1439_v22 = vld [vmem:[%s1809_s0 + $0xc8] sm:$0xff]   ;;  %v1441_v24 = vld [vmem:[%s1809_s0 + $0xd0] sm:$0xff]   ;;  %v1443_v26 = vld [vmem:[%s1809_s0 + $0xd8] sm:$0xff]  }
   0xa   :  { %v1444_v27 = vld [vmem:[%s1809_s0 + $0x60] sm:$0xff]   ;;  %v1446_v29 = vld [vmem:[%s1809_s0 + $0x68] sm:$0xff]   ;;  %v1448_v31 = vld [vmem:[%s1809_s0 + $0x70] sm:$0xff]  }
   0xb   :  { %1346 = vmatpush3.bf16.msra.mxu0 %v1419_v2  ;;  %1416 = vmatpush3.bf16.msra.mxu1 %v1419_v2  ;;  %v1445_v28 = vld [vmem:[%s1809_s0 + $0xe0] sm:$0xff]   ;;  %v1447_v30 = vld [vmem:[%s1809_s0 + $0xe8] sm:$0xff]   ;;  %v1449_v32 = vld [vmem:[%s1809_s0 + $0xf0] sm:$0xff]  }
   0xc   :  { %v1450_v33 = vld [vmem:[%s1809_s0 + $0x78] sm:$0xff]  }
   0xd   :  { %v1451_v34 = vld [vmem:[%s1809_s0 + $0xf8] sm:$0xff]  }
   0xe   :  { %1348 = vmatmul.mubr.msk.bf16.vlgmr.msra.gmra.mrb[0].mxu0 %vm398_vm0, %v1422_v5  ;;  %1380 = vmatmul.mubr.msk.bf16.vlgmr.msra.gmra.mrb[0].mxu1 %vm398_vm0, %v1423_v6 }
   0xf   :  { %1351 = vmatprep.mubr.msk.bf16.mxu0 %vm398_vm0, %v1424_v7  ;;  %1383 = vmatprep.mubr.msk.bf16.mxu1 %vm398_vm0, %v1425_v8 }
  0x16   :  { %1352 = vmatmul.mubr.msk.bf16.gmra.mrb[4].mxu0 %vm398_vm0, %v1426_v9  ;;  %1384 = vmatmul.mubr.msk.bf16.gmra.mrb[4].mxu1 %vm398_vm0, %v1427_v10 }
  0x17   :  { %1355 = vmatprep.mubr.msk.bf16.mxu0 %vm398_vm0, %v1428_v11  ;;  %1387 = vmatprep.mubr.msk.bf16.mxu1 %vm398_vm0, %v1429_v12 }
  0x1e   :  { %1356 = vmatmul.mubr.msk.bf16.gmra.mrb[8].mxu0 %vm398_vm0, %v1430_v13  ;;  %1388 = vmatmul.mubr.msk.bf16.gmra.mrb[8].mxu1 %vm398_vm0, %v1431_v14 }
  0x1f   :  { %1359 = vmatprep.mubr.msk.bf16.mxu0 %vm398_vm0, %v1432_v15  ;;  %1391 = vmatprep.mubr.msk.bf16.mxu1 %vm398_vm0, %v1433_v16 }
  0x26   :  { %1360 = vmatmul.mubr.msk.bf16.gmra.mrb[12].mxu0 %vm398_vm0, %v1434_v17  ;;  %1392 = vmatmul.mubr.msk.bf16.gmra.mrb[12].mxu1 %vm398_vm0, %v1435_v18 }
  0x27   :  { %1363 = vmatprep.mubr.msk.bf16.mxu0 %vm398_vm0, %v1436_v19  ;;  %1395 = vmatprep.mubr.msk.bf16.mxu1 %vm398_vm0, %v1437_v20 }
  0x2e   :  { %1364 = vmatmul.mubr.msk.bf16.gmra.mrb[16].mxu0 %vm398_vm0, %v1438_v21  ;;  %1396 = vmatmul.mubr.msk.bf16.gmra.mrb[16].mxu1 %vm398_vm0, %v1439_v22 }
  0x2f   :  { %1367 = vmatprep.mubr.msk.bf16.mxu0 %vm398_vm0, %v1440_v23  ;;  %1399 = vmatprep.mubr.msk.bf16.mxu1 %vm398_vm0, %v1441_v24 }
  0x36   :  { %1368 = vmatmul.mubr.msk.bf16.gmra.mrb[20].mxu0 %vm398_vm0, %v1442_v25  ;;  %1400 = vmatmul.mubr.msk.bf16.gmra.mrb[20].mxu1 %vm398_vm0, %v1443_v26 }
  0x37   :  { %1371 = vmatprep.mubr.msk.bf16.mxu0 %vm398_vm0, %v1444_v27  ;;  %1403 = vmatprep.mubr.msk.bf16.mxu1 %vm398_vm0, %v1445_v28 }
  0x3e   :  { %1372 = vmatmul.mubr.msk.bf16.gmra.mrb[24].mxu0 %vm398_vm0, %v1446_v29  ;;  %1404 = vmatmul.mubr.msk.bf16.gmra.mrb[24].mxu1 %vm398_vm0, %v1447_v30 }
  0x3f   :  { %1375 = vmatprep.mubr.msk.bf16.mxu0 %vm398_vm0, %v1448_v31  ;;  %1407 = vmatprep.mubr.msk.bf16.mxu1 %vm398_vm0, %v1449_v32 }
  0x46   :  { %1376 = vmatmul.mubr.msk.bf16.gmra.mrb[28].mxu0 %vm398_vm0, %v1450_v33  ;;  %1408 = vmatmul.mubr.msk.bf16.gmra.mrb[28].mxu1 %vm398_vm0, %v1451_v34 }
  0xe1   :  { %v1349_v35 = vpop.f32.mrb[0].mxu0  ;;  %v1381_v36 = vpop.f32.mrb[0].mxu1 }
  0xe2   :  { %vm981_vm1 = vcmp.ge.f32.partialorder %v1349_v35, 0.0  ;;  %v1045_v37 = vmul.f32 0.2, %v1349_v35  ;;  %vm1013_vm2 = vcmp.ge.f32.partialorder %v1381_v36, 0.0  ;;  %v1077_v38 = vmul.f32 0.2, %v1381_v36 }
  0xe3   :  { %v529_v39 = vpop.f32.mrb[1].mxu0  ;;  %v657_v40 = vpop.f32.mrb[1].mxu1 }
  0xe4   :  { %v1109_v41 = vsel %vm981_vm1, %v1349_v35, %v1045_v37  ;;  %v1141_v42 = vsel %vm1013_vm2, %v1381_v36, %v1077_v38  ;;  %vm979_vm3 = vcmp.ge.f32.partialorder %v529_v39, 0.0  ;;  %v1043_v43 = vmul.f32 0.2, %v529_v39  ;;  %v1350_v44 = vpop.f32.mrb[2].mxu0  ;;  %v1382_v45 = vpop.f32.mrb[2].mxu1 }
  0xe5   :  { %1173 = vst [vmem:[%s1810_s4 + $0x10] sm:$0xff] %v1109_v41  ;;  %1205 = vst [vmem:[%s1810_s4 + $0x110] sm:$0xff] %v1141_v42  ;;  %vm1011_vm4 = vcmp.ge.f32.partialorder %v657_v40, 0.0  ;;  %v1075_v46 = vmul.f32 0.2, %v657_v40  ;;  %vm982_vm5 = vcmp.ge.f32.partialorder %v1350_v44, 0.0 }
  0xe6   :  { %v1046_v47 = vmul.f32 0.2, %v1350_v44  ;;  %v1107_v48 = vsel %vm979_vm3, %v529_v39, %v1043_v43  ;;  %vm1014_vm6 = vcmp.ge.f32.partialorder %v1382_v45, 0.0  ;;  %v1078_v49 = vmul.f32 0.2, %v1382_v45  ;;  %v532_v50 = vpop.f32.mrb[3].mxu0 }
  0xe7   :  { %v660_v51 = vpop.f32.mrb[3].mxu1  ;;  %1171 = vst [vmem:[%s1810_s4] sm:$0xff] %v1107_v48  ;;  %v1139_v52 = vsel %vm1011_vm4, %v657_v40, %v1075_v46  ;;  %vm980_vm7 = vcmp.ge.f32.partialorder %v532_v50, 0.0  ;;  %v1044_v54 = vmul.f32 0.2, %v532_v50 }
  0xe8   :  { %v1110_v53 = vsel %vm982_vm5, %v1350_v44, %v1046_v47  ;;  %1203 = vst [vmem:[%s1810_s4 + $0x100] sm:$0xff] %v1139_v52  ;;  %v1142_v55 = vsel %vm1014_vm6, %v1382_v45, %v1078_v49  ;;  %vm1012_vm8 = vcmp.ge.f32.partialorder %v660_v51, 0.0  ;;  %v1076_v56 = vmul.f32 0.2, %v660_v51 }
  0xe9   :  { %1174 = vst [vmem:[%s1810_s4 + $0x18] sm:$0xff] %v1110_v53  ;;  %1206 = vst [vmem:[%s1810_s4 + $0x118] sm:$0xff] %v1142_v55  ;;  %v1108_v57 = vsel %vm980_vm7, %v532_v50, %v1044_v54  ;;  %v1353_v58 = vpop.f32.mrb[4].mxu0  ;;  %v1385_v59 = vpop.f32.mrb[4].mxu1 }
  0xea   :  { %1172 = vst [vmem:[%s1810_s4 + $0x8] sm:$0xff] %v1108_v57  ;;  %v1140_v60 = vsel %vm1012_vm8, %v660_v51, %v1076_v56  ;;  %vm985_vm9 = vcmp.ge.f32.partialorder %v1353_v58, 0.0  ;;  %v1049_v61 = vmul.f32 0.2, %v1353_v58  ;;  %vm1017_vm10 = vcmp.ge.f32.partialorder %v1385_v59, 0.0  ;;  %v545_v62 = vpop.f32.mrb[5].mxu0 }
  0xeb   :  { %v673_v63 = vpop.f32.mrb[5].mxu1  ;;  %1204 = vst [vmem:[%s1810_s4 + $0x108] sm:$0xff] %v1140_v60  ;;  %v1081_v0 = vmul.f32 0.2, %v1385_v59  ;;  %vm983_vm11 = vcmp.ge.f32.partialorder %v545_v62, 0.0  ;;  %v1354_v4 = vpop.f32.mrb[6].mxu0 }
  0xec   :  { %v1047_v1 = vmul.f32 0.2, %v545_v62  ;;  %vm1015_vm12 = vcmp.ge.f32.partialorder %v673_v63, 0.0  ;;  %v1113_v2 = vsel %vm985_vm9, %v1353_v58, %v1049_v61  ;;  %v1079_v3 = vmul.f32 0.2, %v673_v63  ;;  %v1386_v5 = vpop.f32.mrb[6].mxu1 }
  0xed   :  { %1177 = vst [vmem:[%s1810_s4 + $0x30] sm:$0xff] %v1113_v2  ;;  %v1145_v6 = vsel %vm1017_vm10, %v1385_v59, %v1081_v0  ;;  %vm986_vm13 = vcmp.ge.f32.partialorder %v1354_v4, 0.0  ;;  %v1050_v8 = vmul.f32 0.2, %v1354_v4  ;;  %v548_v9 = vpop.f32.mrb[7].mxu0  ;;  %v676_v10 = vpop.f32.mrb[7].mxu1 }
  0xee   :  { %v1111_v7 = vsel %vm983_vm11, %v545_v62, %v1047_v1  ;;  %1209 = vst [vmem:[%s1810_s4 + $0x130] sm:$0xff] %v1145_v6  ;;  %v1143_v11 = vsel %vm1015_vm12, %v673_v63, %v1079_v3  ;;  %vm1018_vm14 = vcmp.ge.f32.partialorder %v1386_v5, 0.0  ;;  %v1082_v12 = vmul.f32 0.2, %v1386_v5 }
  0xef   :  { %1175 = vst [vmem:[%s1810_s4 + $0x20] sm:$0xff] %v1111_v7  ;;  %vm984_vm15 = vcmp.ge.f32.partialorder %v548_v9, 0.0  ;;  %1207 = vst [vmem:[%s1810_s4 + $0x120] sm:$0xff] %v1143_v11  ;;  %v1114_v13 = vsel %vm986_vm13, %v1354_v4, %v1050_v8  ;;  %v1048_v14 = vmul.f32 0.2, %v548_v9  ;;  %vm1016_vm0 = vcmp.ge.f32.partialorder %v676_v10, 0.0 }
  0xf0   :  { %v1080_v15 = vmul.f32 0.2, %v676_v10  ;;  %1178 = vst [vmem:[%s1810_s4 + $0x38] sm:$0xff] %v1114_v13  ;;  %v1146_v16 = vsel %vm1018_vm14, %v1386_v5, %v1082_v12 }
  0xf1   :  { %1210 = vst [vmem:[%s1810_s4 + $0x138] sm:$0xff] %v1146_v16  ;;  %v1112_v17 = vsel %vm984_vm15, %v548_v9, %v1048_v14  ;;  %v1357_v19 = vpop.f32.mrb[8].mxu0  ;;  %v1389_v20 = vpop.f32.mrb[8].mxu1 }
  0xf2   :  { %v1144_v18 = vsel %vm1016_vm0, %v676_v10, %v1080_v15  ;;  %1176 = vst [vmem:[%s1810_s4 + $0x28] sm:$0xff] %v1112_v17  ;;  %vm989_vm1 = vcmp.ge.f32.partialorder %v1357_v19, 0.0  ;;  %v1053_v21 = vmul.f32 0.2, %v1357_v19  ;;  %vm1021_vm2 = vcmp.ge.f32.partialorder %v1389_v20, 0.0  ;;  %v561_v23 = vpop.f32.mrb[9].mxu0 }
  0xf3   :  { %1208 = vst [vmem:[%s1810_s4 + $0x128] sm:$0xff] %v1144_v18  ;;  %v1085_v22 = vmul.f32 0.2, %v1389_v20  ;;  %v689_v24 = vpop.f32.mrb[9].mxu1  ;;  %vm987_vm3 = vcmp.ge.f32.partialorder %v561_v23, 0.0  ;;  %v1358_v28 = vpop.f32.mrb[10].mxu0 }
  0xf4   :  { %v1117_v25 = vsel %vm989_vm1, %v1357_v19, %v1053_v21  ;;  %v1051_v27 = vmul.f32 0.2, %v561_v23  ;;  %v1390_v29 = vpop.f32.mrb[10].mxu1  ;;  %vm1019_vm4 = vcmp.ge.f32.partialorder %v689_v24, 0.0  ;;  %v1083_v30 = vmul.f32 0.2, %v689_v24 }
  0xf5   :  { %v1149_v26 = vsel %vm1021_vm2, %v1389_v20, %v1085_v22  ;;  %1181 = vst [vmem:[%s1810_s4 + $0x50] sm:$0xff] %v1117_v25  ;;  %vm990_vm5 = vcmp.ge.f32.partialorder %v1358_v28, 0.0  ;;  %v1054_v31 = vmul.f32 0.2, %v1358_v28  ;;  %vm1022_vm6 = vcmp.ge.f32.partialorder %v1390_v29, 0.0  ;;  %v564_v34 = vpop.f32.mrb[11].mxu0 }
  0xf6   :  { %1213 = vst [vmem:[%s1810_s4 + $0x150] sm:$0xff] %v1149_v26  ;;  %v1115_v32 = vsel %vm987_vm3, %v561_v23, %v1051_v27  ;;  %v1086_v33 = vmul.f32 0.2, %v1390_v29  ;;  %v692_v35 = vpop.f32.mrb[11].mxu1  ;;  %v1147_v36 = vsel %vm1019_vm4, %v689_v24, %v1083_v30  ;;  %vm988_vm7 = vcmp.ge.f32.partialorder %v564_v34, 0.0 }
  0xf7   :  { %1179 = vst [vmem:[%s1810_s4 + $0x40] sm:$0xff] %v1115_v32  ;;  %v1118_v37 = vsel %vm990_vm5, %v1358_v28, %v1054_v31  ;;  %v1052_v38 = vmul.f32 0.2, %v564_v34  ;;  %1211 = vst [vmem:[%s1810_s4 + $0x140] sm:$0xff] %v1147_v36  ;;  %vm1020_vm8 = vcmp.ge.f32.partialorder %v692_v35, 0.0 }
  0xf8   :  { %1182 = vst [vmem:[%s1810_s4 + $0x58] sm:$0xff] %v1118_v37  ;;  %v1150_v39 = vsel %vm1022_vm6, %v1390_v29, %v1086_v33  ;;  %v1084_v40 = vmul.f32 0.2, %v692_v35 }
  0xf9   :  { %1214 = vst [vmem:[%s1810_s4 + $0x158] sm:$0xff] %v1150_v39  ;;  %v1116_v41 = vsel %vm988_vm7, %v564_v34, %v1052_v38  ;;  %v1361_v42 = vpop.f32.mrb[12].mxu0  ;;  %v1393_v43 = vpop.f32.mrb[12].mxu1 }
  0xfa   :  { %1180 = vst [vmem:[%s1810_s4 + $0x48] sm:$0xff] %v1116_v41  ;;  %v1148_v44 = vsel %vm1020_vm8, %v692_v35, %v1084_v40  ;;  %vm993_vm9 = vcmp.ge.f32.partialorder %v1361_v42, 0.0  ;;  %v1057_v45 = vmul.f32 0.2, %v1361_v42  ;;  %vm1025_vm10 = vcmp.ge.f32.partialorder %v1393_v43, 0.0  ;;  %v577_v46 = vpop.f32.mrb[13].mxu0 }
  0xfb   :  { %v705_v47 = vpop.f32.mrb[13].mxu1  ;;  %1212 = vst [vmem:[%s1810_s4 + $0x148] sm:$0xff] %v1148_v44  ;;  %v1089_v48 = vmul.f32 0.2, %v1393_v43  ;;  %vm991_vm11 = vcmp.ge.f32.partialorder %v577_v46, 0.0  ;;  %v1362_v52 = vpop.f32.mrb[14].mxu0 }
  0xfc   :  { %v1055_v49 = vmul.f32 0.2, %v577_v46  ;;  %vm1023_vm12 = vcmp.ge.f32.partialorder %v705_v47, 0.0  ;;  %v1121_v50 = vsel %vm993_vm9, %v1361_v42, %v1057_v45  ;;  %v1087_v51 = vmul.f32 0.2, %v705_v47  ;;  %v1394_v53 = vpop.f32.mrb[14].mxu1 }
  0xfd   :  { %1185 = vst [vmem:[%s1810_s4 + $0x70] sm:$0xff] %v1121_v50  ;;  %v1153_v54 = vsel %vm1025_vm10, %v1393_v43, %v1089_v48  ;;  %vm994_vm13 = vcmp.ge.f32.partialorder %v1362_v52, 0.0  ;;  %v1058_v56 = vmul.f32 0.2, %v1362_v52  ;;  %v580_v57 = vpop.f32.mrb[15].mxu0  ;;  %v708_v58 = vpop.f32.mrb[15].mxu1 }
  0xfe   :  { %v1119_v55 = vsel %vm991_vm11, %v577_v46, %v1055_v49  ;;  %1217 = vst [vmem:[%s1810_s4 + $0x170] sm:$0xff] %v1153_v54  ;;  %v1151_v59 = vsel %vm1023_vm12, %v705_v47, %v1087_v51  ;;  %vm1026_vm14 = vcmp.ge.f32.partialorder %v1394_v53, 0.0  ;;  %v1090_v60 = vmul.f32 0.2, %v1394_v53 }
  0xff   :  { %1183 = vst [vmem:[%s1810_s4 + $0x60] sm:$0xff] %v1119_v55  ;;  %vm992_vm15 = vcmp.ge.f32.partialorder %v580_v57, 0.0  ;;  %1215 = vst [vmem:[%s1810_s4 + $0x160] sm:$0xff] %v1151_v59  ;;  %v1122_v61 = vsel %vm994_vm13, %v1362_v52, %v1058_v56  ;;  %v1056_v62 = vmul.f32 0.2, %v580_v57  ;;  %vm1024_vm0 = vcmp.ge.f32.partialorder %v708_v58, 0.0 }
 0x100   :  { %v1088_v63 = vmul.f32 0.2, %v708_v58  ;;  %1186 = vst [vmem:[%s1810_s4 + $0x78] sm:$0xff] %v1122_v61  ;;  %v1154_v0 = vsel %vm1026_vm14, %v1394_v53, %v1090_v60 }
 0x101   :  { %1218 = vst [vmem:[%s1810_s4 + $0x178] sm:$0xff] %v1154_v0  ;;  %v1120_v1 = vsel %vm992_vm15, %v580_v57, %v1056_v62  ;;  %v1365_v3 = vpop.f32.mrb[16].mxu0  ;;  %v1397_v4 = vpop.f32.mrb[16].mxu1 }
 0x102   :  { %v1152_v2 = vsel %vm1024_vm0, %v708_v58, %v1088_v63  ;;  %1184 = vst [vmem:[%s1810_s4 + $0x68] sm:$0xff] %v1120_v1  ;;  %vm997_vm1 = vcmp.ge.f32.partialorder %v1365_v3, 0.0  ;;  %v1061_v5 = vmul.f32 0.2, %v1365_v3  ;;  %vm1029_vm2 = vcmp.ge.f32.partialorder %v1397_v4, 0.0  ;;  %v593_v7 = vpop.f32.mrb[17].mxu0 }
 0x103   :  { %1216 = vst [vmem:[%s1810_s4 + $0x168] sm:$0xff] %v1152_v2  ;;  %v1093_v6 = vmul.f32 0.2, %v1397_v4  ;;  %v721_v8 = vpop.f32.mrb[17].mxu1  ;;  %vm995_vm3 = vcmp.ge.f32.partialorder %v593_v7, 0.0  ;;  %v1366_v12 = vpop.f32.mrb[18].mxu0 }
 0x104   :  { %v1125_v9 = vsel %vm997_vm1, %v1365_v3, %v1061_v5  ;;  %v1059_v11 = vmul.f32 0.2, %v593_v7  ;;  %v1398_v13 = vpop.f32.mrb[18].mxu1  ;;  %vm1027_vm4 = vcmp.ge.f32.partialorder %v721_v8, 0.0  ;;  %v1091_v14 = vmul.f32 0.2, %v721_v8 }
 0x105   :  { %v1157_v10 = vsel %vm1029_vm2, %v1397_v4, %v1093_v6  ;;  %1189 = vst [vmem:[%s1810_s4 + $0x90] sm:$0xff] %v1125_v9  ;;  %vm998_vm5 = vcmp.ge.f32.partialorder %v1366_v12, 0.0  ;;  %v1062_v15 = vmul.f32 0.2, %v1366_v12  ;;  %vm1030_vm6 = vcmp.ge.f32.partialorder %v1398_v13, 0.0  ;;  %v596_v18 = vpop.f32.mrb[19].mxu0 }
 0x106   :  { %1221 = vst [vmem:[%s1810_s4 + $0x190] sm:$0xff] %v1157_v10  ;;  %v1123_v16 = vsel %vm995_vm3, %v593_v7, %v1059_v11  ;;  %v1094_v17 = vmul.f32 0.2, %v1398_v13  ;;  %v724_v19 = vpop.f32.mrb[19].mxu1  ;;  %v1155_v20 = vsel %vm1027_vm4, %v721_v8, %v1091_v14  ;;  %vm996_vm7 = vcmp.ge.f32.partialorder %v596_v18, 0.0 }
 0x107   :  { %1187 = vst [vmem:[%s1810_s4 + $0x80] sm:$0xff] %v1123_v16  ;;  %v1126_v21 = vsel %vm998_vm5, %v1366_v12, %v1062_v15  ;;  %v1060_v22 = vmul.f32 0.2, %v596_v18  ;;  %1219 = vst [vmem:[%s1810_s4 + $0x180] sm:$0xff] %v1155_v20  ;;  %vm1028_vm8 = vcmp.ge.f32.partialorder %v724_v19, 0.0 }
 0x108   :  { %1190 = vst [vmem:[%s1810_s4 + $0x98] sm:$0xff] %v1126_v21  ;;  %v1158_v23 = vsel %vm1030_vm6, %v1398_v13, %v1094_v17  ;;  %v1092_v24 = vmul.f32 0.2, %v724_v19 }
 0x109   :  { %1222 = vst [vmem:[%s1810_s4 + $0x198] sm:$0xff] %v1158_v23  ;;  %v1124_v25 = vsel %vm996_vm7, %v596_v18, %v1060_v22  ;;  %v1369_v26 = vpop.f32.mrb[20].mxu0  ;;  %v1401_v27 = vpop.f32.mrb[20].mxu1 }
 0x10a   :  { %1188 = vst [vmem:[%s1810_s4 + $0x88] sm:$0xff] %v1124_v25  ;;  %v1156_v28 = vsel %vm1028_vm8, %v724_v19, %v1092_v24  ;;  %vm1001_vm9 = vcmp.ge.f32.partialorder %v1369_v26, 0.0  ;;  %v1065_v29 = vmul.f32 0.2, %v1369_v26  ;;  %vm1033_vm10 = vcmp.ge.f32.partialorder %v1401_v27, 0.0  ;;  %v609_v30 = vpop.f32.mrb[21].mxu0 }
 0x10b   :  { %v737_v31 = vpop.f32.mrb[21].mxu1  ;;  %1220 = vst [vmem:[%s1810_s4 + $0x188] sm:$0xff] %v1156_v28  ;;  %v1097_v32 = vmul.f32 0.2, %v1401_v27  ;;  %vm999_vm11 = vcmp.ge.f32.partialorder %v609_v30, 0.0  ;;  %v1370_v36 = vpop.f32.mrb[22].mxu0 }
 0x10c   :  { %v1063_v33 = vmul.f32 0.2, %v609_v30  ;;  %vm1031_vm12 = vcmp.ge.f32.partialorder %v737_v31, 0.0  ;;  %v1129_v34 = vsel %vm1001_vm9, %v1369_v26, %v1065_v29  ;;  %v1095_v35 = vmul.f32 0.2, %v737_v31  ;;  %v1402_v37 = vpop.f32.mrb[22].mxu1 }
 0x10d   :  { %1193 = vst [vmem:[%s1810_s4 + $0xb0] sm:$0xff] %v1129_v34  ;;  %v1161_v38 = vsel %vm1033_vm10, %v1401_v27, %v1097_v32  ;;  %vm1002_vm13 = vcmp.ge.f32.partialorder %v1370_v36, 0.0  ;;  %v1066_v40 = vmul.f32 0.2, %v1370_v36  ;;  %v612_v41 = vpop.f32.mrb[23].mxu0  ;;  %v740_v42 = vpop.f32.mrb[23].mxu1 }
 0x10e   :  { %v1127_v39 = vsel %vm999_vm11, %v609_v30, %v1063_v33  ;;  %1225 = vst [vmem:[%s1810_s4 + $0x1b0] sm:$0xff] %v1161_v38  ;;  %v1159_v43 = vsel %vm1031_vm12, %v737_v31, %v1095_v35  ;;  %vm1034_vm14 = vcmp.ge.f32.partialorder %v1402_v37, 0.0  ;;  %v1098_v44 = vmul.f32 0.2, %v1402_v37 }
 0x10f   :  { %1191 = vst [vmem:[%s1810_s4 + $0xa0] sm:$0xff] %v1127_v39  ;;  %vm1000_vm15 = vcmp.ge.f32.partialorder %v612_v41, 0.0  ;;  %1223 = vst [vmem:[%s1810_s4 + $0x1a0] sm:$0xff] %v1159_v43  ;;  %v1130_v45 = vsel %vm1002_vm13, %v1370_v36, %v1066_v40  ;;  %v1064_v46 = vmul.f32 0.2, %v612_v41  ;;  %vm1032_vm0 = vcmp.ge.f32.partialorder %v740_v42, 0.0 }
 0x110   :  { %v1096_v47 = vmul.f32 0.2, %v740_v42  ;;  %1194 = vst [vmem:[%s1810_s4 + $0xb8] sm:$0xff] %v1130_v45  ;;  %v1162_v48 = vsel %vm1034_vm14, %v1402_v37, %v1098_v44 }
 0x111   :  { %1226 = vst [vmem:[%s1810_s4 + $0x1b8] sm:$0xff] %v1162_v48  ;;  %v1128_v49 = vsel %vm1000_vm15, %v612_v41, %v1064_v46  ;;  %v1373_v51 = vpop.f32.mrb[24].mxu0  ;;  %v1405_v52 = vpop.f32.mrb[24].mxu1 }
 0x112   :  { %v1160_v50 = vsel %vm1032_vm0, %v740_v42, %v1096_v47  ;;  %1192 = vst [vmem:[%s1810_s4 + $0xa8] sm:$0xff] %v1128_v49  ;;  %vm1005_vm1 = vcmp.ge.f32.partialorder %v1373_v51, 0.0  ;;  %v1069_v53 = vmul.f32 0.2, %v1373_v51  ;;  %vm1037_vm2 = vcmp.ge.f32.partialorder %v1405_v52, 0.0  ;;  %v625_v55 = vpop.f32.mrb[25].mxu0 }
 0x113   :  { %1224 = vst [vmem:[%s1810_s4 + $0x1a8] sm:$0xff] %v1160_v50  ;;  %v1101_v54 = vmul.f32 0.2, %v1405_v52  ;;  %v753_v56 = vpop.f32.mrb[25].mxu1  ;;  %vm1003_vm3 = vcmp.ge.f32.partialorder %v625_v55, 0.0  ;;  %v1374_v60 = vpop.f32.mrb[26].mxu0 }
 0x114   :  { %v1133_v57 = vsel %vm1005_vm1, %v1373_v51, %v1069_v53  ;;  %v1067_v59 = vmul.f32 0.2, %v625_v55  ;;  %v1406_v61 = vpop.f32.mrb[26].mxu1  ;;  %vm1035_vm4 = vcmp.ge.f32.partialorder %v753_v56, 0.0  ;;  %v1099_v62 = vmul.f32 0.2, %v753_v56 }
 0x115   :  { %v1165_v58 = vsel %vm1037_vm2, %v1405_v52, %v1101_v54  ;;  %1197 = vst [vmem:[%s1810_s4 + $0xd0] sm:$0xff] %v1133_v57  ;;  %vm1006_vm5 = vcmp.ge.f32.partialorder %v1374_v60, 0.0  ;;  %v1070_v63 = vmul.f32 0.2, %v1374_v60  ;;  %vm1038_vm6 = vcmp.ge.f32.partialorder %v1406_v61, 0.0  ;;  %v628_v2 = vpop.f32.mrb[27].mxu0 }
 0x116   :  { %1229 = vst [vmem:[%s1810_s4 + $0x1d0] sm:$0xff] %v1165_v58  ;;  %v1131_v0 = vsel %vm1003_vm3, %v625_v55, %v1067_v59  ;;  %v1102_v1 = vmul.f32 0.2, %v1406_v61  ;;  %v756_v3 = vpop.f32.mrb[27].mxu1  ;;  %v1163_v4 = vsel %vm1035_vm4, %v753_v56, %v1099_v62  ;;  %vm1004_vm7 = vcmp.ge.f32.partialorder %v628_v2, 0.0 }
 0x117   :  { %1195 = vst [vmem:[%s1810_s4 + $0xc0] sm:$0xff] %v1131_v0  ;;  %v1134_v5 = vsel %vm1006_vm5, %v1374_v60, %v1070_v63  ;;  %v1068_v6 = vmul.f32 0.2, %v628_v2  ;;  %1227 = vst [vmem:[%s1810_s4 + $0x1c0] sm:$0xff] %v1163_v4  ;;  %vm1036_vm8 = vcmp.ge.f32.partialorder %v756_v3, 0.0 }
 0x118   :  { %1198 = vst [vmem:[%s1810_s4 + $0xd8] sm:$0xff] %v1134_v5  ;;  %v1166_v7 = vsel %vm1038_vm6, %v1406_v61, %v1102_v1  ;;  %v1100_v8 = vmul.f32 0.2, %v756_v3 }
 0x119   :  { %1230 = vst [vmem:[%s1810_s4 + $0x1d8] sm:$0xff] %v1166_v7  ;;  %v1132_v9 = vsel %vm1004_vm7, %v628_v2, %v1068_v6  ;;  %v1377_v10 = vpop.f32.mrb[28].mxu0  ;;  %v1409_v11 = vpop.f32.mrb[28].mxu1 }
 0x11a   :  { %1196 = vst [vmem:[%s1810_s4 + $0xc8] sm:$0xff] %v1132_v9  ;;  %v1164_v12 = vsel %vm1036_vm8, %v756_v3, %v1100_v8  ;;  %vm1009_vm9 = vcmp.ge.f32.partialorder %v1377_v10, 0.0  ;;  %v1073_v13 = vmul.f32 0.2, %v1377_v10  ;;  %vm1041_vm10 = vcmp.ge.f32.partialorder %v1409_v11, 0.0  ;;  %v641_v14 = vpop.f32.mrb[29].mxu0 }
 0x11b   :  { %v769_v15 = vpop.f32.mrb[29].mxu1  ;;  %1228 = vst [vmem:[%s1810_s4 + $0x1c8] sm:$0xff] %v1164_v12  ;;  %v1105_v16 = vmul.f32 0.2, %v1409_v11  ;;  %vm1007_vm11 = vcmp.ge.f32.partialorder %v641_v14, 0.0  ;;  %v1378_v20 = vpop.f32.mrb[30].mxu0 }
 0x11c   :  { %v1071_v17 = vmul.f32 0.2, %v641_v14  ;;  %vm1039_vm12 = vcmp.ge.f32.partialorder %v769_v15, 0.0  ;;  %v1137_v18 = vsel %vm1009_vm9, %v1377_v10, %v1073_v13  ;;  %v1103_v19 = vmul.f32 0.2, %v769_v15  ;;  %v1410_v21 = vpop.f32.mrb[30].mxu1 }
 0x11d   :  { %1201 = vst [vmem:[%s1810_s4 + $0xf0] sm:$0xff] %v1137_v18  ;;  %v1169_v22 = vsel %vm1041_vm10, %v1409_v11, %v1105_v16  ;;  %vm1010_vm13 = vcmp.ge.f32.partialorder %v1378_v20, 0.0  ;;  %v1074_v24 = vmul.f32 0.2, %v1378_v20  ;;  %v644_v25 = vpop.f32.mrb[31].mxu0  ;;  %v772_v26 = vpop.f32.mrb[31].mxu1 }
 0x11e   :  { %v1135_v23 = vsel %vm1007_vm11, %v641_v14, %v1071_v17  ;;  %1233 = vst [vmem:[%s1810_s4 + $0x1f0] sm:$0xff] %v1169_v22  ;;  %v1167_v27 = vsel %vm1039_vm12, %v769_v15, %v1103_v19  ;;  %vm1042_vm14 = vcmp.ge.f32.partialorder %v1410_v21, 0.0  ;;  %v1106_v28 = vmul.f32 0.2, %v1410_v21 }
 0x11f   :  { %1199 = vst [vmem:[%s1810_s4 + $0xe0] sm:$0xff] %v1135_v23  ;;  %vm1008_vm15 = vcmp.ge.f32.partialorder %v644_v25, 0.0  ;;  %1231 = vst [vmem:[%s1810_s4 + $0x1e0] sm:$0xff] %v1167_v27  ;;  %v1138_v29 = vsel %vm1010_vm13, %v1378_v20, %v1074_v24  ;;  %v1072_v30 = vmul.f32 0.2, %v644_v25  ;;  %vm1040_vm0 = vcmp.ge.f32.partialorder %v772_v26, 0.0 }
 0x120   :  { %v1104_v31 = vmul.f32 0.2, %v772_v26  ;;  %1202 = vst [vmem:[%s1810_s4 + $0xf8] sm:$0xff] %v1138_v29  ;;  %v1170_v32 = vsel %vm1042_vm14, %v1410_v21, %v1106_v28 }
 0x121   :  { %1234 = vst [vmem:[%s1810_s4 + $0x1f8] sm:$0xff] %v1170_v32  ;;  %v1136_v33 = vsel %vm1008_vm15, %v644_v25, %v1072_v30 }
 0x122   :  { %v1168_v34 = vsel %vm1040_vm0, %v772_v26, %v1104_v31  ;;  %1200 = vst [vmem:[%s1810_s4 + $0xe8] sm:$0xff] %v1136_v33 }
 0x123   :  { %1232 = vst [vmem:[%s1810_s4 + $0x1e8] sm:$0xff] %v1168_v34 }

// kernel: discriminator32_forward.5
= control target key start
LH: loop header
LB: loop body
LE: loop exit
PB: predicated region body
PF: predicated region fallthrough
CT: control target
= control target key end

     0   :  { %s2632_s1 = inlined_call_operand.vmem [shape: bf16[1024,128], index: 1, kind: input, shape index: {}]   ;;  %s2633_s0 = inlined_call_operand.vmem [shape: bf16[128,1024], index: 0, kind: input, shape index: {}]   ;;  %s2634_s2 = inlined_call_operand.vmem [shape: f32[1,128], index: 2, kind: input, shape index: {}]   ;;  %s2635_s3 = inlined_call_operand.vmem [shape: f32[1,128], index: 3, kind: input, shape index: {}]   ;;  %s2636_s4 = inlined_call_operand.vmem [shape: f32[128,128], index: 4, kind: output, shape index: {}]  }
   0x1   :  { %v1955_v0 = vld [vmem:[%s2632_s1 + $0x40] sm:$0xff]   ;;  %v1959_v4 = vld [vmem:[%s2632_s1 + $0x48] sm:$0xff]   ;;  %v1963_v8 = vld [vmem:[%s2632_s1 + $0x50] sm:$0xff]  }
   0x2   :  { %v1956_v1 = vld [vmem:[%s2632_s1 + $0xc0] sm:$0xff]   ;;  %1699 = vmatprep.subr.bf16.mxu0 %v1955_v0  ;;  %v1960_v5 = vld [vmem:[%s2632_s1 + $0xc8] sm:$0xff]   ;;  %v1964_v9 = vld [vmem:[%s2632_s1 + $0xd0] sm:$0xff]  }
   0x3   :  { %v1957_v2 = vld [vmem:[%s2632_s1] sm:$0xff]   ;;  %1763 = vmatprep.subr.bf16.mxu1 %v1956_v1  ;;  %v1961_v6 = vld [vmem:[%s2632_s1 + $0x8] sm:$0xff]   ;;  %v1965_v10 = vld [vmem:[%s2632_s1 + $0x10] sm:$0xff]  }
   0x4   :  { %v1958_v3 = vld [vmem:[%s2632_s1 + $0x80] sm:$0xff]   ;;  %1700 = vmatpush3.bf16.msra.mxu0 %v1957_v2  ;;  %v1962_v7 = vld [vmem:[%s2632_s1 + $0x88] sm:$0xff]   ;;  %v1966_v11 = vld [vmem:[%s2632_s1 + $0x90] sm:$0xff]  }
   0x5   :  { %1764 = vmatpush3.bf16.msra.mxu1 %v1958_v3  ;;  %1701 = vmatprep.subr.bf16.mxu0 %v1959_v4  ;;  %v1967_v12 = vld [vmem:[%s2632_s1 + $0x58] sm:$0xff]   ;;  %v1971_v16 = vld [vmem:[%s2632_s1 + $0x60] sm:$0xff]   ;;  %v1975_v20 = vld [vmem:[%s2632_s1 + $0x68] sm:$0xff]  }
   0x6   :  { %1765 = vmatprep.subr.bf16.mxu1 %v1960_v5  ;;  %v1968_v13 = vld [vmem:[%s2632_s1 + $0xd8] sm:$0xff]   ;;  %v1972_v17 = vld [vmem:[%s2632_s1 + $0xe0] sm:$0xff]   ;;  %v1976_v21 = vld [vmem:[%s2632_s1 + $0xe8] sm:$0xff]  }
   0x7   :  { %v1969_v14 = vld [vmem:[%s2632_s1 + $0x18] sm:$0xff]   ;;  %v1973_v18 = vld [vmem:[%s2632_s1 + $0x20] sm:$0xff]   ;;  %v1977_v22 = vld [vmem:[%s2632_s1 + $0x28] sm:$0xff]  }
   0x8   :  { %1702 = vmatpush3.bf16.msra.mxu0 %v1961_v6  ;;  %v1970_v15 = vld [vmem:[%s2632_s1 + $0x98] sm:$0xff]   ;;  %v1974_v19 = vld [vmem:[%s2632_s1 + $0xa0] sm:$0xff]   ;;  %v1978_v23 = vld [vmem:[%s2632_s1 + $0xa8] sm:$0xff]  }
   0x9   :  { %1766 = vmatpush3.bf16.msra.mxu1 %v1962_v7  ;;  %1703 = vmatprep.subr.bf16.mxu0 %v1963_v8  ;;  %v1979_v24 = vld [vmem:[%s2632_s1 + $0x70] sm:$0xff]   ;;  %v1983_v28 = vld [vmem:[%s2632_s1 + $0x78] sm:$0xff]   ;;  %v54_v32 = vld [vmem:[%s2633_s0] sm:$0xff] }
   0xa   :  { %1767 = vmatprep.subr.bf16.mxu1 %v1964_v9  ;;  %v1980_v25 = vld [vmem:[%s2632_s1 + $0xf0] sm:$0xff]   ;;  %v1984_v29 = vld [vmem:[%s2632_s1 + $0xf8] sm:$0xff]   ;;  %v58_v33 = vld [vmem:[%s2633_s0 + $0x20] sm:$0xff] }
   0xb   :  { %v1981_v26 = vld [vmem:[%s2632_s1 + $0x30] sm:$0xff]   ;;  %v1985_v30 = vld [vmem:[%s2632_s1 + $0x38] sm:$0xff]   ;;  %v55_v34 = vld [vmem:[%s2633_s0 + $0x8] sm:$0xff]  ;;  %v1571_v35 = vcombine.low %v54_v32, %v58_v33  ;;  %v1572_v36 = vcombine.high %v54_v32, %v58_v33 }
   0xc   :  { %1704 = vmatpush3.bf16.msra.mxu0 %v1965_v10  ;;  %v1982_v27 = vld [vmem:[%s2632_s1 + $0xb0] sm:$0xff]   ;;  %v1986_v31 = vld [vmem:[%s2632_s1 + $0xb8] sm:$0xff]   ;;  %v59_v37 = vld [vmem:[%s2633_s0 + $0x28] sm:$0xff] }
   0xd   :  { %1768 = vmatpush3.bf16.msra.mxu1 %v1966_v11  ;;  %1705 = vmatprep.subr.bf16.mxu0 %v1967_v12  ;;  %v1573_v38 = vcombine.low %v55_v34, %v59_v37  ;;  %v1574_v39 = vcombine.high %v55_v34, %v59_v37  ;;  %v1987_v40 = vld [vmem:[%s2632_s1 + $0x140] sm:$0xff]   ;;  %v63_v47 = vld [vmem:[%s2633_s0 + $0x48] sm:$0xff]  ;;  %v1995_v62 = vld [vmem:[%s2632_s1 + $0x150] sm:$0xff]  }
   0xe   :  { %1769 = vmatprep.subr.bf16.mxu1 %v1968_v13  ;;  %982 = vmatprep.mubr.bf16.mxu0 %v1572_v36  ;;  %v1988_v41 = vld [vmem:[%s2632_s1 + $0x100] sm:$0xff]   ;;  %v67_v48 = vld [vmem:[%s2633_s0 + $0x68] sm:$0xff]  ;;  %v1996_v63 = vld [vmem:[%s2632_s1 + $0x110] sm:$0xff]  }
   0xf   :  { %1079 = vmatprep.mubr.bf16.mxu1 %v1574_v39  ;;  %v1989_v42 = vld [vmem:[%s2632_s1 + $0x1c0] sm:$0xff]   ;;  %v1582_v49 = vcombine.high %v63_v47, %v67_v48  ;;  %v1991_v50 = vld [vmem:[%s2632_s1 + $0x148] sm:$0xff]   ;;  %v1581_v53 = vcombine.low %v63_v47, %v67_v48  ;;  %v1997_v0 = vld [vmem:[%s2632_s1 + $0x1d0] sm:$0xff]  }
  0x10   :  { %1706 = vmatpush3.bf16.msra.mxu0 %v1969_v14  ;;  %v1990_v43 = vld [vmem:[%s2632_s1 + $0x180] sm:$0xff]   ;;  %v1992_v52 = vld [vmem:[%s2632_s1 + $0x108] sm:$0xff]   ;;  %v1998_v1 = vld [vmem:[%s2632_s1 + $0x190] sm:$0xff]  }
  0x11   :  { %1770 = vmatpush3.bf16.msra.mxu1 %v1970_v15  ;;  %1707 = vmatprep.subr.bf16.mxu0 %v1971_v16  ;;  %v62_v44 = vld [vmem:[%s2633_s0 + $0x40] sm:$0xff]  ;;  %v1993_v54 = vld [vmem:[%s2632_s1 + $0x1c8] sm:$0xff]   ;;  %v1999_v10 = vld [vmem:[%s2632_s1 + $0x158] sm:$0xff]  }
  0x12   :  { %1771 = vmatprep.subr.bf16.mxu1 %v1972_v17  ;;  %v66_v45 = vld [vmem:[%s2633_s0 + $0x60] sm:$0xff]  ;;  %v1994_v55 = vld [vmem:[%s2632_s1 + $0x188] sm:$0xff]   ;;  %v2000_v11 = vld [vmem:[%s2632_s1 + $0x118] sm:$0xff]  }
  0x13   :  { %v1580_v46 = vcombine.high %v62_v44, %v66_v45  ;;  %v1579_v51 = vcombine.low %v62_v44, %v66_v45  ;;  %v70_v56 = vld [vmem:[%s2633_s0 + $0x80] sm:$0xff]  ;;  %v71_v58 = vld [vmem:[%s2633_s0 + $0x88] sm:$0xff]  ;;  %v2001_v12 = vld [vmem:[%s2632_s1 + $0x1d8] sm:$0xff]  }
  0x14   :  { %1708 = vmatpush3.bf16.msra.mxu0 %v1973_v18  ;;  %v74_v57 = vld [vmem:[%s2633_s0 + $0xa0] sm:$0xff]  ;;  %v75_v59 = vld [vmem:[%s2633_s0 + $0xa8] sm:$0xff]  ;;  %v2002_v13 = vld [vmem:[%s2632_s1 + $0x198] sm:$0xff]  }
  0x15   :  { %1772 = vmatpush3.bf16.msra.mxu1 %v1974_v19  ;;  %1709 = vmatprep.subr.bf16.mxu0 %v1975_v20  ;;  %v1588_v60 = vcombine.high %v70_v56, %v74_v57  ;;  %v1590_v61 = vcombine.high %v71_v58, %v75_v59  ;;  %v1587_v2 = vcombine.low %v70_v56, %v74_v57  ;;  %v78_v3 = vld [vmem:[%s2633_s0 + $0xc0] sm:$0xff]  ;;  %v79_v5 = vld [vmem:[%s2633_s0 + $0xc8] sm:$0xff]  ;;  %v2012_v39 = vld [vmem:[%s2632_s1 + $0x130] sm:$0xff]  }
  0x16   :  { %1773 = vmatprep.subr.bf16.mxu1 %v1976_v21  ;;  %v82_v4 = vld [vmem:[%s2633_s0 + $0xe0] sm:$0xff]  ;;  %v1589_v6 = vcombine.low %v71_v58, %v75_v59  ;;  %v83_v8 = vld [vmem:[%s2633_s0 + $0xe8] sm:$0xff]  ;;  %v2016_v48 = vld [vmem:[%s2632_s1 + $0x138] sm:$0xff]  }
  0x17   :  { %v1596_v7 = vcombine.high %v78_v3, %v82_v4  ;;  %v1598_v9 = vcombine.high %v79_v5, %v83_v8  ;;  %v86_v14 = vld [vmem:[%s2633_s0 + $0x100] sm:$0xff]  ;;  %v87_v16 = vld [vmem:[%s2633_s0 + $0x108] sm:$0xff]  ;;  %v1595_v19 = vcombine.low %v78_v3, %v82_v4  ;;  %v1597_v21 = vcombine.low %v79_v5, %v83_v8  ;;  %v65_v8 = vld [vmem:[%s2633_s0 + $0x58] sm:$0xff] }
  0x18   :  { %1710 = vmatpush3.bf16.msra.mxu0 %v1977_v22  ;;  %v90_v15 = vld [vmem:[%s2633_s0 + $0x120] sm:$0xff]  ;;  %v91_v17 = vld [vmem:[%s2633_s0 + $0x128] sm:$0xff] }
  0x19   :  { %1774 = vmatpush3.bf16.msra.mxu1 %v1978_v23  ;;  %1711 = vmatprep.subr.bf16.mxu0 %v1979_v24  ;;  %v2003_v18 = vld [vmem:[%s2632_s1 + $0x160] sm:$0xff]   ;;  %v1604_v22 = vcombine.high %v86_v14, %v90_v15  ;;  %v1606_v24 = vcombine.high %v87_v16, %v91_v17  ;;  %v2009_v32 = vld [vmem:[%s2632_s1 + $0x1e8] sm:$0xff]   ;;  %v1603_v34 = vcombine.low %v86_v14, %v90_v15  ;;  %v72_v14 = vld [vmem:[%s2633_s0 + $0x90] sm:$0xff] }
  0x1a   :  { %1775 = vmatprep.subr.bf16.mxu1 %v1980_v25  ;;  %v2004_v20 = vld [vmem:[%s2632_s1 + $0x120] sm:$0xff]   ;;  %v2010_v33 = vld [vmem:[%s2632_s1 + $0x1a8] sm:$0xff]   ;;  %v76_v15 = vld [vmem:[%s2633_s0 + $0xb0] sm:$0xff] }
  0x1b   :  { %v2005_v23 = vld [vmem:[%s2632_s1 + $0x1e0] sm:$0xff]   ;;  %v103_v44 = vld [vmem:[%s2633_s0 + $0x188] sm:$0xff] }
  0x1c   :  { %1712 = vmatpush3.bf16.msra.mxu0 %v1981_v26  ;;  %v2006_v25 = vld [vmem:[%s2632_s1 + $0x1a0] sm:$0xff]   ;;  %v107_v45 = vld [vmem:[%s2633_s0 + $0x1a8] sm:$0xff] }
  0x1d   :  { %1776 = vmatpush3.bf16.msra.mxu1 %v1982_v27  ;;  %1713 = vmatprep.subr.bf16.mxu0 %v1983_v28  ;;  %v94_v26 = vld [vmem:[%s2633_s0 + $0x140] sm:$0xff]  ;;  %v2007_v28 = vld [vmem:[%s2632_s1 + $0x168] sm:$0xff]   ;;  %v1621_v59 = vcombine.low %v103_v44, %v107_v45 }
  0x1e   :  { %1777 = vmatprep.subr.bf16.mxu1 %v1984_v29  ;;  %v98_v27 = vld [vmem:[%s2633_s0 + $0x160] sm:$0xff]  ;;  %v95_v29 = vld [vmem:[%s2633_s0 + $0x148] sm:$0xff] }
  0x1f   :  { %v1612_v36 = vcombine.high %v94_v26, %v98_v27  ;;  %v1611_v47 = vcombine.low %v94_v26, %v98_v27  ;;  %v111_v56 = vld [vmem:[%s2633_s0 + $0x1c8] sm:$0xff]  ;;  %v1591_v26 = vcombine.low %v72_v14, %v76_v15 }
  0x20   :  { %1714 = vmatpush3.bf16.msra.mxu0 %v1985_v30  ;;  %v99_v30 = vld [vmem:[%s2633_s0 + $0x168] sm:$0xff] }
  0x21   :  { %1778 = vmatpush3.bf16.msra.mxu1 %v1986_v31  ;;  %1827 = vmatprep.subr.bf16.mxu0 %v1987_v40  ;;  %v2008_v31 = vld [vmem:[%s2632_s1 + $0x128] sm:$0xff]   ;;  %v1614_v37 = vcombine.high %v95_v29, %v99_v30  ;;  %v2013_v40 = vld [vmem:[%s2632_s1 + $0x1f0] sm:$0xff]  }
  0x22   :  { %1891 = vmatprep.subr.bf16.mxu1 %v1989_v42  ;;  %v106_v42 = vld [vmem:[%s2633_s0 + $0x1a0] sm:$0xff]  ;;  %v115_v57 = vld [vmem:[%s2633_s0 + $0x1e8] sm:$0xff] }
  0x23   :  { %983 = vmatmul.mubr.bf16.vlgmr.msra.gmra.mrb[0].mxu0 %v1571_v35  ;;  %v1605_v35 = vcombine.low %v87_v16, %v91_v17  ;;  %v1629_v3 = vcombine.low %v111_v56, %v115_v57  ;;  %v73_v16 = vld [vmem:[%s2633_s0 + $0x98] sm:$0xff] }
  0x24   :  { %1080 = vmatmul.mubr.bf16.vlgmr.msra.gmra.mrb[0].mxu1 %v1573_v38  ;;  %1828 = vmatpush3.bf16.msra.mxu0 %v1988_v41  ;;  %v2011_v38 = vld [vmem:[%s2632_s1 + $0x170] sm:$0xff]   ;;  %v102_v41 = vld [vmem:[%s2633_s0 + $0x180] sm:$0xff]  ;;  %v77_v17 = vld [vmem:[%s2633_s0 + $0xb8] sm:$0xff] }
  0x25   :  { %1892 = vmatpush3.bf16.msra.mxu1 %v1990_v43  ;;  %990 = vmatprep.mubr.bf16.mxu0 %v1580_v46  ;;  %v2014_v43 = vld [vmem:[%s2632_s1 + $0x1b0] sm:$0xff]   ;;  %v2015_v46 = vld [vmem:[%s2632_s1 + $0x178] sm:$0xff]   ;;  %v1619_v58 = vcombine.low %v102_v41, %v106_v42  ;;  %v1593_v27 = vcombine.low %v73_v16, %v77_v17 }
  0x26   :  { %1087 = vmatprep.mubr.bf16.mxu1 %v1582_v49  ;;  %1829 = vmatprep.subr.bf16.mxu0 %v1991_v50  ;;  %v1613_v49 = vcombine.low %v95_v29, %v99_v30  ;;  %v1620_v50 = vcombine.high %v102_v41, %v106_v42  ;;  %v88_v30 = vld [vmem:[%s2633_s0 + $0x110] sm:$0xff]  ;;  %v101_v41 = vld [vmem:[%s2633_s0 + $0x178] sm:$0xff] }
  0x27   :  { %1893 = vmatprep.subr.bf16.mxu1 %v1993_v54  ;;  %v110_v54 = vld [vmem:[%s2633_s0 + $0x1c0] sm:$0xff] }
  0x28   :  { %1830 = vmatpush3.bf16.msra.mxu0 %v1992_v52  ;;  %v1622_v52 = vcombine.high %v103_v44, %v107_v45 }
  0x29   :  { %1894 = vmatpush3.bf16.msra.mxu1 %v1994_v55  ;;  %1831 = vmatprep.subr.bf16.mxu0 %v1995_v62  ;;  %v114_v55 = vld [vmem:[%s2633_s0 + $0x1e0] sm:$0xff]  ;;  %v56_v62 = vld [vmem:[%s2633_s0 + $0x10] sm:$0xff] }
  0x2a   :  { %1895 = vmatprep.subr.bf16.mxu1 %v1997_v0  ;;  %v57_v0 = vld [vmem:[%s2633_s0 + $0x18] sm:$0xff] }
  0x2b   :  { %991 = vmatmul.mubr.bf16.gmra.mrb[4].mxu0 %v1579_v51  ;;  %v2017_v51 = vld [vmem:[%s2632_s1 + $0x1f8] sm:$0xff]  }
  0x2c   :  { %1088 = vmatmul.mubr.bf16.gmra.mrb[4].mxu1 %v1581_v53  ;;  %998 = vmatprep.mubr.bf16.mxu0 %v1588_v60  ;;  %v2018_v53 = vld [vmem:[%s2632_s1 + $0x1b8] sm:$0xff]   ;;  %v1628_v60 = vcombine.high %v110_v54, %v114_v55 }
  0x2d   :  { %1095 = vmatprep.mubr.bf16.mxu1 %v1590_v61  ;;  %1832 = vmatpush3.bf16.msra.mxu0 %v1996_v63  ;;  %v1630_v61 = vcombine.high %v111_v56, %v115_v57  ;;  %v60_v63 = vld [vmem:[%s2633_s0 + $0x30] sm:$0xff]  ;;  %v113_v56 = vld [vmem:[%s2633_s0 + $0x1d8] sm:$0xff] }
  0x2e   :  { %1896 = vmatpush3.bf16.msra.mxu1 %v1998_v1  ;;  %1833 = vmatprep.subr.bf16.mxu0 %v1999_v10  ;;  %v61_v1 = vld [vmem:[%s2633_s0 + $0x38] sm:$0xff]  ;;  %v1576_v4 = vcombine.high %v56_v62, %v60_v63  ;;  %v1575_v10 = vcombine.low %v56_v62, %v60_v63 }
  0x2f   :  { %1897 = vmatprep.subr.bf16.mxu1 %v2001_v12  ;;  %v1578_v5 = vcombine.high %v57_v0, %v61_v1  ;;  %v117_v57 = vld [vmem:[%s2633_s0 + $0x1f8] sm:$0xff] }
  0x30   :  { %v1633_v63 = vcombine.low %v113_v56, %v117_v57 }
  0x31   :  { %1834 = vmatpush3.bf16.msra.mxu0 %v2000_v11  ;;  %v1577_v11 = vcombine.low %v57_v0, %v61_v1 }
  0x32   :  { %1898 = vmatpush3.bf16.msra.mxu1 %v2002_v13  ;;  %1835 = vmatprep.subr.bf16.mxu0 %v2003_v18 }
  0x33   :  { %999 = vmatmul.mubr.bf16.gmra.mrb[8].mxu0 %v1587_v2  ;;  %1899 = vmatprep.subr.bf16.mxu1 %v2005_v23  ;;  %v1627_v2 = vcombine.low %v110_v54, %v114_v55  ;;  %v84_v23 = vld [vmem:[%s2633_s0 + $0xf0] sm:$0xff] }
  0x34   :  { %1096 = vmatmul.mubr.bf16.gmra.mrb[8].mxu1 %v1589_v6  ;;  %1006 = vmatprep.mubr.bf16.mxu0 %v1596_v7  ;;  %v64_v6 = vld [vmem:[%s2633_s0 + $0x50] sm:$0xff] }
  0x35   :  { %1103 = vmatprep.mubr.bf16.mxu1 %v1598_v9  ;;  %1836 = vmatpush3.bf16.msra.mxu0 %v2004_v20  ;;  %v68_v7 = vld [vmem:[%s2633_s0 + $0x70] sm:$0xff]  ;;  %v69_v9 = vld [vmem:[%s2633_s0 + $0x78] sm:$0xff]  ;;  %v1592_v20 = vcombine.high %v72_v14, %v76_v15 }
  0x36   :  { %1900 = vmatpush3.bf16.msra.mxu1 %v2006_v25  ;;  %1837 = vmatprep.subr.bf16.mxu0 %v2007_v28  ;;  %v1584_v12 = vcombine.high %v64_v6, %v68_v7  ;;  %v1586_v13 = vcombine.high %v65_v8, %v69_v9  ;;  %v1583_v18 = vcombine.low %v64_v6, %v68_v7  ;;  %v85_v25 = vld [vmem:[%s2633_s0 + $0xf8] sm:$0xff]  ;;  %v112_v54 = vld [vmem:[%s2633_s0 + $0x1d0] sm:$0xff] }
  0x37   :  { %1901 = vmatprep.subr.bf16.mxu1 %v2009_v32  ;;  %v89_v32 = vld [vmem:[%s2633_s0 + $0x118] sm:$0xff]  ;;  %v116_v55 = vld [vmem:[%s2633_s0 + $0x1f0] sm:$0xff] }
  0x38   :  { %v1631_v62 = vcombine.low %v112_v54, %v116_v55 }
  0x39   :  { %1838 = vmatpush3.bf16.msra.mxu0 %v2008_v31  ;;  %v92_v31 = vld [vmem:[%s2633_s0 + $0x130] sm:$0xff] }
  0x3a   :  { %1902 = vmatpush3.bf16.msra.mxu1 %v2010_v33  ;;  %1839 = vmatprep.subr.bf16.mxu0 %v2011_v38  ;;  %v93_v33 = vld [vmem:[%s2633_s0 + $0x138] sm:$0xff]  ;;  %v96_v38 = vld [vmem:[%s2633_s0 + $0x150] sm:$0xff]  ;;  %v1607_v42 = vcombine.low %v88_v30, %v92_v31 }
  0x3b   :  { %1007 = vmatmul.mubr.bf16.gmra.mrb[12].mxu0 %v1595_v19  ;;  %1903 = vmatprep.subr.bf16.mxu1 %v2013_v40  ;;  %v1585_v19 = vcombine.low %v65_v8, %v69_v9  ;;  %v97_v40 = vld [vmem:[%s2633_s0 + $0x158] sm:$0xff] }
  0x3c   :  { %1104 = vmatmul.mubr.bf16.gmra.mrb[12].mxu1 %v1597_v21  ;;  %1014 = vmatprep.mubr.bf16.mxu0 %v1604_v22  ;;  %v1594_v21 = vcombine.high %v73_v16, %v77_v17  ;;  %v80_v22 = vld [vmem:[%s2633_s0 + $0xd0] sm:$0xff]  ;;  %v1618_v45 = vcombine.high %v97_v40, %v101_v41 }
  0x3d   :  { %1111 = vmatprep.mubr.bf16.mxu1 %v1606_v24  ;;  %1840 = vmatpush3.bf16.msra.mxu0 %v2012_v39  ;;  %v81_v24 = vld [vmem:[%s2633_s0 + $0xd8] sm:$0xff]  ;;  %v1600_v28 = vcombine.high %v80_v22, %v84_v23  ;;  %v100_v39 = vld [vmem:[%s2633_s0 + $0x170] sm:$0xff] }
  0x3e   :  { %1904 = vmatpush3.bf16.msra.mxu1 %v2014_v43  ;;  %1841 = vmatprep.subr.bf16.mxu0 %v2015_v46  ;;  %v1602_v29 = vcombine.high %v81_v24, %v85_v25  ;;  %v1609_v43 = vcombine.low %v89_v32, %v93_v33  ;;  %v1616_v44 = vcombine.high %v96_v38, %v100_v39  ;;  %v104_v46 = vld [vmem:[%s2633_s0 + $0x190] sm:$0xff] }
  0x3f   :  { %1905 = vmatprep.subr.bf16.mxu1 %v2017_v51  ;;  %v1617_v51 = vcombine.low %v97_v40, %v101_v41 }
  0x41   :  { %1842 = vmatpush3.bf16.msra.mxu0 %v2016_v48  ;;  %v105_v48 = vld [vmem:[%s2633_s0 + $0x198] sm:$0xff] }
  0x42   :  { %1906 = vmatpush3.bf16.msra.mxu1 %v2018_v53 }
  0x43   :  { %1015 = vmatmul.mubr.bf16.gmra.mrb[16].mxu0 %v1603_v34  ;;  %v1599_v34 = vcombine.low %v80_v22, %v84_v23 }
  0x44   :  { %1112 = vmatmul.mubr.bf16.gmra.mrb[16].mxu1 %v1605_v35  ;;  %1022 = vmatprep.mubr.bf16.mxu0 %v1612_v36  ;;  %v1601_v35 = vcombine.low %v81_v24, %v85_v25  ;;  %v1608_v36 = vcombine.high %v88_v30, %v92_v31 }
  0x45   :  { %1119 = vmatprep.mubr.bf16.mxu1 %v1614_v37  ;;  %v1610_v37 = vcombine.high %v89_v32, %v93_v33 }
  0x4b   :  { %1023 = vmatmul.mubr.bf16.gmra.mrb[20].mxu0 %v1611_v47  ;;  %v108_v47 = vld [vmem:[%s2633_s0 + $0x1b0] sm:$0xff] }
  0x4c   :  { %1120 = vmatmul.mubr.bf16.gmra.mrb[20].mxu1 %v1613_v49  ;;  %1030 = vmatprep.mubr.bf16.mxu0 %v1620_v50  ;;  %v109_v49 = vld [vmem:[%s2633_s0 + $0x1b8] sm:$0xff]  ;;  %v1615_v50 = vcombine.low %v96_v38, %v100_v39 }
  0x4d   :  { %1127 = vmatprep.mubr.bf16.mxu1 %v1622_v52  ;;  %v1624_v52 = vcombine.high %v104_v46, %v108_v47  ;;  %v1626_v53 = vcombine.high %v105_v48, %v109_v49 }
  0x53   :  { %1031 = vmatmul.mubr.bf16.gmra.mrb[24].mxu0 %v1619_v58  ;;  %v1623_v58 = vcombine.low %v104_v46, %v108_v47 }
  0x54   :  { %1128 = vmatmul.mubr.bf16.gmra.mrb[24].mxu1 %v1621_v59  ;;  %1038 = vmatprep.mubr.bf16.mxu0 %v1628_v60  ;;  %v1625_v59 = vcombine.low %v105_v48, %v109_v49  ;;  %v1632_v60 = vcombine.high %v112_v54, %v116_v55 }
  0x55   :  { %1135 = vmatprep.mubr.bf16.mxu1 %v1630_v61  ;;  %v1634_v61 = vcombine.high %v113_v56, %v117_v57 }
  0x5b   :  { %1039 = vmatmul.mubr.bf16.gmra.mrb[28].mxu0 %v1627_v2 }
  0x5c   :  { %1136 = vmatmul.mubr.bf16.gmra.mrb[28].mxu1 %v1629_v3  ;;  %1176 = vmatprep.mubr.bf16.mxu0 %v1576_v4 }
  0x5d   :  { %1273 = vmatprep.mubr.bf16.mxu1 %v1578_v5 }
  0x63   :  { %1177 = vmatmul.mubr.bf16.vlgmr.msra.gmra.mrb[32].mxu0 %v1575_v10 }
  0x64   :  { %1274 = vmatmul.mubr.bf16.vlgmr.msra.gmra.mrb[32].mxu1 %v1577_v11  ;;  %1184 = vmatprep.mubr.bf16.mxu0 %v1584_v12 }
  0x65   :  { %1281 = vmatprep.mubr.bf16.mxu1 %v1586_v13 }
  0x6b   :  { %1185 = vmatmul.mubr.bf16.gmra.mrb[36].mxu0 %v1583_v18 }
  0x6c   :  { %1282 = vmatmul.mubr.bf16.gmra.mrb[36].mxu1 %v1585_v19  ;;  %1192 = vmatprep.mubr.bf16.mxu0 %v1592_v20 }
  0x6d   :  { %1289 = vmatprep.mubr.bf16.mxu1 %v1594_v21 }
  0x73   :  { %1193 = vmatmul.mubr.bf16.gmra.mrb[40].mxu0 %v1591_v26 }
  0x74   :  { %1290 = vmatmul.mubr.bf16.gmra.mrb[40].mxu1 %v1593_v27  ;;  %1200 = vmatprep.mubr.bf16.mxu0 %v1600_v28 }
  0x75   :  { %1297 = vmatprep.mubr.bf16.mxu1 %v1602_v29 }
  0x7b   :  { %1201 = vmatmul.mubr.bf16.gmra.mrb[44].mxu0 %v1599_v34 }
  0x7c   :  { %1298 = vmatmul.mubr.bf16.gmra.mrb[44].mxu1 %v1601_v35  ;;  %1208 = vmatprep.mubr.bf16.mxu0 %v1608_v36 }
  0x7d   :  { %1305 = vmatprep.mubr.bf16.mxu1 %v1610_v37 }
  0x83   :  { %1209 = vmatmul.mubr.bf16.gmra.mrb[48].mxu0 %v1607_v42 }
  0x84   :  { %1306 = vmatmul.mubr.bf16.gmra.mrb[48].mxu1 %v1609_v43  ;;  %1216 = vmatprep.mubr.bf16.mxu0 %v1616_v44 }
  0x85   :  { %1313 = vmatprep.mubr.bf16.mxu1 %v1618_v45 }
  0x8b   :  { %1217 = vmatmul.mubr.bf16.gmra.mrb[52].mxu0 %v1615_v50 }
  0x8c   :  { %1314 = vmatmul.mubr.bf16.gmra.mrb[52].mxu1 %v1617_v51  ;;  %1224 = vmatprep.mubr.bf16.mxu0 %v1624_v52 }
  0x8d   :  { %1321 = vmatprep.mubr.bf16.mxu1 %v1626_v53 }
  0x93   :  { %1225 = vmatmul.mubr.bf16.gmra.mrb[56].mxu0 %v1623_v58 }
  0x94   :  { %1322 = vmatmul.mubr.bf16.gmra.mrb[56].mxu1 %v1625_v59  ;;  %1232 = vmatprep.mubr.bf16.mxu0 %v1632_v60 }
  0x95   :  { %1329 = vmatprep.mubr.bf16.mxu1 %v1634_v61 }
  0x9b   :  { %1233 = vmatmul.mubr.bf16.gmra.mrb[60].mxu0 %v1631_v62 }
  0x9c   :  { %1330 = vmatmul.mubr.bf16.gmra.mrb[60].mxu1 %v1633_v63 }
  0xf6   :  { %v1715_v0 = vpop.f32.mrb[0].mxu0 }
  0xf7   :  { %v1779_v1 = vpop.f32.mrb[0].mxu1  ;;  %v1716_v2 = vpop.f32.mrb[1].mxu0 }
  0xf8   :  { %v1717_v3 = vadd.f32 %v1716_v2, %v1715_v0  ;;  %v1780_v4 = vpop.f32.mrb[1].mxu1  ;;  %v1718_v5 = vpop.f32.mrb[2].mxu0 }
  0xf9   :  { %v1781_v6 = vadd.f32 %v1780_v4, %v1779_v1  ;;  %v1782_v7 = vpop.f32.mrb[2].mxu1  ;;  %v1719_v8 = vpop.f32.mrb[3].mxu0 }
  0xfa   :  { %v1720_v9 = vadd.f32 %v1719_v8, %v1718_v5  ;;  %v1783_v10 = vpop.f32.mrb[3].mxu1 }
  0xfb   :  { %v2430_v11 = vadd.f32 %v1781_v6, %v1717_v3  ;;  %v1784_v12 = vadd.f32 %v1783_v10, %v1782_v7 }
  0xfd   :  { %v2432_v13 = vadd.f32 %v1784_v12, %v1720_v9 }
  0xfe   :  { %v1721_v14 = vpop.f32.mrb[4].mxu0 }
  0xff   :  { %v1785_v15 = vpop.f32.mrb[4].mxu1  ;;  %v1722_v16 = vpop.f32.mrb[5].mxu0 }
 0x100   :  { %v1723_v17 = vadd.f32 %v1722_v16, %v1721_v14  ;;  %v1786_v18 = vpop.f32.mrb[5].mxu1  ;;  %v1724_v19 = vpop.f32.mrb[6].mxu0 }
 0x101   :  { %v1787_v20 = vadd.f32 %v1786_v18, %v1785_v15  ;;  %v1788_v21 = vpop.f32.mrb[6].mxu1  ;;  %v1725_v22 = vpop.f32.mrb[7].mxu0 }
 0x102   :  { %v1726_v23 = vadd.f32 %v1725_v22, %v1724_v19  ;;  %v1789_v24 = vpop.f32.mrb[7].mxu1 }
 0x103   :  { %v2434_v25 = vadd.f32 %v1787_v20, %v1723_v17  ;;  %v1790_v26 = vadd.f32 %v1789_v24, %v1788_v21 }
 0x105   :  { %v2436_v27 = vadd.f32 %v1790_v26, %v1726_v23 }
 0x106   :  { %v1727_v28 = vpop.f32.mrb[8].mxu0 }
 0x107   :  { %v1791_v29 = vpop.f32.mrb[8].mxu1  ;;  %v1728_v30 = vpop.f32.mrb[9].mxu0 }
 0x108   :  { %v1729_v31 = vadd.f32 %v1728_v30, %v1727_v28  ;;  %v1792_v32 = vpop.f32.mrb[9].mxu1  ;;  %v1730_v33 = vpop.f32.mrb[10].mxu0 }
 0x109   :  { %v1793_v34 = vadd.f32 %v1792_v32, %v1791_v29  ;;  %v1794_v35 = vpop.f32.mrb[10].mxu1  ;;  %v1731_v36 = vpop.f32.mrb[11].mxu0 }
 0x10a   :  { %v1732_v37 = vadd.f32 %v1731_v36, %v1730_v33  ;;  %v1795_v38 = vpop.f32.mrb[11].mxu1 }
 0x10b   :  { %v2438_v39 = vadd.f32 %v1793_v34, %v1729_v31  ;;  %v1796_v40 = vadd.f32 %v1795_v38, %v1794_v35 }
 0x10d   :  { %v2440_v41 = vadd.f32 %v1796_v40, %v1732_v37 }
 0x10e   :  { %v1733_v42 = vpop.f32.mrb[12].mxu0 }
 0x10f   :  { %v1797_v43 = vpop.f32.mrb[12].mxu1  ;;  %v1734_v44 = vpop.f32.mrb[13].mxu0 }
 0x110   :  { %v1735_v45 = vadd.f32 %v1734_v44, %v1733_v42  ;;  %v1798_v46 = vpop.f32.mrb[13].mxu1  ;;  %v1736_v47 = vpop.f32.mrb[14].mxu0 }
 0x111   :  { %v1799_v48 = vadd.f32 %v1798_v46, %v1797_v43  ;;  %v1800_v49 = vpop.f32.mrb[14].mxu1  ;;  %v1737_v50 = vpop.f32.mrb[15].mxu0 }
 0x112   :  { %v1738_v51 = vadd.f32 %v1737_v50, %v1736_v47  ;;  %v1801_v52 = vpop.f32.mrb[15].mxu1 }
 0x113   :  { %v2442_v53 = vadd.f32 %v1799_v48, %v1735_v45  ;;  %v1802_v54 = vadd.f32 %v1801_v52, %v1800_v49 }
 0x115   :  { %v2444_v55 = vadd.f32 %v1802_v54, %v1738_v51 }
 0x116   :  { %v1739_v56 = vpop.f32.mrb[16].mxu0 }
 0x117   :  { %v1803_v57 = vpop.f32.mrb[16].mxu1  ;;  %v1740_v58 = vpop.f32.mrb[17].mxu0 }
 0x118   :  { %v1741_v59 = vadd.f32 %v1740_v58, %v1739_v56  ;;  %v1804_v60 = vpop.f32.mrb[17].mxu1  ;;  %v1742_v61 = vpop.f32.mrb[18].mxu0 }
 0x119   :  { %v1805_v62 = vadd.f32 %v1804_v60, %v1803_v57  ;;  %v1806_v63 = vpop.f32.mrb[18].mxu1  ;;  %v1743_v0 = vpop.f32.mrb[19].mxu0 }
 0x11a   :  { %v1744_v1 = vadd.f32 %v1743_v0, %v1742_v61  ;;  %v1807_v2 = vpop.f32.mrb[19].mxu1 }
 0x11b   :  { %v2446_v3 = vadd.f32 %v1805_v62, %v1741_v59  ;;  %v1808_v4 = vadd.f32 %v1807_v2, %v1806_v63 }
 0x11d   :  { %v2448_v5 = vadd.f32 %v1808_v4, %v1744_v1 }
 0x11e   :  { %v1745_v6 = vpop.f32.mrb[20].mxu0 }
 0x11f   :  { %v1809_v7 = vpop.f32.mrb[20].mxu1  ;;  %v1746_v8 = vpop.f32.mrb[21].mxu0 }
 0x120   :  { %v1747_v9 = vadd.f32 %v1746_v8, %v1745_v6  ;;  %v1810_v10 = vpop.f32.mrb[21].mxu1  ;;  %v1748_v12 = vpop.f32.mrb[22].mxu0 }
 0x121   :  { %v1811_v14 = vadd.f32 %v1810_v10, %v1809_v7  ;;  %v1812_v15 = vpop.f32.mrb[22].mxu1  ;;  %v1749_v16 = vpop.f32.mrb[23].mxu0 }
 0x122   :  { %v1750_v17 = vadd.f32 %v1749_v16, %v1748_v12  ;;  %v1813_v18 = vpop.f32.mrb[23].mxu1 }
 0x123   :  { %v2450_v19 = vadd.f32 %v1811_v14, %v1747_v9  ;;  %v1814_v20 = vadd.f32 %v1813_v18, %v1812_v15 }
 0x125   :  { %v2452_v21 = vadd.f32 %v1814_v20, %v1750_v17 }
 0x126   :  { %v1751_v22 = vpop.f32.mrb[24].mxu0 }
 0x127   :  { %v1815_v23 = vpop.f32.mrb[24].mxu1  ;;  %v1752_v24 = vpop.f32.mrb[25].mxu0 }
 0x128   :  { %v1753_v26 = vadd.f32 %v1752_v24, %v1751_v22  ;;  %v1816_v28 = vpop.f32.mrb[25].mxu1  ;;  %v1754_v29 = vpop.f32.mrb[26].mxu0 }
 0x129   :  { %v1817_v30 = vadd.f32 %v1816_v28, %v1815_v23  ;;  %v1818_v31 = vpop.f32.mrb[26].mxu1  ;;  %v1755_v32 = vpop.f32.mrb[27].mxu0 }
 0x12a   :  { %v1756_v33 = vadd.f32 %v1755_v32, %v1754_v29  ;;  %v1819_v34 = vpop.f32.mrb[27].mxu1 }
 0x12b   :  { %v2454_v35 = vadd.f32 %v1817_v30, %v1753_v26  ;;  %v1820_v36 = vadd.f32 %v1819_v34, %v1818_v31 }
 0x12d   :  { %v2456_v37 = vadd.f32 %v1820_v36, %v1756_v33 }
 0x12e   :  { %v1757_v38 = vpop.f32.mrb[28].mxu0 }
 0x12f   :  { %v1821_v40 = vpop.f32.mrb[28].mxu1  ;;  %v1758_v42 = vpop.f32.mrb[29].mxu0 }
 0x130   :  { %v1759_v43 = vadd.f32 %v1758_v42, %v1757_v38  ;;  %v1822_v44 = vpop.f32.mrb[29].mxu1  ;;  %v1760_v45 = vpop.f32.mrb[30].mxu0 }
 0x131   :  { %v1823_v46 = vadd.f32 %v1822_v44, %v1821_v40  ;;  %v1824_v47 = vpop.f32.mrb[30].mxu1  ;;  %v1761_v48 = vpop.f32.mrb[31].mxu0 }
 0x132   :  { %v1762_v49 = vadd.f32 %v1761_v48, %v1760_v45  ;;  %v1825_v50 = vpop.f32.mrb[31].mxu1 }
 0x133   :  { %v2458_v51 = vadd.f32 %v1823_v46, %v1759_v43  ;;  %v1826_v52 = vadd.f32 %v1825_v50, %v1824_v47 }
 0x135   :  { %v2460_v54 = vadd.f32 %v1826_v52, %v1762_v49 }
 0x136   :  { %v1843_v56 = vpop.f32.mrb[32].mxu0 }
 0x137   :  { %v1907_v57 = vpop.f32.mrb[32].mxu1  ;;  %v1844_v58 = vpop.f32.mrb[33].mxu0 }
 0x138   :  { %v1845_v59 = vadd.f32 %v1844_v58, %v1843_v56  ;;  %v1908_v60 = vpop.f32.mrb[33].mxu1  ;;  %v1846_v61 = vpop.f32.mrb[34].mxu0 }
 0x139   :  { %v1909_v62 = vadd.f32 %v1908_v60, %v1907_v57  ;;  %v1910_v63 = vpop.f32.mrb[34].mxu1  ;;  %v1847_v0 = vpop.f32.mrb[35].mxu0 }
 0x13a   :  { %v1179_v1 = vadd.f32 %v1845_v59, %v2430_v11  ;;  %v1848_v2 = vadd.f32 %v1847_v0, %v1846_v61  ;;  %v1911_v4 = vpop.f32.mrb[35].mxu1 }
 0x13b   :  { %v1912_v6 = vadd.f32 %v1911_v4, %v1910_v63 }
 0x13c   :  { %v2463_v7 = vadd.f32 %v1909_v62, %v1179_v1  ;;  %v1182_v8 = vadd.f32 %v1848_v2, %v2432_v13 }
 0x13e   :  { %v2466_v9 = vadd.f32 %v1912_v6, %v1182_v8  ;;  %v1849_v10 = vpop.f32.mrb[36].mxu0  ;;  %v1411_v34 = vmul.f32 %v2463_v7, %v2463_v7 }
 0x13f   :  { %v1913_v12 = vpop.f32.mrb[36].mxu1  ;;  %v1850_v14 = vpop.f32.mrb[37].mxu0 }
 0x140   :  { %v1851_v15 = vadd.f32 %v1850_v14, %v1849_v10  ;;  %v1914_v16 = vpop.f32.mrb[37].mxu1  ;;  %v1852_v17 = vpop.f32.mrb[38].mxu0  ;;  %v1412_v29 = vmul.f32 %v2466_v9, %v2466_v9 }
 0x141   :  { %v1915_v18 = vadd.f32 %v1914_v16, %v1913_v12  ;;  %v1916_v20 = vpop.f32.mrb[38].mxu1  ;;  %v1853_v22 = vpop.f32.mrb[39].mxu0 }
 0x142   :  { %v1187_v11 = vadd.f32 %v1851_v15, %v2434_v25  ;;  %v1854_v23 = vadd.f32 %v1853_v22, %v1852_v17  ;;  %v1917_v24 = vpop.f32.mrb[39].mxu1  ;;  %v1389_v25 = vadd.f32 %v2466_v9, %v2463_v7  ;;  %v1427_v45 = vadd.f32 %v1412_v29, %v1411_v34 }
 0x143   :  { %v1918_v26 = vadd.f32 %v1917_v24, %v1916_v20 }
 0x144   :  { %v2469_v28 = vadd.f32 %v1915_v18, %v1187_v11  ;;  %v1190_v13 = vadd.f32 %v1854_v23, %v2436_v27 }
 0x146   :  { %v2474_v30 = vadd.f32 %v1918_v26, %v1190_v13  ;;  %v1855_v31 = vpop.f32.mrb[40].mxu0  ;;  %v1413_v36 = vmul.f32 %v2469_v28, %v2469_v28  ;;  %v1390_v46 = vadd.f32 %v1389_v25, %v2469_v28 }
 0x147   :  { %v1919_v32 = vpop.f32.mrb[40].mxu1  ;;  %v1856_v33 = vpop.f32.mrb[41].mxu0 }
 0x148   :  { %v1857_v38 = vadd.f32 %v1856_v33, %v1855_v31  ;;  %v1920_v40 = vpop.f32.mrb[41].mxu1  ;;  %v1858_v27 = vpop.f32.mrb[42].mxu0  ;;  %v1428_v52 = vadd.f32 %v1427_v45, %v1413_v36  ;;  %v1414_v56 = vmul.f32 %v2474_v30, %v2474_v30  ;;  %v1391_v59 = vadd.f32 %v1390_v46, %v2474_v30 }
 0x149   :  { %v1921_v42 = vadd.f32 %v1920_v40, %v1919_v32  ;;  %v1922_v43 = vpop.f32.mrb[42].mxu1  ;;  %v1859_v44 = vpop.f32.mrb[43].mxu0 }
 0x14a   :  { %v1195_v47 = vadd.f32 %v1857_v38, %v2438_v39  ;;  %v1860_v48 = vadd.f32 %v1859_v44, %v1858_v27  ;;  %v1923_v49 = vpop.f32.mrb[43].mxu1  ;;  %v1429_v0 = vadd.f32 %v1428_v52, %v1414_v56 }
 0x14b   :  { %v1924_v50 = vadd.f32 %v1923_v49, %v1922_v43 }
 0x14c   :  { %v2486_v57 = vadd.f32 %v1921_v42, %v1195_v47  ;;  %v1198_v58 = vadd.f32 %v1860_v48, %v2440_v41 }
 0x14e   :  { %v1415_v60 = vmul.f32 %v2486_v57, %v2486_v57  ;;  %v2492_v61 = vadd.f32 %v1924_v50, %v1198_v58  ;;  %v1861_v62 = vpop.f32.mrb[44].mxu0  ;;  %v1392_v1 = vadd.f32 %v1391_v59, %v2486_v57 }
 0x14f   :  { %v1925_v39 = vpop.f32.mrb[44].mxu1  ;;  %v1862_v63 = vpop.f32.mrb[45].mxu0 }
 0x150   :  { %v1863_v2 = vadd.f32 %v1862_v63, %v1861_v62  ;;  %v1926_v4 = vpop.f32.mrb[45].mxu1  ;;  %v1864_v6 = vpop.f32.mrb[46].mxu0  ;;  %v1430_v41 = vadd.f32 %v1429_v0, %v1415_v60  ;;  %v1416_v14 = vmul.f32 %v2492_v61, %v2492_v61  ;;  %v1393_v20 = vadd.f32 %v1392_v1, %v2492_v61 }
 0x151   :  { %v1927_v8 = vadd.f32 %v1926_v4, %v1925_v39  ;;  %v1928_v10 = vpop.f32.mrb[46].mxu1  ;;  %v1865_v12 = vpop.f32.mrb[47].mxu0 }
 0x152   :  { %v1203_v15 = vadd.f32 %v1863_v2, %v2442_v53  ;;  %v1866_v16 = vadd.f32 %v1865_v12, %v1864_v6  ;;  %v1929_v17 = vpop.f32.mrb[47].mxu1  ;;  %v1431_v23 = vadd.f32 %v1430_v41, %v1416_v14 }
 0x153   :  { %v1930_v18 = vadd.f32 %v1929_v17, %v1928_v10 }
 0x154   :  { %v2499_v22 = vadd.f32 %v1927_v8, %v1203_v15  ;;  %v1206_v11 = vadd.f32 %v1866_v16, %v2444_v55 }
 0x156   :  { %v1394_v24 = vadd.f32 %v1393_v20, %v2499_v22  ;;  %v1417_v26 = vmul.f32 %v2499_v22, %v2499_v22  ;;  %v2505_v13 = vadd.f32 %v1930_v18, %v1206_v11  ;;  %v1867_v29 = vpop.f32.mrb[48].mxu0 }
 0x157   :  { %v1931_v31 = vpop.f32.mrb[48].mxu1  ;;  %v1868_v53 = vpop.f32.mrb[49].mxu0 }
 0x158   :  { %v1432_v32 = vadd.f32 %v1431_v23, %v1417_v26  ;;  %v1395_v33 = vadd.f32 %v1394_v24, %v2505_v13  ;;  %v1418_v34 = vmul.f32 %v2505_v13, %v2505_v13  ;;  %v1869_v25 = vadd.f32 %v1868_v53, %v1867_v29  ;;  %v1932_v36 = vpop.f32.mrb[49].mxu1  ;;  %v1870_v55 = vpop.f32.mrb[50].mxu0 }
 0x159   :  { %v1933_v38 = vadd.f32 %v1932_v36, %v1931_v31  ;;  %v1934_v40 = vpop.f32.mrb[50].mxu1  ;;  %v1871_v27 = vpop.f32.mrb[51].mxu0 }
 0x15a   :  { %v1433_v42 = vadd.f32 %v1432_v32, %v1418_v34  ;;  %v1211_v43 = vadd.f32 %v1869_v25, %v2446_v3  ;;  %v1872_v44 = vadd.f32 %v1871_v27, %v1870_v55  ;;  %v1935_v45 = vpop.f32.mrb[51].mxu1 }
 0x15b   :  { %v1936_v46 = vadd.f32 %v1935_v45, %v1934_v40 }
 0x15c   :  { %v2511_v47 = vadd.f32 %v1933_v38, %v1211_v43  ;;  %v1214_v48 = vadd.f32 %v1872_v44, %v2448_v5 }
 0x15e   :  { %v1396_v49 = vadd.f32 %v1395_v33, %v2511_v47  ;;  %v1419_v50 = vmul.f32 %v2511_v47, %v2511_v47  ;;  %v2517_v52 = vadd.f32 %v1936_v46, %v1214_v48  ;;  %v1873_v56 = vpop.f32.mrb[52].mxu0 }
 0x15f   :  { %v1937_v58 = vpop.f32.mrb[52].mxu1  ;;  %v1874_v59 = vpop.f32.mrb[53].mxu0 }
 0x160   :  { %v1434_v60 = vadd.f32 %v1433_v42, %v1419_v50  ;;  %v1397_v3 = vadd.f32 %v1396_v49, %v2517_v52  ;;  %v1420_v62 = vmul.f32 %v2517_v52, %v2517_v52  ;;  %v1875_v39 = vadd.f32 %v1874_v59, %v1873_v56  ;;  %v1938_v63 = vpop.f32.mrb[53].mxu1  ;;  %v1876_v0 = vpop.f32.mrb[54].mxu0 }
 0x161   :  { %v1939_v5 = vadd.f32 %v1938_v63, %v1937_v58  ;;  %v1940_v1 = vpop.f32.mrb[54].mxu1  ;;  %v1877_v2 = vpop.f32.mrb[55].mxu0 }
 0x162   :  { %v1435_v4 = vadd.f32 %v1434_v60, %v1420_v62  ;;  %v1219_v6 = vadd.f32 %v1875_v39, %v2450_v19  ;;  %v1878_v8 = vadd.f32 %v1877_v2, %v1876_v0  ;;  %v1941_v10 = vpop.f32.mrb[55].mxu1 }
 0x163   :  { %v1942_v12 = vadd.f32 %v1941_v10, %v1940_v1 }
 0x164   :  { %v2523_v41 = vadd.f32 %v1939_v5, %v1219_v6  ;;  %v1222_v14 = vadd.f32 %v1878_v8, %v2452_v21 }
 0x166   :  { %v1398_v15 = vadd.f32 %v1397_v3, %v2523_v41  ;;  %v1421_v16 = vmul.f32 %v2523_v41, %v2523_v41  ;;  %v2529_v17 = vadd.f32 %v1942_v12, %v1222_v14  ;;  %v1879_v18 = vpop.f32.mrb[56].mxu0 }
 0x167   :  { %v1943_v20 = vpop.f32.mrb[56].mxu1  ;;  %v1880_v11 = vpop.f32.mrb[57].mxu0 }
 0x168   :  { %v1436_v23 = vadd.f32 %v1435_v4, %v1421_v16  ;;  %v1399_v19 = vadd.f32 %v1398_v15, %v2529_v17  ;;  %v1422_v24 = vmul.f32 %v2529_v17, %v2529_v17  ;;  %v1881_v26 = vadd.f32 %v1880_v11, %v1879_v18  ;;  %v1944_v29 = vpop.f32.mrb[57].mxu1  ;;  %v1882_v31 = vpop.f32.mrb[58].mxu0 }
 0x169   :  { %v1945_v21 = vadd.f32 %v1944_v29, %v1943_v20  ;;  %v1946_v53 = vpop.f32.mrb[58].mxu1  ;;  %v1883_v32 = vpop.f32.mrb[59].mxu0 }
 0x16a   :  { %v1437_v33 = vadd.f32 %v1436_v23, %v1422_v24  ;;  %v1227_v34 = vadd.f32 %v1881_v26, %v2454_v35  ;;  %v1884_v25 = vadd.f32 %v1883_v32, %v1882_v31  ;;  %v1947_v36 = vpop.f32.mrb[59].mxu1 }
 0x16b   :  { %v1948_v55 = vadd.f32 %v1947_v36, %v1946_v53 }
 0x16c   :  { %v2535_v38 = vadd.f32 %v1945_v21, %v1227_v34  ;;  %v1230_v40 = vadd.f32 %v1884_v25, %v2456_v37  ;;  %v1460_v25 = vlaneseq }
 0x16e   :  { %v1400_v27 = vadd.f32 %v1399_v19, %v2535_v38  ;;  %v1423_v42 = vmul.f32 %v2535_v38, %v2535_v38  ;;  %v2541_v43 = vadd.f32 %v1948_v55, %v1230_v40  ;;  %v1885_v44 = vpop.f32.mrb[60].mxu0  ;;  %v1461_v36 = vshrl.u32 %v1460_v25, 7  ;;  %v1452_v55 = vld [vmem:[%s2634_s2] sm:$0x1] }
 0x16f   :  { %v1949_v45 = vpop.f32.mrb[60].mxu1  ;;  %v1886_v46 = vpop.f32.mrb[61].mxu0 }
 0x170   :  { %v1438_v48 = vadd.f32 %v1437_v33, %v1423_v42  ;;  %v1401_v35 = vadd.f32 %v1400_v27, %v2541_v43  ;;  %v1424_v49 = vmul.f32 %v2541_v43, %v2541_v43  ;;  %v1887_v50 = vadd.f32 %v1886_v46, %v1885_v44  ;;  %v1950_v56 = vpop.f32.mrb[61].mxu1  ;;  %v1888_v58 = vpop.f32.mrb[62].mxu0  ;;  %v1456_v44 = vld [vmem:[%s2635_s3] sm:$0x1] }
 0x171   :  { %v1951_v37 = vadd.f32 %v1950_v56, %v1949_v45  ;;  %v1952_v59 = vpop.f32.mrb[62].mxu1  ;;  %v1889_v60 = vpop.f32.mrb[63].mxu0  ;;  %v1462_v40 = vsub.s32 0, %v1461_v36 }
 0x172   :  { %v1439_v3 = vadd.f32 %v1438_v48, %v1424_v49  ;;  %v1235_v62 = vadd.f32 %v1887_v50, %v2458_v51  ;;  %v1890_v39 = vadd.f32 %v1889_v60, %v1888_v58  ;;  %v1953_v63 = vpop.f32.mrb[63].mxu1 }
 0x173   :  { %v1954_v0 = vadd.f32 %v1953_v63, %v1952_v59 }
 0x174   :  { %v1332_v5 = vadd.f32 %v1951_v37, %v1235_v62  ;;  %v1238_v1 = vadd.f32 %v1890_v39, %v2460_v54 }
 0x176   :  { %v1402_v2 = vadd.f32 %v1401_v35, %v1332_v5  ;;  %v1425_v4 = vmul.f32 %v1332_v5, %v1332_v5  ;;  %v1335_v6 = vadd.f32 %v1954_v0, %v1238_v1 }
 0x178   :  { %v1440_v8 = vadd.f32 %v1439_v3, %v1425_v4  ;;  %v1403_v10 = vadd.f32 %v1402_v2, %v1335_v6  ;;  %v1426_v12 = vmul.f32 %v1335_v6, %v1335_v6 }
 0x17a   :  { %v1404_v14 = vrot.slane %v1403_v10, 4  ;;  %v1441_v15 = vadd.f32 %v1440_v8, %v1426_v12 }
 0x17c   :  { %v1405_v16 = vadd.f32 %v1404_v14, %v1403_v10  ;;  %v1442_v18 = vrot.slane %v1441_v15, 4 }
 0x17e   :  { %v1406_v20 = vrot.slane %v1405_v16, 2  ;;  %v1443_v11 = vadd.f32 %v1442_v18, %v1441_v15 }
 0x180   :  { %v1407_v23 = vadd.f32 %v1406_v20, %v1405_v16  ;;  %v1444_v51 = vrot.slane %v1443_v11, 2 }
 0x182   :  { %v1408_v19 = vrot.slane %v1407_v23, 1  ;;  %v1445_v24 = vadd.f32 %v1444_v51, %v1443_v11 }
 0x184   :  { %v1409_v26 = vadd.f32 %v1408_v19, %v1407_v23  ;;  %v1446_v29 = vrot.slane %v1445_v24, 1 }
 0x186   :  { %v1410_v31 = vmul.f32 0.0078125, %v1409_v26  ;;  %v1447_v54 = vadd.f32 %v1446_v29, %v1445_v24 }
 0x188   :  { %v1448_v21 = vmul.f32 0.0078125, %v1447_v54  ;;  %v1449_v53 = vmul.f32 %v1410_v31, %v1410_v31 }
 0x18a   :  { %v1450_v32 = vsub.f32 %v1448_v21, %v1449_v53 }
 0x18c   :  { %v1451_v33 = vmax.f32 %v1450_v32, 0.0 }
 0x18e   :  { %v1453_v34 = vadd.f32 1e-05, %v1451_v33 }
 0x190   :  { %2019 = vrsqrt.f32 %v1453_v34 }
 0x19a   :  { %v2020_v27 = vpop.eup %2019 }
 0x19b   :  { %v1455_v42 = vmul.f32 %v2020_v27, %v1452_v55 }
 0x19d   :  { %v1457_v45 = vmul.f32 %v1455_v42, %v1410_v31  ;;  %v1463_v46 = vrot.slane %v1455_v42, %v1462_v40 }
 0x19f   :  { %v1458_v48 = vsub.f32 %v1456_v44, %v1457_v45  ;;  %v1465_v35 = vmul.f32 %v1463_v46, %v2463_v7  ;;  %v1466_v49 = vmul.f32 %v1463_v46, %v2466_v9  ;;  %v1470_v50 = vmul.f32 %v1463_v46, %v2492_v61 }
 0x1a0   :  { %v1471_v56 = vmul.f32 %v1463_v46, %v2499_v22  ;;  %v1472_v58 = vmul.f32 %v1463_v46, %v2505_v13  ;;  %v1473_v37 = vmul.f32 %v1463_v46, %v2511_v47  ;;  %v1474_v59 = vmul.f32 %v1463_v46, %v2517_v52 }
 0x1a1   :  { %v1475_v60 = vmul.f32 %v1463_v46, %v2523_v41  ;;  %v1476_v3 = vmul.f32 %v1463_v46, %v2529_v17  ;;  %v1477_v62 = vmul.f32 %v1463_v46, %v2535_v38  ;;  %v1478_v7 = vmul.f32 %v1463_v46, %v2541_v43 }
 0x1a2   :  { %v1479_v39 = vmul.f32 %v1463_v46, %v1332_v5  ;;  %v1467_v9 = vmul.f32 %v1463_v46, %v2469_v28  ;;  %v1468_v61 = vmul.f32 %v1463_v46, %v2474_v30  ;;  %v1480_v22 = vmul.f32 %v1463_v46, %v1335_v6 }
 0x1a3   :  { %v1485_v63 = vrot.slane %v1458_v48, %v1462_v40  ;;  %v1469_v13 = vmul.f32 %v1463_v46, %v2486_v57 }
 0x1a5   :  { %v1487_v47 = vadd.f32 %v1485_v63, %v1465_v35  ;;  %v1488_v0 = vadd.f32 %v1485_v63, %v1466_v49  ;;  %v1489_v52 = vadd.f32 %v1485_v63, %v1467_v9  ;;  %v1490_v1 = vadd.f32 %v1485_v63, %v1468_v61 }
 0x1a6   :  { %v1491_v41 = vadd.f32 %v1485_v63, %v1469_v13  ;;  %v1492_v2 = vadd.f32 %v1485_v63, %v1470_v50  ;;  %v1493_v17 = vadd.f32 %v1485_v63, %v1471_v56  ;;  %v1494_v4 = vadd.f32 %v1485_v63, %v1472_v58 }
 0x1a7   :  { %v1495_v38 = vadd.f32 %v1485_v63, %v1473_v37  ;;  %v1496_v8 = vadd.f32 %v1485_v63, %v1474_v59  ;;  %v1497_v43 = vadd.f32 %v1485_v63, %v1475_v60  ;;  %v1498_v5 = vadd.f32 %v1485_v63, %v1476_v3 }
 0x1a8   :  { %v1499_v10 = vadd.f32 %v1485_v63, %v1477_v62  ;;  %v1500_v28 = vadd.f32 %v1485_v63, %v1478_v7  ;;  %v1501_v12 = vadd.f32 %v1485_v63, %v1479_v39  ;;  %v1502_v30 = vadd.f32 %v1485_v63, %v1480_v22 }
 0x1a9   :  { %vm1503_vm0 = vcmp.ge.f32.partialorder %v1487_v47, 0.0  ;;  %vm1504_vm1 = vcmp.ge.f32.partialorder %v1488_v0, 0.0  ;;  %vm1505_vm2 = vcmp.ge.f32.partialorder %v1489_v52, 0.0  ;;  %vm1506_vm3 = vcmp.ge.f32.partialorder %v1490_v1, 0.0 }
 0x1aa   :  { %vm1507_vm4 = vcmp.ge.f32.partialorder %v1491_v41, 0.0  ;;  %vm1508_vm5 = vcmp.ge.f32.partialorder %v1492_v2, 0.0  ;;  %vm1509_vm6 = vcmp.ge.f32.partialorder %v1493_v17, 0.0  ;;  %vm1510_vm7 = vcmp.ge.f32.partialorder %v1494_v4, 0.0 }
 0x1ab   :  { %vm1511_vm8 = vcmp.ge.f32.partialorder %v1495_v38, 0.0  ;;  %vm1512_vm9 = vcmp.ge.f32.partialorder %v1496_v8, 0.0  ;;  %vm1513_vm10 = vcmp.ge.f32.partialorder %v1497_v43, 0.0  ;;  %vm1514_vm11 = vcmp.ge.f32.partialorder %v1498_v5, 0.0 }
 0x1ac   :  { %vm1515_vm12 = vcmp.ge.f32.partialorder %v1499_v10, 0.0  ;;  %vm1516_vm13 = vcmp.ge.f32.partialorder %v1500_v28, 0.0  ;;  %vm1517_vm14 = vcmp.ge.f32.partialorder %v1501_v12, 0.0  ;;  %vm1518_vm15 = vcmp.ge.f32.partialorder %v1502_v30, 0.0 }
 0x1ad   :  { %v1519_v57 = vmul.f32 0.2, %v1487_v47  ;;  %v1520_v6 = vmul.f32 0.2, %v1488_v0  ;;  %v1521_v14 = vmul.f32 0.2, %v1489_v52 }
 0x1ae   :  { %v1522_v15 = vmul.f32 0.2, %v1490_v1  ;;  %v1523_v16 = vmul.f32 0.2, %v1491_v41  ;;  %v1524_v18 = vmul.f32 0.2, %v1492_v2 }
 0x1af   :  { %v1525_v20 = vmul.f32 0.2, %v1493_v17  ;;  %v1526_v11 = vmul.f32 0.2, %v1494_v4  ;;  %v1527_v23 = vmul.f32 0.2, %v1495_v38  ;;  %v1535_v51 = vsel %vm1503_vm0, %v1487_v47, %v1519_v57 }
 0x1b0   :  { %v1528_v19 = vmul.f32 0.2, %v1496_v8  ;;  %v1529_v24 = vmul.f32 0.2, %v1497_v43  ;;  %v1530_v26 = vmul.f32 0.2, %v1498_v5  ;;  %v1536_v29 = vsel %vm1504_vm1, %v1488_v0, %v1520_v6  ;;  %1551 = vst [vmem:[%s2636_s4] sm:$0xff] %v1535_v51 }
 0x1b1   :  { %v1531_v31 = vmul.f32 0.2, %v1499_v10  ;;  %v1532_v54 = vmul.f32 0.2, %v1500_v28  ;;  %v1533_v21 = vmul.f32 0.2, %v1501_v12  ;;  %v1537_v53 = vsel %vm1505_vm2, %v1489_v52, %v1521_v14 }
 0x1b2   :  { %1552 = vst [vmem:[%s2636_s4 + $0x8] sm:$0xff] %v1536_v29  ;;  %v1534_v32 = vmul.f32 0.2, %v1502_v30  ;;  %v1538_v33 = vsel %vm1506_vm3, %v1490_v1, %v1522_v15  ;;  %v1539_v34 = vsel %vm1507_vm4, %v1491_v41, %v1523_v16  ;;  %v1540_v25 = vsel %vm1508_vm5, %v1492_v2, %v1524_v18  ;;  %1553 = vst [vmem:[%s2636_s4 + $0x10] sm:$0xff] %v1537_v53 }
 0x1b3   :  { %v1541_v36 = vsel %vm1509_vm6, %v1493_v17, %v1525_v20  ;;  %v1542_v55 = vsel %vm1510_vm7, %v1494_v4, %v1526_v11  ;;  %v1543_v40 = vsel %vm1511_vm8, %v1495_v38, %v1527_v23  ;;  %v1544_v27 = vsel %vm1512_vm9, %v1496_v8, %v1528_v19  ;;  %1554 = vst [vmem:[%s2636_s4 + $0x18] sm:$0xff] %v1538_v33 }
 0x1b4   :  { %1555 = vst [vmem:[%s2636_s4 + $0x20] sm:$0xff] %v1539_v34  ;;  %1556 = vst [vmem:[%s2636_s4 + $0x28] sm:$0xff] %v1540_v25  ;;  %v1545_v42 = vsel %vm1513_vm10, %v1497_v43, %v1529_v24  ;;  %v1546_v44 = vsel %vm1514_vm11, %v1498_v5, %v1530_v26  ;;  %v1547_v45 = vsel %vm1515_vm12, %v1499_v10, %v1531_v31 }
 0x1b5   :  { %v1548_v46 = vsel %vm1516_vm13, %v1500_v28, %v1532_v54  ;;  %1557 = vst [vmem:[%s2636_s4 + $0x30] sm:$0xff] %v1541_v36  ;;  %1558 = vst [vmem:[%s2636_s4 + $0x38] sm:$0xff] %v1542_v55  ;;  %v1549_v48 = vsel %vm1517_vm14, %v1501_v12, %v1533_v21  ;;  %v1550_v35 = vsel %vm1518_vm15, %v1502_v30, %v1534_v32 }
 0x1b6   :  { %1559 = vst [vmem:[%s2636_s4 + $0x40] sm:$0xff] %v1543_v40  ;;  %1560 = vst [vmem:[%s2636_s4 + $0x48] sm:$0xff] %v1544_v27 }
 0x1b7   :  { %1561 = vst [vmem:[%s2636_s4 + $0x50] sm:$0xff] %v1545_v42  ;;  %1562 = vst [vmem:[%s2636_s4 + $0x58] sm:$0xff] %v1546_v44 }
 0x1b8   :  { %1563 = vst [vmem:[%s2636_s4 + $0x60] sm:$0xff] %v1547_v45  ;;  %1564 = vst [vmem:[%s2636_s4 + $0x68] sm:$0xff] %v1548_v46 }
 0x1b9   :  { %1565 = vst [vmem:[%s2636_s4 + $0x70] sm:$0xff] %v1549_v48  ;;  %1566 = vst [vmem:[%s2636_s4 + $0x78] sm:$0xff] %v1550_v35 }

// kernel: discriminator32_forward.6
= control target key start
LH: loop header
LB: loop body
LE: loop exit
PB: predicated region body
PF: predicated region fallthrough
CT: control target
= control target key end

     0   :  { %s3813_s15 = smov 0   ;;  %s3815_s16 = smov 0   ;;  %s4655_s0 = inlined_call_operand.vmem [shape: bf16[32,2048], index: 0, kind: input, shape index: {}]   ;;  %s4656_s1 = inlined_call_operand.vmem [shape: bf16[2048,256], index: 1, kind: input, shape index: {}]   ;;  %s4657_s2 = inlined_call_operand.vmem [shape: f32[1,256], index: 2, kind: input, shape index: {}]   ;;  %s4658_s3 = inlined_call_operand.vmem [shape: f32[1,256], index: 3, kind: input, shape index: {}]   ;;  %s4659_s4 = inlined_call_operand.vmem [shape: f32[32,256], index: 4, kind: output, shape index: {}]  }
   0x1   :  { %s3817_s17 = smov 0   ;;  %s3819_s18 = smov 0  }
   0x2   :  { %s3821_s19 = smov 0  }
   0x3 LB: > { %s26_s20 = sadd.s32 1, %s3782_s18  ;;  %s3180_s21 = sadd.s32 4294967295, %s3786_s19   ;;  %s3786_s19 = sphi %s3821_s19, %s14_s19   ;;  %s3782_s18 = sphi %s3819_s18, %s4664_s18   ;;  %s3778_s17 = sphi %s3817_s17, %s4663_s17   ;;  %s3774_s16 = sphi %s3815_s16, %s4662_s16   ;;  %s3770_s15 = sphi %s3813_s15, %s4661_s15  }
   0x4   : > { %p28_p0 = scmp.ge.s32.totalorder %s26_s20, 2  ;;  %p68_p1 = scmp.ne.s32.totalorder %s3774_s16, %s3770_s15 }
   0x5   : > { %p69_p2 = scmp.eq.s32.totalorder %s3786_s19, 0  ;;  %p150_p4 = scmp.eq.s32.totalorder %s3180_s21, 1 }
   0x6   : > { %s4666_s20 = smov (%p28_p0, %s26_s20), 0  ;;  %s61_s23 = sadd.s32 1, %s3774_s16 }
   0x7   : > { %p70_p3 = por %p69_p2, %p68_p1  ;;  %s57_s22 = ssub.s32 %s3782_s18, %s4666_s20 }
   0x8   : > { %p59_p5 = scmp.eq.s32.totalorder %s57_s22, 0  ;;  %p3848_p6 = por %p150_p4, %p68_p1 }
   0x9   : > { %p3184_p7 = scmp.ge.s32.totalorder %s3786_s19, 2 }
   0xa   : > { %s3853_s25 = scalar_select %p59_p5, %s3774_s16, %s61_s23  }
   0xb   : > { %181 = sbr.rel (%p3184_p7) target bundleno = 192 (0xc0), region = 20 }
  0x12   : > { %184 = sbr.rel (!%p70_p3) target bundleno = 192 (0xc0), region = 24  ;;  %s186_s26 = sand.u32 (%p70_p3), 1, %s3774_s16  }
  0x13   : > { %s3186_s27 = sshll.u32 (%p70_p3), %s3782_s18, 2  ;;  %s3185_s28 = sshll.u32 (%p70_p3), %s186_s26, 10 }
  0x14   : > { %s3861_s5 = scalar_lea.vmem (%p70_p3), %s4656_s1, %s3186_s27  ;;  %s3865_s6 = scalar_lea.vmem (%p70_p3), [#allocation3], %s3185_s28 }
  0x15   : > { %v209_v0 = vld [vmem:[%s3861_s5] sm:$0xf] (%p70_p3)  ;;  %v211_v1 = vld [vmem:[%s3861_s5 + $0x8] sm:$0xf] (%p70_p3)  ;;  %v213_v2 = vld [vmem:[%s3861_s5 + $0x10] sm:$0xf] (%p70_p3) }
  0x16   : > { %210 = vst [vmem:[%s3865_s6] sm:$0xf] (%p70_p3), %v209_v0  ;;  %212 = vst [vmem:[%s3865_s6 + $0x4] sm:$0xf] (%p70_p3), %v211_v1  ;;  %v215_v3 = vld [vmem:[%s3861_s5 + $0x18] sm:$0xf] (%p70_p3) }
  0x17   : > { %v217_v4 = vld [vmem:[%s3861_s5 + $0x20] sm:$0xf] (%p70_p3)  ;;  %214 = vst [vmem:[%s3865_s6 + $0x8] sm:$0xf] (%p70_p3), %v213_v2  ;;  %216 = vst [vmem:[%s3865_s6 + $0xc] sm:$0xf] (%p70_p3), %v215_v3 }
  0x18   : > { %218 = vst [vmem:[%s3865_s6 + $0x10] sm:$0xf] (%p70_p3), %v217_v4  ;;  %v219_v5 = vld [vmem:[%s3861_s5 + $0x28] sm:$0xf] (%p70_p3)  ;;  %v221_v6 = vld [vmem:[%s3861_s5 + $0x30] sm:$0xf] (%p70_p3) }
  0x19   : > { %v223_v7 = vld [vmem:[%s3861_s5 + $0x38] sm:$0xf]  ;;  %220 = vst [vmem:[%s3865_s6 + $0x14] sm:$0xf] %v219_v5  ;;  %222 = vst [vmem:[%s3865_s6 + $0x18] sm:$0xf] %v221_v6 }
  0x1a   : > { %224 = vst [vmem:[%s3865_s6 + $0x1c] sm:$0xf] %v223_v7  ;;  %v225_v8 = vld [vmem:[%s3861_s5 + $0x40] sm:$0xf]  ;;  %v227_v9 = vld [vmem:[%s3861_s5 + $0x48] sm:$0xf] }
  0x1b   : > { %v229_v10 = vld [vmem:[%s3861_s5 + $0x50] sm:$0xf]  ;;  %226 = vst [vmem:[%s3865_s6 + $0x20] sm:$0xf] %v225_v8  ;;  %228 = vst [vmem:[%s3865_s6 + $0x24] sm:$0xf] %v227_v9 }
  0x1c   : > { %230 = vst [vmem:[%s3865_s6 + $0x28] sm:$0xf] %v229_v10  ;;  %v231_v11 = vld [vmem:[%s3861_s5 + $0x58] sm:$0xf]  ;;  %v233_v12 = vld [vmem:[%s3861_s5 + $0x60] sm:$0xf] }
  0x1d   : > { %v235_v13 = vld [vmem:[%s3861_s5 + $0x68] sm:$0xf]  ;;  %232 = vst [vmem:[%s3865_s6 + $0x2c] sm:$0xf] %v231_v11  ;;  %234 = vst [vmem:[%s3865_s6 + $0x30] sm:$0xf] %v233_v12 }
  0x1e   : > { %236 = vst [vmem:[%s3865_s6 + $0x34] sm:$0xf] %v235_v13  ;;  %v237_v14 = vld [vmem:[%s3861_s5 + $0x70] sm:$0xf]  ;;  %v239_v15 = vld [vmem:[%s3861_s5 + $0x78] sm:$0xf] }
  0x1f   : > { %v241_v16 = vld [vmem:[%s3861_s5 + $0x80] sm:$0xf]  ;;  %238 = vst [vmem:[%s3865_s6 + $0x38] sm:$0xf] %v237_v14  ;;  %240 = vst [vmem:[%s3865_s6 + $0x3c] sm:$0xf] %v239_v15 }
  0x20   : > { %242 = vst [vmem:[%s3865_s6 + $0x40] sm:$0xf] %v241_v16  ;;  %v243_v17 = vld [vmem:[%s3861_s5 + $0x88] sm:$0xf]  ;;  %v245_v18 = vld [vmem:[%s3861_s5 + $0x90] sm:$0xf] }
  0x21   : > { %v247_v19 = vld [vmem:[%s3861_s5 + $0x98] sm:$0xf]  ;;  %244 = vst [vmem:[%s3865_s6 + $0x44] sm:$0xf] %v243_v17  ;;  %246 = vst [vmem:[%s3865_s6 + $0x48] sm:$0xf] %v245_v18 }
  0x22   : > { %248 = vst [vmem:[%s3865_s6 + $0x4c] sm:$0xf] %v247_v19  ;;  %v249_v20 = vld [vmem:[%s3861_s5 + $0xa0] sm:$0xf]  ;;  %v251_v21 = vld [vmem:[%s3861_s5 + $0xa8] sm:$0xf] }
  0x23   : > { %v253_v22 = vld [vmem:[%s3861_s5 + $0xb0] sm:$0xf]  ;;  %250 = vst [vmem:[%s3865_s6 + $0x50] sm:$0xf] %v249_v20  ;;  %252 = vst [vmem:[%s3865_s6 + $0x54] sm:$0xf] %v251_v21 }
  0x24   : > { %254 = vst [vmem:[%s3865_s6 + $0x58] sm:$0xf] %v253_v22  ;;  %v255_v23 = vld [vmem:[%s3861_s5 + $0xb8] sm:$0xf]  ;;  %v257_v24 = vld [vmem:[%s3861_s5 + $0xc0] sm:$0xf] }
  0x25   : > { %v259_v25 = vld [vmem:[%s3861_s5 + $0xc8] sm:$0xf]  ;;  %256 = vst [vmem:[%s3865_s6 + $0x5c] sm:$0xf] %v255_v23  ;;  %258 = vst [vmem:[%s3865_s6 + $0x60] sm:$0xf] %v257_v24 }
  0x26   : > { %260 = vst [vmem:[%s3865_s6 + $0x64] sm:$0xf] %v259_v25  ;;  %v261_v26 = vld [vmem:[%s3861_s5 + $0xd0] sm:$0xf]  ;;  %v263_v27 = vld [vmem:[%s3861_s5 + $0xd8] sm:$0xf] }
  0x27   : > { %v265_v28 = vld [vmem:[%s3861_s5 + $0xe0] sm:$0xf]  ;;  %262 = vst [vmem:[%s3865_s6 + $0x68] sm:$0xf] %v261_v26  ;;  %264 = vst [vmem:[%s3865_s6 + $0x6c] sm:$0xf] %v263_v27 }
  0x28   : > { %266 = vst [vmem:[%s3865_s6 + $0x70] sm:$0xf] %v265_v28  ;;  %v267_v29 = vld [vmem:[%s3861_s5 + $0xe8] sm:$0xf]  ;;  %v269_v30 = vld [vmem:[%s3861_s5 + $0xf0] sm:$0xf] }
  0x29   : > { %v271_v31 = vld [vmem:[%s3861_s5 + $0xf8] sm:$0xf]  ;;  %268 = vst [vmem:[%s3865_s6 + $0x74] sm:$0xf] %v267_v29  ;;  %270 = vst [vmem:[%s3865_s6 + $0x78] sm:$0xf] %v269_v30 }
  0x2a   : > { %272 = vst [vmem:[%s3865_s6 + $0x7c] sm:$0xf] %v271_v31  ;;  %v273_v32 = vld [vmem:[%s3861_s5 + $0x100] sm:$0xf]  ;;  %v275_v33 = vld [vmem:[%s3861_s5 + $0x108] sm:$0xf] }
  0x2b   : > { %v277_v34 = vld [vmem:[%s3861_s5 + $0x110] sm:$0xf]  ;;  %274 = vst [vmem:[%s3865_s6 + $0x80] sm:$0xf] %v273_v32  ;;  %276 = vst [vmem:[%s3865_s6 + $0x84] sm:$0xf] %v275_v33 }
  0x2c   : > { %278 = vst [vmem:[%s3865_s6 + $0x88] sm:$0xf] %v277_v34  ;;  %v279_v35 = vld [vmem:[%s3861_s5 + $0x118] sm:$0xf]  ;;  %v281_v36 = vld [vmem:[%s3861_s5 + $0x120] sm:$0xf] }
  0x2d   : > { %v283_v37 = vld [vmem:[%s3861_s5 + $0x128] sm:$0xf]  ;;  %280 = vst [vmem:[%s3865_s6 + $0x8c] sm:$0xf] %v279_v35  ;;  %282 = vst [vmem:[%s3865_s6 + $0x90] sm:$0xf] %v281_v36 }
  0x2e   : > { %284 = vst [vmem:[%s3865_s6 + $0x94] sm:$0xf] %v283_v37  ;;  %v285_v38 = vld [vmem:[%s3861_s5 + $0x130] sm:$0xf]  ;;  %v287_v39 = vld [vmem:[%s3861_s5 + $0x138] sm:$0xf] }
  0x2f   : > { %v289_v40 = vld [vmem:[%s3861_s5 + $0x140] sm:$0xf]  ;;  %286 = vst [vmem:[%s3865_s6 + $0x98] sm:$0xf] %v285_v38  ;;  %288 = vst [vmem:[%s3865_s6 + $0x9c] sm:$0xf] %v287_v39 }
  0x30   : > { %290 = vst [vmem:[%s3865_s6 + $0xa0] sm:$0xf] %v289_v40  ;;  %v291_v41 = vld [vmem:[%s3861_s5 + $0x148] sm:$0xf]  ;;  %v293_v42 = vld [vmem:[%s3861_s5 + $0x150] sm:$0xf] }
  0x31   : > { %v295_v43 = vld [vmem:[%s3861_s5 + $0x158] sm:$0xf]  ;;  %292 = vst [vmem:[%s3865_s6 + $0xa4] sm:$0xf] %v291_v41  ;;  %294 = vst [vmem:[%s3865_s6 + $0xa8] sm:$0xf] %v293_v42 }
  0x32   : > { %296 = vst [vmem:[%s3865_s6 + $0xac] sm:$0xf] %v295_v43  ;;  %v297_v44 = vld [vmem:[%s3861_s5 + $0x160] sm:$0xf]  ;;  %v299_v45 = vld [vmem:[%s3861_s5 + $0x168] sm:$0xf] }
  0x33   : > { %v301_v46 = vld [vmem:[%s3861_s5 + $0x170] sm:$0xf]  ;;  %298 = vst [vmem:[%s3865_s6 + $0xb0] sm:$0xf] %v297_v44  ;;  %300 = vst [vmem:[%s3865_s6 + $0xb4] sm:$0xf] %v299_v45 }
  0x34   : > { %302 = vst [vmem:[%s3865_s6 + $0xb8] sm:$0xf] %v301_v46  ;;  %v303_v47 = vld [vmem:[%s3861_s5 + $0x178] sm:$0xf]  ;;  %v305_v48 = vld [vmem:[%s3861_s5 + $0x180] sm:$0xf] }
  0x35   : > { %v307_v49 = vld [vmem:[%s3861_s5 + $0x188] sm:$0xf]  ;;  %304 = vst [vmem:[%s3865_s6 + $0xbc] sm:$0xf] %v303_v47  ;;  %306 = vst [vmem:[%s3865_s6 + $0xc0] sm:$0xf] %v305_v48 }
  0x36   : > { %308 = vst [vmem:[%s3865_s6 + $0xc4] sm:$0xf] %v307_v49  ;;  %v309_v50 = vld [vmem:[%s3861_s5 + $0x190] sm:$0xf]  ;;  %v311_v51 = vld [vmem:[%s3861_s5 + $0x198] sm:$0xf] }
  0x37   : > { %v313_v52 = vld [vmem:[%s3861_s5 + $0x1a0] sm:$0xf]  ;;  %310 = vst [vmem:[%s3865_s6 + $0xc8] sm:$0xf] %v309_v50  ;;  %312 = vst [vmem:[%s3865_s6 + $0xcc] sm:$0xf] %v311_v51 }
  0x38   : > { %314 = vst [vmem:[%s3865_s6 + $0xd0] sm:$0xf] %v313_v52  ;;  %v315_v53 = vld [vmem:[%s3861_s5 + $0x1a8] sm:$0xf]  ;;  %v317_v54 = vld [vmem:[%s3861_s5 + $0x1b0] sm:$0xf] }
  0x39   : > { %v319_v55 = vld [vmem:[%s3861_s5 + $0x1b8] sm:$0xf]  ;;  %316 = vst [vmem:[%s3865_s6 + $0xd4] sm:$0xf] %v315_v53  ;;  %318 = vst [vmem:[%s3865_s6 + $0xd8] sm:$0xf] %v317_v54 }
  0x3a   : > { %320 = vst [vmem:[%s3865_s6 + $0xdc] sm:$0xf] %v319_v55  ;;  %v321_v56 = vld [vmem:[%s3861_s5 + $0x1c0] sm:$0xf]  ;;  %v323_v57 = vld [vmem:[%s3861_s5 + $0x1c8] sm:$0xf] }
  0x3b   : > { %v325_v58 = vld [vmem:[%s3861_s5 + $0x1d0] sm:$0xf]  ;;  %322 = vst [vmem:[%s3865_s6 + $0xe0] sm:$0xf] %v321_v56  ;;  %324 = vst [vmem:[%s3865_s6 + $0xe4] sm:$0xf] %v323_v57 }
  0x3c   : > { %326 = vst [vmem:[%s3865_s6 + $0xe8] sm:$0xf] %v325_v58  ;;  %v327_v59 = vld [vmem:[%s3861_s5 + $0x1d8] sm:$0xf]  ;;  %v329_v60 = vld [vmem:[%s3861_s5 + $0x1e0] sm:$0xf] }
  0x3d   : > { %v331_v61 = vld [vmem:[%s3861_s5 + $0x1e8] sm:$0xf]  ;;  %328 = vst [vmem:[%s3865_s6 + $0xec] sm:$0xf] %v327_v59  ;;  %330 = vst [vmem:[%s3865_s6 + $0xf0] sm:$0xf] %v329_v60 }
  0x3e   : > { %332 = vst [vmem:[%s3865_s6 + $0xf4] sm:$0xf] %v331_v61  ;;  %v333_v62 = vld [vmem:[%s3861_s5 + $0x1f0] sm:$0xf]  ;;  %v335_v63 = vld [vmem:[%s3861_s5 + $0x1f8] sm:$0xf] }
  0x3f   : > { %v337_v0 = vld [vmem:[%s3861_s5 + $0x200] sm:$0xf]  ;;  %334 = vst [vmem:[%s3865_s6 + $0xf8] sm:$0xf] %v333_v62  ;;  %336 = vst [vmem:[%s3865_s6 + $0xfc] sm:$0xf] %v335_v63 }
  0x40   : > { %338 = vst [vmem:[%s3865_s6 + $0x100] sm:$0xf] %v337_v0  ;;  %v339_v1 = vld [vmem:[%s3861_s5 + $0x208] sm:$0xf]  ;;  %v341_v2 = vld [vmem:[%s3861_s5 + $0x210] sm:$0xf] }
  0x41   : > { %v343_v3 = vld [vmem:[%s3861_s5 + $0x218] sm:$0xf]  ;;  %340 = vst [vmem:[%s3865_s6 + $0x104] sm:$0xf] %v339_v1  ;;  %342 = vst [vmem:[%s3865_s6 + $0x108] sm:$0xf] %v341_v2 }
  0x42   : > { %344 = vst [vmem:[%s3865_s6 + $0x10c] sm:$0xf] %v343_v3  ;;  %v345_v4 = vld [vmem:[%s3861_s5 + $0x220] sm:$0xf]  ;;  %v347_v5 = vld [vmem:[%s3861_s5 + $0x228] sm:$0xf] }
  0x43   : > { %v349_v6 = vld [vmem:[%s3861_s5 + $0x230] sm:$0xf]  ;;  %346 = vst [vmem:[%s3865_s6 + $0x110] sm:$0xf] %v345_v4  ;;  %348 = vst [vmem:[%s3865_s6 + $0x114] sm:$0xf] %v347_v5 }
  0x44   : > { %350 = vst [vmem:[%s3865_s6 + $0x118] sm:$0xf] %v349_v6  ;;  %v351_v7 = vld [vmem:[%s3861_s5 + $0x238] sm:$0xf]  ;;  %v353_v8 = vld [vmem:[%s3861_s5 + $0x240] sm:$0xf] }
  0x45   : > { %v355_v9 = vld [vmem:[%s3861_s5 + $0x248] sm:$0xf]  ;;  %352 = vst [vmem:[%s3865_s6 + $0x11c] sm:$0xf] %v351_v7  ;;  %354 = vst [vmem:[%s3865_s6 + $0x120] sm:$0xf] %v353_v8 }
  0x46   : > { %356 = vst [vmem:[%s3865_s6 + $0x124] sm:$0xf] %v355_v9  ;;  %v357_v10 = vld [vmem:[%s3861_s5 + $0x250] sm:$0xf]  ;;  %v359_v11 = vld [vmem:[%s3861_s5 + $0x258] sm:$0xf] }
  0x47   : > { %v361_v12 = vld [vmem:[%s3861_s5 + $0x260] sm:$0xf]  ;;  %358 = vst [vmem:[%s3865_s6 + $0x128] sm:$0xf] %v357_v10  ;;  %360 = vst [vmem:[%s3865_s6 + $0x12c] sm:$0xf] %v359_v11 }
  0x48   : > { %362 = vst [vmem:[%s3865_s6 + $0x130] sm:$0xf] %v361_v12  ;;  %v363_v13 = vld [vmem:[%s3861_s5 + $0x268] sm:$0xf]  ;;  %v365_v14 = vld [vmem:[%s3861_s5 + $0x270] sm:$0xf] }
  0x49   : > { %v367_v15 = vld [vmem:[%s3861_s5 + $0x278] sm:$0xf]  ;;  %364 = vst [vmem:[%s3865_s6 + $0x134] sm:$0xf] %v363_v13  ;;  %366 = vst [vmem:[%s3865_s6 + $0x138] sm:$0xf] %v365_v14 }
  0x4a   : > { %368 = vst [vmem:[%s3865_s6 + $0x13c] sm:$0xf] %v367_v15  ;;  %v369_v16 = vld [vmem:[%s3861_s5 + $0x280] sm:$0xf]  ;;  %v371_v17 = vld [vmem:[%s3861_s5 + $0x288] sm:$0xf] }
  0x4b   : > { %v373_v18 = vld [vmem:[%s3861_s5 + $0x290] sm:$0xf]  ;;  %370 = vst [vmem:[%s3865_s6 + $0x140] sm:$0xf] %v369_v16  ;;  %372 = vst [vmem:[%s3865_s6 + $0x144] sm:$0xf] %v371_v17 }
  0x4c   : > { %374 = vst [vmem:[%s3865_s6 + $0x148] sm:$0xf] %v373_v18  ;;  %v375_v19 = vld [vmem:[%s3861_s5 + $0x298] sm:$0xf]  ;;  %v377_v20 = vld [vmem:[%s3861_s5 + $0x2a0] sm:$0xf] }
  0x4d   : > { %v379_v21 = vld [vmem:[%s3861_s5 + $0x2a8] sm:$0xf]  ;;  %376 = vst [vmem:[%s3865_s6 + $0x14c] sm:$0xf] %v375_v19  ;;  %378 = vst [vmem:[%s3865_s6 + $0x150] sm:$0xf] %v377_v20 }
  0x4e   : > { %380 = vst [vmem:[%s3865_s6 + $0x154] sm:$0xf] %v379_v21  ;;  %v381_v22 = vld [vmem:[%s3861_s5 + $0x2b0] sm:$0xf]  ;;  %v383_v23 = vld [vmem:[%s3861_s5 + $0x2b8] sm:$0xf] }
  0x4f   : > { %v385_v24 = vld [vmem:[%s3861_s5 + $0x2c0] sm:$0xf]  ;;  %382 = vst [vmem:[%s3865_s6 + $0x158] sm:$0xf] %v381_v22  ;;  %384 = vst [vmem:[%s3865_s6 + $0x15c] sm:$0xf] %v383_v23 }
  0x50   : > { %386 = vst [vmem:[%s3865_s6 + $0x160] sm:$0xf] %v385_v24  ;;  %v387_v25 = vld [vmem:[%s3861_s5 + $0x2c8] sm:$0xf]  ;;  %v389_v26 = vld [vmem:[%s3861_s5 + $0x2d0] sm:$0xf] }
  0x51   : > { %v391_v27 = vld [vmem:[%s3861_s5 + $0x2d8] sm:$0xf]  ;;  %388 = vst [vmem:[%s3865_s6 + $0x164] sm:$0xf] %v387_v25  ;;  %390 = vst [vmem:[%s3865_s6 + $0x168] sm:$0xf] %v389_v26 }
  0x52   : > { %392 = vst [vmem:[%s3865_s6 + $0x16c] sm:$0xf] %v391_v27  ;;  %v393_v28 = vld [vmem:[%s3861_s5 + $0x2e0] sm:$0xf]  ;;  %v395_v29 = vld [vmem:[%s3861_s5 + $0x2e8] sm:$0xf] }
  0x53   : > { %v397_v30 = vld [vmem:[%s3861_s5 + $0x2f0] sm:$0xf]  ;;  %394 = vst [vmem:[%s3865_s6 + $0x170] sm:$0xf] %v393_v28  ;;  %396 = vst [vmem:[%s3865_s6 + $0x174] sm:$0xf] %v395_v29 }
  0x54   : > { %398 = vst [vmem:[%s3865_s6 + $0x178] sm:$0xf] %v397_v30  ;;  %v399_v31 = vld [vmem:[%s3861_s5 + $0x2f8] sm:$0xf]  ;;  %v401_v32 = vld [vmem:[%s3861_s5 + $0x300] sm:$0xf] }
  0x55   : > { %v403_v33 = vld [vmem:[%s3861_s5 + $0x308] sm:$0xf]  ;;  %400 = vst [vmem:[%s3865_s6 + $0x17c] sm:$0xf] %v399_v31  ;;  %402 = vst [vmem:[%s3865_s6 + $0x180] sm:$0xf] %v401_v32 }
  0x56   : > { %404 = vst [vmem:[%s3865_s6 + $0x184] sm:$0xf] %v403_v33  ;;  %v405_v34 = vld [vmem:[%s3861_s5 + $0x310] sm:$0xf]  ;;  %v407_v35 = vld [vmem:[%s3861_s5 + $0x318] sm:$0xf] }
  0x57   : > { %v409_v36 = vld [vmem:[%s3861_s5 + $0x320] sm:$0xf]  ;;  %406 = vst [vmem:[%s3865_s6 + $0x188] sm:$0xf] %v405_v34  ;;  %408 = vst [vmem:[%s3865_s6 + $0x18c] sm:$0xf] %v407_v35 }
  0x58   : > { %410 = vst [vmem:[%s3865_s6 + $0x190] sm:$0xf] %v409_v36  ;;  %v411_v37 = vld [vmem:[%s3861_s5 + $0x328] sm:$0xf]  ;;  %v413_v38 = vld [vmem:[%s3861_s5 + $0x330] sm:$0xf] }
  0x59   : > { %v415_v39 = vld [vmem:[%s3861_s5 + $0x338] sm:$0xf]  ;;  %412 = vst [vmem:[%s3865_s6 + $0x194] sm:$0xf] %v411_v37  ;;  %414 = vst [vmem:[%s3865_s6 + $0x198] sm:$0xf] %v413_v38 }
  0x5a   : > { %416 = vst [vmem:[%s3865_s6 + $0x19c] sm:$0xf] %v415_v39  ;;  %v417_v40 = vld [vmem:[%s3861_s5 + $0x340] sm:$0xf]  ;;  %v419_v41 = vld [vmem:[%s3861_s5 + $0x348] sm:$0xf] }
  0x5b   : > { %v421_v42 = vld [vmem:[%s3861_s5 + $0x350] sm:$0xf]  ;;  %418 = vst [vmem:[%s3865_s6 + $0x1a0] sm:$0xf] %v417_v40  ;;  %420 = vst [vmem:[%s3865_s6 + $0x1a4] sm:$0xf] %v419_v41 }
  0x5c   : > { %422 = vst [vmem:[%s3865_s6 + $0x1a8] sm:$0xf] %v421_v42  ;;  %v423_v43 = vld [vmem:[%s3861_s5 + $0x358] sm:$0xf]  ;;  %v425_v44 = vld [vmem:[%s3861_s5 + $0x360] sm:$0xf] }
  0x5d   : > { %v427_v45 = vld [vmem:[%s3861_s5 + $0x368] sm:$0xf]  ;;  %424 = vst [vmem:[%s3865_s6 + $0x1ac] sm:$0xf] %v423_v43  ;;  %426 = vst [vmem:[%s3865_s6 + $0x1b0] sm:$0xf] %v425_v44 }
  0x5e   : > { %428 = vst [vmem:[%s3865_s6 + $0x1b4] sm:$0xf] %v427_v45  ;;  %v429_v46 = vld [vmem:[%s3861_s5 + $0x370] sm:$0xf]  ;;  %v431_v47 = vld [vmem:[%s3861_s5 + $0x378] sm:$0xf] }
  0x5f   : > { %v433_v48 = vld [vmem:[%s3861_s5 + $0x380] sm:$0xf]  ;;  %430 = vst [vmem:[%s3865_s6 + $0x1b8] sm:$0xf] %v429_v46  ;;  %432 = vst [vmem:[%s3865_s6 + $0x1bc] sm:$0xf] %v431_v47 }
  0x60   : > { %434 = vst [vmem:[%s3865_s6 + $0x1c0] sm:$0xf] %v433_v48  ;;  %v435_v49 = vld [vmem:[%s3861_s5 + $0x388] sm:$0xf]  ;;  %v437_v50 = vld [vmem:[%s3861_s5 + $0x390] sm:$0xf] }
  0x61   : > { %v439_v51 = vld [vmem:[%s3861_s5 + $0x398] sm:$0xf]  ;;  %436 = vst [vmem:[%s3865_s6 + $0x1c4] sm:$0xf] %v435_v49  ;;  %438 = vst [vmem:[%s3865_s6 + $0x1c8] sm:$0xf] %v437_v50 }
  0x62   : > { %440 = vst [vmem:[%s3865_s6 + $0x1cc] sm:$0xf] %v439_v51  ;;  %v441_v52 = vld [vmem:[%s3861_s5 + $0x3a0] sm:$0xf]  ;;  %v443_v53 = vld [vmem:[%s3861_s5 + $0x3a8] sm:$0xf] }
  0x63   : > { %v445_v54 = vld [vmem:[%s3861_s5 + $0x3b0] sm:$0xf]  ;;  %442 = vst [vmem:[%s3865_s6 + $0x1d0] sm:$0xf] %v441_v52  ;;  %444 = vst [vmem:[%s3865_s6 + $0x1d4] sm:$0xf] %v443_v53 }
  0x64   : > { %446 = vst [vmem:[%s3865_s6 + $0x1d8] sm:$0xf] %v445_v54  ;;  %v447_v55 = vld [vmem:[%s3861_s5 + $0x3b8] sm:$0xf]  ;;  %v449_v56 = vld [vmem:[%s3861_s5 + $0x3c0] sm:$0xf] }
  0x65   : > { %v451_v57 = vld [vmem:[%s3861_s5 + $0x3c8] sm:$0xf]  ;;  %448 = vst [vmem:[%s3865_s6 + $0x1dc] sm:$0xf] %v447_v55  ;;  %450 = vst [vmem:[%s3865_s6 + $0x1e0] sm:$0xf] %v449_v56 }
  0x66   : > { %452 = vst [vmem:[%s3865_s6 + $0x1e4] sm:$0xf] %v451_v57  ;;  %v453_v58 = vld [vmem:[%s3861_s5 + $0x3d0] sm:$0xf]  ;;  %v455_v59 = vld [vmem:[%s3861_s5 + $0x3d8] sm:$0xf] }
  0x67   : > { %v457_v60 = vld [vmem:[%s3861_s5 + $0x3e0] sm:$0xf]  ;;  %454 = vst [vmem:[%s3865_s6 + $0x1e8] sm:$0xf] %v453_v58  ;;  %456 = vst [vmem:[%s3865_s6 + $0x1ec] sm:$0xf] %v455_v59 }
  0x68   : > { %458 = vst [vmem:[%s3865_s6 + $0x1f0] sm:$0xf] %v457_v60  ;;  %v459_v61 = vld [vmem:[%s3861_s5 + $0x3e8] sm:$0xf]  ;;  %v461_v62 = vld [vmem:[%s3861_s5 + $0x3f0] sm:$0xf] }
  0x69   : > { %v463_v63 = vld [vmem:[%s3861_s5 + $0x3f8] sm:$0xf]  ;;  %460 = vst [vmem:[%s3865_s6 + $0x1f4] sm:$0xf] %v459_v61  ;;  %462 = vst [vmem:[%s3865_s6 + $0x1f8] sm:$0xf] %v461_v62 }
  0x6a   : > { %464 = vst [vmem:[%s3865_s6 + $0x1fc] sm:$0xf] %v463_v63  ;;  %v465_v0 = vld [vmem:[%s3861_s5 + $0x400] sm:$0xf]  ;;  %v467_v1 = vld [vmem:[%s3861_s5 + $0x408] sm:$0xf] }
  0x6b   : > { %v469_v2 = vld [vmem:[%s3861_s5 + $0x410] sm:$0xf]  ;;  %466 = vst [vmem:[%s3865_s6 + $0x200] sm:$0xf] %v465_v0  ;;  %468 = vst [vmem:[%s3865_s6 + $0x204] sm:$0xf] %v467_v1 }
  0x6c   : > { %470 = vst [vmem:[%s3865_s6 + $0x208] sm:$0xf] %v469_v2  ;;  %v471_v3 = vld [vmem:[%s3861_s5 + $0x418] sm:$0xf]  ;;  %v473_v4 = vld [vmem:[%s3861_s5 + $0x420] sm:$0xf] }
  0x6d   : > { %v475_v5 = vld [vmem:[%s3861_s5 + $0x428] sm:$0xf]  ;;  %472 = vst [vmem:[%s3865_s6 + $0x20c] sm:$0xf] %v471_v3  ;;  %474 = vst [vmem:[%s3865_s6 + $0x210] sm:$0xf] %v473_v4 }
  0x6e   : > { %476 = vst [vmem:[%s3865_s6 + $0x214] sm:$0xf] %v475_v5  ;;  %v477_v6 = vld [vmem:[%s3861_s5 + $0x430] sm:$0xf]  ;;  %v479_v7 = vld [vmem:[%s3861_s5 + $0x438] sm:$0xf] }
  0x6f   : > { %v481_v8 = vld [vmem:[%s3861_s5 + $0x440] sm:$0xf]  ;;  %478 = vst [vmem:[%s3865_s6 + $0x218] sm:$0xf] %v477_v6  ;;  %480 = vst [vmem:[%s3865_s6 + $0x21c] sm:$0xf] %v479_v7 }
  0x70   : > { %482 = vst [vmem:[%s3865_s6 + $0x220] sm:$0xf] %v481_v8  ;;  %v483_v9 = vld [vmem:[%s3861_s5 + $0x448] sm:$0xf]  ;;  %v485_v10 = vld [vmem:[%s3861_s5 + $0x450] sm:$0xf] }
  0x71   : > { %v487_v11 = vld [vmem:[%s3861_s5 + $0x458] sm:$0xf]  ;;  %484 = vst [vmem:[%s3865_s6 + $0x224] sm:$0xf] %v483_v9  ;;  %486 = vst [vmem:[%s3865_s6 + $0x228] sm:$0xf] %v485_v10 }
  0x72   : > { %488 = vst [vmem:[%s3865_s6 + $0x22c] sm:$0xf] %v487_v11  ;;  %v489_v12 = vld [vmem:[%s3861_s5 + $0x460] sm:$0xf]  ;;  %v491_v13 = vld [vmem:[%s3861_s5 + $0x468] sm:$0xf] }
  0x73   : > { %v493_v14 = vld [vmem:[%s3861_s5 + $0x470] sm:$0xf]  ;;  %490 = vst [vmem:[%s3865_s6 + $0x230] sm:$0xf] %v489_v12  ;;  %492 = vst [vmem:[%s3865_s6 + $0x234] sm:$0xf] %v491_v13 }
  0x74   : > { %494 = vst [vmem:[%s3865_s6 + $0x238] sm:$0xf] %v493_v14  ;;  %v495_v15 = vld [vmem:[%s3861_s5 + $0x478] sm:$0xf]  ;;  %v497_v16 = vld [vmem:[%s3861_s5 + $0x480] sm:$0xf] }
  0x75   : > { %v499_v17 = vld [vmem:[%s3861_s5 + $0x488] sm:$0xf]  ;;  %496 = vst [vmem:[%s3865_s6 + $0x23c] sm:$0xf] %v495_v15  ;;  %498 = vst [vmem:[%s3865_s6 + $0x240] sm:$0xf] %v497_v16 }
  0x76   : > { %500 = vst [vmem:[%s3865_s6 + $0x244] sm:$0xf] %v499_v17  ;;  %v501_v18 = vld [vmem:[%s3861_s5 + $0x490] sm:$0xf]  ;;  %v503_v19 = vld [vmem:[%s3861_s5 + $0x498] sm:$0xf] }
  0x77   : > { %v505_v20 = vld [vmem:[%s3861_s5 + $0x4a0] sm:$0xf]  ;;  %502 = vst [vmem:[%s3865_s6 + $0x248] sm:$0xf] %v501_v18  ;;  %504 = vst [vmem:[%s3865_s6 + $0x24c] sm:$0xf] %v503_v19 }
  0x78   : > { %506 = vst [vmem:[%s3865_s6 + $0x250] sm:$0xf] %v505_v20  ;;  %v507_v21 = vld [vmem:[%s3861_s5 + $0x4a8] sm:$0xf]  ;;  %v509_v22 = vld [vmem:[%s3861_s5 + $0x4b0] sm:$0xf] }
  0x79   : > { %v511_v23 = vld [vmem:[%s3861_s5 + $0x4b8] sm:$0xf]  ;;  %508 = vst [vmem:[%s3865_s6 + $0x254] sm:$0xf] %v507_v21  ;;  %510 = vst [vmem:[%s3865_s6 + $0x258] sm:$0xf] %v509_v22 }
  0x7a   : > { %512 = vst [vmem:[%s3865_s6 + $0x25c] sm:$0xf] %v511_v23  ;;  %v513_v24 = vld [vmem:[%s3861_s5 + $0x4c0] sm:$0xf]  ;;  %v515_v25 = vld [vmem:[%s3861_s5 + $0x4c8] sm:$0xf] }
  0x7b   : > { %v517_v26 = vld [vmem:[%s3861_s5 + $0x4d0] sm:$0xf]  ;;  %514 = vst [vmem:[%s3865_s6 + $0x260] sm:$0xf] %v513_v24  ;;  %516 = vst [vmem:[%s3865_s6 + $0x264] sm:$0xf] %v515_v25 }
  0x7c   : > { %518 = vst [vmem:[%s3865_s6 + $0x268] sm:$0xf] %v517_v26  ;;  %v519_v27 = vld [vmem:[%s3861_s5 + $0x4d8] sm:$0xf]  ;;  %v521_v28 = vld [vmem:[%s3861_s5 + $0x4e0] sm:$0xf] }
  0x7d   : > { %v523_v29 = vld [vmem:[%s3861_s5 + $0x4e8] sm:$0xf]  ;;  %520 = vst [vmem:[%s3865_s6 + $0x26c] sm:$0xf] %v519_v27  ;;  %522 = vst [vmem:[%s3865_s6 + $0x270] sm:$0xf] %v521_v28 }
  0x7e   : > { %524 = vst [vmem:[%s3865_s6 + $0x274] sm:$0xf] %v523_v29  ;;  %v525_v30 = vld [vmem:[%s3861_s5 + $0x4f0] sm:$0xf]  ;;  %v527_v31 = vld [vmem:[%s3861_s5 + $0x4f8] sm:$0xf] }
  0x7f   : > { %v529_v32 = vld [vmem:[%s3861_s5 + $0x500] sm:$0xf]  ;;  %526 = vst [vmem:[%s3865_s6 + $0x278] sm:$0xf] %v525_v30  ;;  %528 = vst [vmem:[%s3865_s6 + $0x27c] sm:$0xf] %v527_v31 }
  0x80   : > { %530 = vst [vmem:[%s3865_s6 + $0x280] sm:$0xf] %v529_v32  ;;  %v531_v33 = vld [vmem:[%s3861_s5 + $0x508] sm:$0xf]  ;;  %v533_v34 = vld [vmem:[%s3861_s5 + $0x510] sm:$0xf] }
  0x81   : > { %v535_v35 = vld [vmem:[%s3861_s5 + $0x518] sm:$0xf]  ;;  %532 = vst [vmem:[%s3865_s6 + $0x284] sm:$0xf] %v531_v33  ;;  %534 = vst [vmem:[%s3865_s6 + $0x288] sm:$0xf] %v533_v34 }
  0x82   : > { %536 = vst [vmem:[%s3865_s6 + $0x28c] sm:$0xf] %v535_v35  ;;  %v537_v36 = vld [vmem:[%s3861_s5 + $0x520] sm:$0xf]  ;;  %v539_v37 = vld [vmem:[%s3861_s5 + $0x528] sm:$0xf] }
  0x83   : > { %v541_v38 = vld [vmem:[%s3861_s5 + $0x530] sm:$0xf]  ;;  %538 = vst [vmem:[%s3865_s6 + $0x290] sm:$0xf] %v537_v36  ;;  %540 = vst [vmem:[%s3865_s6 + $0x294] sm:$0xf] %v539_v37 }
  0x84   : > { %542 = vst [vmem:[%s3865_s6 + $0x298] sm:$0xf] %v541_v38  ;;  %v543_v39 = vld [vmem:[%s3861_s5 + $0x538] sm:$0xf]  ;;  %v545_v40 = vld [vmem:[%s3861_s5 + $0x540] sm:$0xf] }
  0x85   : > { %v547_v41 = vld [vmem:[%s3861_s5 + $0x548] sm:$0xf]  ;;  %544 = vst [vmem:[%s3865_s6 + $0x29c] sm:$0xf] %v543_v39  ;;  %546 = vst [vmem:[%s3865_s6 + $0x2a0] sm:$0xf] %v545_v40 }
  0x86   : > { %548 = vst [vmem:[%s3865_s6 + $0x2a4] sm:$0xf] %v547_v41  ;;  %v549_v42 = vld [vmem:[%s3861_s5 + $0x550] sm:$0xf]  ;;  %v551_v43 = vld [vmem:[%s3861_s5 + $0x558] sm:$0xf] }
  0x87   : > { %v553_v44 = vld [vmem:[%s3861_s5 + $0x560] sm:$0xf]  ;;  %550 = vst [vmem:[%s3865_s6 + $0x2a8] sm:$0xf] %v549_v42  ;;  %552 = vst [vmem:[%s3865_s6 + $0x2ac] sm:$0xf] %v551_v43 }
  0x88   : > { %554 = vst [vmem:[%s3865_s6 + $0x2b0] sm:$0xf] %v553_v44  ;;  %v555_v45 = vld [vmem:[%s3861_s5 + $0x568] sm:$0xf]  ;;  %v557_v46 = vld [vmem:[%s3861_s5 + $0x570] sm:$0xf] }
  0x89   : > { %v559_v47 = vld [vmem:[%s3861_s5 + $0x578] sm:$0xf]  ;;  %556 = vst [vmem:[%s3865_s6 + $0x2b4] sm:$0xf] %v555_v45  ;;  %558 = vst [vmem:[%s3865_s6 + $0x2b8] sm:$0xf] %v557_v46 }
  0x8a   : > { %560 = vst [vmem:[%s3865_s6 + $0x2bc] sm:$0xf] %v559_v47  ;;  %v561_v48 = vld [vmem:[%s3861_s5 + $0x580] sm:$0xf]  ;;  %v563_v49 = vld [vmem:[%s3861_s5 + $0x588] sm:$0xf] }
  0x8b   : > { %v565_v50 = vld [vmem:[%s3861_s5 + $0x590] sm:$0xf]  ;;  %562 = vst [vmem:[%s3865_s6 + $0x2c0] sm:$0xf] %v561_v48  ;;  %564 = vst [vmem:[%s3865_s6 + $0x2c4] sm:$0xf] %v563_v49 }
  0x8c   : > { %566 = vst [vmem:[%s3865_s6 + $0x2c8] sm:$0xf] %v565_v50  ;;  %v567_v51 = vld [vmem:[%s3861_s5 + $0x598] sm:$0xf]  ;;  %v569_v52 = vld [vmem:[%s3861_s5 + $0x5a0] sm:$0xf] }
  0x8d   : > { %v571_v53 = vld [vmem:[%s3861_s5 + $0x5a8] sm:$0xf]  ;;  %568 = vst [vmem:[%s3865_s6 + $0x2cc] sm:$0xf] %v567_v51  ;;  %570 = vst [vmem:[%s3865_s6 + $0x2d0] sm:$0xf] %v569_v52 }
  0x8e   : > { %572 = vst [vmem:[%s3865_s6 + $0x2d4] sm:$0xf] %v571_v53  ;;  %v573_v54 = vld [vmem:[%s3861_s5 + $0x5b0] sm:$0xf]  ;;  %v575_v55 = vld [vmem:[%s3861_s5 + $0x5b8] sm:$0xf] }
  0x8f   : > { %v577_v56 = vld [vmem:[%s3861_s5 + $0x5c0] sm:$0xf]  ;;  %574 = vst [vmem:[%s3865_s6 + $0x2d8] sm:$0xf] %v573_v54  ;;  %576 = vst [vmem:[%s3865_s6 + $0x2dc] sm:$0xf] %v575_v55 }
  0x90   : > { %578 = vst [vmem:[%s3865_s6 + $0x2e0] sm:$0xf] %v577_v56  ;;  %v579_v57 = vld [vmem:[%s3861_s5 + $0x5c8] sm:$0xf]  ;;  %v581_v58 = vld [vmem:[%s3861_s5 + $0x5d0] sm:$0xf] }
  0x91   : > { %v583_v59 = vld [vmem:[%s3861_s5 + $0x5d8] sm:$0xf]  ;;  %580 = vst [vmem:[%s3865_s6 + $0x2e4] sm:$0xf] %v579_v57  ;;  %582 = vst [vmem:[%s3865_s6 + $0x2e8] sm:$0xf] %v581_v58 }
  0x92   : > { %584 = vst [vmem:[%s3865_s6 + $0x2ec] sm:$0xf] %v583_v59  ;;  %v585_v60 = vld [vmem:[%s3861_s5 + $0x5e0] sm:$0xf]  ;;  %v587_v61 = vld [vmem:[%s3861_s5 + $0x5e8] sm:$0xf] }
  0x93   : > { %v589_v62 = vld [vmem:[%s3861_s5 + $0x5f0] sm:$0xf]  ;;  %586 = vst [vmem:[%s3865_s6 + $0x2f0] sm:$0xf] %v585_v60  ;;  %588 = vst [vmem:[%s3865_s6 + $0x2f4] sm:$0xf] %v587_v61 }
  0x94   : > { %590 = vst [vmem:[%s3865_s6 + $0x2f8] sm:$0xf] %v589_v62  ;;  %v591_v63 = vld [vmem:[%s3861_s5 + $0x5f8] sm:$0xf]  ;;  %v593_v0 = vld [vmem:[%s3861_s5 + $0x600] sm:$0xf] }
  0x95   : > { %v595_v1 = vld [vmem:[%s3861_s5 + $0x608] sm:$0xf]  ;;  %592 = vst [vmem:[%s3865_s6 + $0x2fc] sm:$0xf] %v591_v63  ;;  %594 = vst [vmem:[%s3865_s6 + $0x300] sm:$0xf] %v593_v0 }
  0x96   : > { %596 = vst [vmem:[%s3865_s6 + $0x304] sm:$0xf] %v595_v1  ;;  %v597_v2 = vld [vmem:[%s3861_s5 + $0x610] sm:$0xf]  ;;  %v599_v3 = vld [vmem:[%s3861_s5 + $0x618] sm:$0xf] }
  0x97   : > { %v601_v4 = vld [vmem:[%s3861_s5 + $0x620] sm:$0xf]  ;;  %598 = vst [vmem:[%s3865_s6 + $0x308] sm:$0xf] %v597_v2  ;;  %600 = vst [vmem:[%s3865_s6 + $0x30c] sm:$0xf] %v599_v3 }
  0x98   : > { %602 = vst [vmem:[%s3865_s6 + $0x310] sm:$0xf] %v601_v4  ;;  %v603_v5 = vld [vmem:[%s3861_s5 + $0x628] sm:$0xf]  ;;  %v605_v6 = vld [vmem:[%s3861_s5 + $0x630] sm:$0xf] }
  0x99   : > { %v607_v7 = vld [vmem:[%s3861_s5 + $0x638] sm:$0xf]  ;;  %604 = vst [vmem:[%s3865_s6 + $0x314] sm:$0xf] %v603_v5  ;;  %606 = vst [vmem:[%s3865_s6 + $0x318] sm:$0xf] %v605_v6 }
  0x9a   : > { %608 = vst [vmem:[%s3865_s6 + $0x31c] sm:$0xf] %v607_v7  ;;  %v609_v8 = vld [vmem:[%s3861_s5 + $0x640] sm:$0xf]  ;;  %v611_v9 = vld [vmem:[%s3861_s5 + $0x648] sm:$0xf] }
  0x9b   : > { %v613_v10 = vld [vmem:[%s3861_s5 + $0x650] sm:$0xf]  ;;  %610 = vst [vmem:[%s3865_s6 + $0x320] sm:$0xf] %v609_v8  ;;  %612 = vst [vmem:[%s3865_s6 + $0x324] sm:$0xf] %v611_v9 }
  0x9c   : > { %614 = vst [vmem:[%s3865_s6 + $0x328] sm:$0xf] %v613_v10  ;;  %v615_v11 = vld [vmem:[%s3861_s5 + $0x658] sm:$0xf]  ;;  %v617_v12 = vld [vmem:[%s3861_s5 + $0x660] sm:$0xf] }
  0x9d   : > { %v619_v13 = vld [vmem:[%s3861_s5 + $0x668] sm:$0xf]  ;;  %616 = vst [vmem:[%s3865_s6 + $0x32c] sm:$0xf] %v615_v11  ;;  %618 = vst [vmem:[%s3865_s6 + $0x330] sm:$0xf] %v617_v12 }
  0x9e   : > { %620 = vst [vmem:[%s3865_s6 + $0x334] sm:$0xf] %v619_v13  ;;  %v621_v14 = vld [vmem:[%s3861_s5 + $0x670] sm:$0xf]  ;;  %v623_v15 = vld [vmem:[%s3861_s5 + $0x678] sm:$0xf] }
  0x9f   : > { %v625_v16 = vld [vmem:[%s3861_s5 + $0x680] sm:$0xf]  ;;  %622 = vst [vmem:[%s3865_s6 + $0x338] sm:$0xf] %v621_v14  ;;  %624 = vst [vmem:[%s3865_s6 + $0x33c] sm:$0xf] %v623_v15 }
  0xa0   : > { %626 = vst [vmem:[%s3865_s6 + $0x340] sm:$0xf] %v625_v16  ;;  %v627_v17 = vld [vmem:[%s3861_s5 + $0x688] sm:$0xf]  ;;  %v629_v18 = vld [vmem:[%s3861_s5 + $0x690] sm:$0xf] }
  0xa1   : > { %v631_v19 = vld [vmem:[%s3861_s5 + $0x698] sm:$0xf]  ;;  %628 = vst [vmem:[%s3865_s6 + $0x344] sm:$0xf] %v627_v17  ;;  %630 = vst [vmem:[%s3865_s6 + $0x348] sm:$0xf] %v629_v18 }
  0xa2   : > { %632 = vst [vmem:[%s3865_s6 + $0x34c] sm:$0xf] %v631_v19  ;;  %v633_v20 = vld [vmem:[%s3861_s5 + $0x6a0] sm:$0xf]  ;;  %v635_v21 = vld [vmem:[%s3861_s5 + $0x6a8] sm:$0xf] }
  0xa3   : > { %v637_v22 = vld [vmem:[%s3861_s5 + $0x6b0] sm:$0xf]  ;;  %634 = vst [vmem:[%s3865_s6 + $0x350] sm:$0xf] %v633_v20  ;;  %636 = vst [vmem:[%s3865_s6 + $0x354] sm:$0xf] %v635_v21 }
  0xa4   : > { %638 = vst [vmem:[%s3865_s6 + $0x358] sm:$0xf] %v637_v22  ;;  %v639_v23 = vld [vmem:[%s3861_s5 + $0x6b8] sm:$0xf]  ;;  %v641_v24 = vld [vmem:[%s3861_s5 + $0x6c0] sm:$0xf] }
  0xa5   : > { %v643_v25 = vld [vmem:[%s3861_s5 + $0x6c8] sm:$0xf]  ;;  %640 = vst [vmem:[%s3865_s6 + $0x35c] sm:$0xf] %v639_v23  ;;  %642 = vst [vmem:[%s3865_s6 + $0x360] sm:$0xf] %v641_v24 }
  0xa6   : > { %644 = vst [vmem:[%s3865_s6 + $0x364] sm:$0xf] %v643_v25  ;;  %v645_v26 = vld [vmem:[%s3861_s5 + $0x6d0] sm:$0xf]  ;;  %v647_v27 = vld [vmem:[%s3861_s5 + $0x6d8] sm:$0xf] }
  0xa7   : > { %v649_v28 = vld [vmem:[%s3861_s5 + $0x6e0] sm:$0xf]  ;;  %646 = vst [vmem:[%s3865_s6 + $0x368] sm:$0xf] %v645_v26  ;;  %648 = vst [vmem:[%s3865_s6 + $0x36c] sm:$0xf] %v647_v27 }
  0xa8   : > { %650 = vst [vmem:[%s3865_s6 + $0x370] sm:$0xf] %v649_v28  ;;  %v651_v29 = vld [vmem:[%s3861_s5 + $0x6e8] sm:$0xf]  ;;  %v653_v30 = vld [vmem:[%s3861_s5 + $0x6f0] sm:$0xf] }
  0xa9   : > { %v655_v31 = vld [vmem:[%s3861_s5 + $0x6f8] sm:$0xf]  ;;  %652 = vst [vmem:[%s3865_s6 + $0x374] sm:$0xf] %v651_v29  ;;  %654 = vst [vmem:[%s3865_s6 + $0x378] sm:$0xf] %v653_v30 }
  0xaa   : > { %656 = vst [vmem:[%s3865_s6 + $0x37c] sm:$0xf] %v655_v31  ;;  %v657_v32 = vld [vmem:[%s3861_s5 + $0x700] sm:$0xf]  ;;  %v659_v33 = vld [vmem:[%s3861_s5 + $0x708] sm:$0xf] }
  0xab   : > { %v661_v34 = vld [vmem:[%s3861_s5 + $0x710] sm:$0xf]  ;;  %658 = vst [vmem:[%s3865_s6 + $0x380] sm:$0xf] %v657_v32  ;;  %660 = vst [vmem:[%s3865_s6 + $0x384] sm:$0xf] %v659_v33 }
  0xac   : > { %662 = vst [vmem:[%s3865_s6 + $0x388] sm:$0xf] %v661_v34  ;;  %v663_v35 = vld [vmem:[%s3861_s5 + $0x718] sm:$0xf]  ;;  %v665_v36 = vld [vmem:[%s3861_s5 + $0x720] sm:$0xf] }
  0xad   : > { %v667_v37 = vld [vmem:[%s3861_s5 + $0x728] sm:$0xf]  ;;  %664 = vst [vmem:[%s3865_s6 + $0x38c] sm:$0xf] %v663_v35  ;;  %666 = vst [vmem:[%s3865_s6 + $0x390] sm:$0xf] %v665_v36 }
  0xae   : > { %668 = vst [vmem:[%s3865_s6 + $0x394] sm:$0xf] %v667_v37  ;;  %v669_v38 = vld [vmem:[%s3861_s5 + $0x730] sm:$0xf]  ;;  %v671_v39 = vld [vmem:[%s3861_s5 + $0x738] sm:$0xf] }
  0xaf   : > { %v673_v40 = vld [vmem:[%s3861_s5 + $0x740] sm:$0xf]  ;;  %670 = vst [vmem:[%s3865_s6 + $0x398] sm:$0xf] %v669_v38  ;;  %672 = vst [vmem:[%s3865_s6 + $0x39c] sm:$0xf] %v671_v39 }
  0xb0   : > { %674 = vst [vmem:[%s3865_s6 + $0x3a0] sm:$0xf] %v673_v40  ;;  %v675_v41 = vld [vmem:[%s3861_s5 + $0x748] sm:$0xf]  ;;  %v677_v42 = vld [vmem:[%s3861_s5 + $0x750] sm:$0xf] }
  0xb1   : > { %v679_v43 = vld [vmem:[%s3861_s5 + $0x758] sm:$0xf]  ;;  %676 = vst [vmem:[%s3865_s6 + $0x3a4] sm:$0xf] %v675_v41  ;;  %678 = vst [vmem:[%s3865_s6 + $0x3a8] sm:$0xf] %v677_v42 }
  0xb2   : > { %680 = vst [vmem:[%s3865_s6 + $0x3ac] sm:$0xf] %v679_v43  ;;  %v681_v44 = vld [vmem:[%s3861_s5 + $0x760] sm:$0xf]  ;;  %v683_v45 = vld [vmem:[%s3861_s5 + $0x768] sm:$0xf] }
  0xb3   : > { %v685_v46 = vld [vmem:[%s3861_s5 + $0x770] sm:$0xf]  ;;  %682 = vst [vmem:[%s3865_s6 + $0x3b0] sm:$0xf] %v681_v44  ;;  %684 = vst [vmem:[%s3865_s6 + $0x3b4] sm:$0xf] %v683_v45 }
  0xb4   : > { %686 = vst [vmem:[%s3865_s6 + $0x3b8] sm:$0xf] %v685_v46  ;;  %v687_v47 = vld [vmem:[%s3861_s5 + $0x778] sm:$0xf]  ;;  %v689_v48 = vld [vmem:[%s3861_s5 + $0x780] sm:$0xf] }
  0xb5   : > { %v691_v49 = vld [vmem:[%s3861_s5 + $0x788] sm:$0xf]  ;;  %688 = vst [vmem:[%s3865_s6 + $0x3bc] sm:$0xf] %v687_v47  ;;  %690 = vst [vmem:[%s3865_s6 + $0x3c0] sm:$0xf] %v689_v48 }
  0xb6   : > { %692 = vst [vmem:[%s3865_s6 + $0x3c4] sm:$0xf] %v691_v49  ;;  %v693_v50 = vld [vmem:[%s3861_s5 + $0x790] sm:$0xf]  ;;  %v695_v51 = vld [vmem:[%s3861_s5 + $0x798] sm:$0xf] }
  0xb7   : > { %v697_v52 = vld [vmem:[%s3861_s5 + $0x7a0] sm:$0xf]  ;;  %694 = vst [vmem:[%s3865_s6 + $0x3c8] sm:$0xf] %v693_v50  ;;  %696 = vst [vmem:[%s3865_s6 + $0x3cc] sm:$0xf] %v695_v51 }
  0xb8   : > { %698 = vst [vmem:[%s3865_s6 + $0x3d0] sm:$0xf] %v697_v52  ;;  %v699_v53 = vld [vmem:[%s3861_s5 + $0x7a8] sm:$0xf]  ;;  %v701_v54 = vld [vmem:[%s3861_s5 + $0x7b0] sm:$0xf] }
  0xb9   : > { %v703_v55 = vld [vmem:[%s3861_s5 + $0x7b8] sm:$0xf]  ;;  %700 = vst [vmem:[%s3865_s6 + $0x3d4] sm:$0xf] %v699_v53  ;;  %702 = vst [vmem:[%s3865_s6 + $0x3d8] sm:$0xf] %v701_v54 }
  0xba   : > { %704 = vst [vmem:[%s3865_s6 + $0x3dc] sm:$0xf] %v703_v55  ;;  %v705_v56 = vld [vmem:[%s3861_s5 + $0x7c0] sm:$0xf]  ;;  %v707_v57 = vld [vmem:[%s3861_s5 + $0x7c8] sm:$0xf] }
  0xbb   : > { %v709_v58 = vld [vmem:[%s3861_s5 + $0x7d0] sm:$0xf]  ;;  %706 = vst [vmem:[%s3865_s6 + $0x3e0] sm:$0xf] %v705_v56  ;;  %708 = vst [vmem:[%s3865_s6 + $0x3e4] sm:$0xf] %v707_v57 }
  0xbc   : > { %710 = vst [vmem:[%s3865_s6 + $0x3e8] sm:$0xf] %v709_v58  ;;  %v711_v59 = vld [vmem:[%s3861_s5 + $0x7d8] sm:$0xf]  ;;  %v713_v60 = vld [vmem:[%s3861_s5 + $0x7e0] sm:$0xf] }
  0xbd   : > { %v715_v61 = vld [vmem:[%s3861_s5 + $0x7e8] sm:$0xf]  ;;  %712 = vst [vmem:[%s3865_s6 + $0x3ec] sm:$0xf] %v711_v59  ;;  %714 = vst [vmem:[%s3865_s6 + $0x3f0] sm:$0xf] %v713_v60 }
  0xbe   : > { %716 = vst [vmem:[%s3865_s6 + $0x3f4] sm:$0xf] %v715_v61  ;;  %v717_v62 = vld [vmem:[%s3861_s5 + $0x7f0] sm:$0xf]  ;;  %v719_v63 = vld [vmem:[%s3861_s5 + $0x7f8] sm:$0xf] }
  0xbf   : > { %718 = vst [vmem:[%s3865_s6 + $0x3f8] sm:$0xf] %v717_v62  ;;  %720 = vst [vmem:[%s3865_s6 + $0x3fc] sm:$0xf] %v719_v63 }
  0xc0 PF: > { %p3187_p8 = scmp.ge.s32.totalorder %s3786_s19, 1  ;;  %p1266_p9 = scmp.lt.s32.totalorder %s3786_s19, 3 }
  0xc2   : > { %p1267_p10 = pnand %p3187_p8, %p1266_p9 }
  0xc3   : > { %s1273_s7 = sand.u32 (!%p1267_p10), 1, %s3770_s15   ;;  %v4383_v0 = vld [vmem:[%s4655_s0] sm:$0xff] (!%p1267_p10)  ;;  %v4393_v2 = vld [vmem:[%s4655_s0 + $0x8] sm:$0xff] (!%p1267_p10)  ;;  %p1315_p11 = scmp.lt.s32.totalorder (!%p1267_p10), %s3778_s17, 1 }
  0xc4   : > { %1270 = sbr.rel (%p1267_p10) target bundleno = 616 (0x268), region = 73  ;;  %v4388_v1 = vld [vmem:[%s4655_s0 + $0x40] sm:$0xff] (!%p1267_p10)  ;;  %s3188_s14 = sshll.u32 (!%p1267_p10), %s1273_s7, 10  ;;  %v4402_v4 = vld [vmem:[%s4655_s0 + $0x48] sm:$0xff] (!%p1267_p10) }
  0xc5   : > { %v3191_v3 = vcombine.high (!%p1267_p10), %v4383_v0, %v4388_v1  ;;  %v3193_v5 = vcombine.high (!%p1267_p10), %v4393_v2, %v4402_v4  ;;  %s4406_s23 = scalar_lea.vmem (!%p1267_p10), [#allocation3], %s3188_s14  ;;  %v1350_v35 = vld [vmem:[%s4655_s0 + $0x80] sm:$0xff] (!%p1267_p10)  ;;  %v1351_v38 = vld [vmem:[%s4655_s0 + $0x88] sm:$0xff] (!%p1267_p10)  ;;  %v3190_v42 = vcombine.low (!%p1267_p10), %v4383_v0, %v4388_v1  ;;  %v3192_v43 = vcombine.low (!%p1267_p10), %v4393_v2, %v4402_v4  ;;  %s3189_s21 = sshll.u32 (!%p1267_p10), %s1273_s7, 5 }
  0xc6   : > { %v3618_v6 = vld [vmem:[%s4406_s23 + $0x40] sm:$0xff] (!%p1267_p10)   ;;  %v3622_v10 = vld [vmem:[%s4406_s23 + $0x48] sm:$0xff] (!%p1267_p10)   ;;  %v3626_v14 = vld [vmem:[%s4406_s23 + $0x50] sm:$0xff] (!%p1267_p10)   ;;  %s1307_s22 = scalar_lea.vmem (!%p1267_p10), [#allocation4], %s3189_s21 }
  0xc7   : > { %2582 = vmatprep.mubr.bf16.mxu0 (!%p1267_p10), %v3191_v3  ;;  %v3619_v7 = vld [vmem:[%s4406_s23 + $0xc0] sm:$0xff] (!%p1267_p10)   ;;  %2631 = vmatprep.mubr.bf16.mxu1 (!%p1267_p10), %v3193_v5  ;;  %v3623_v11 = vld [vmem:[%s4406_s23 + $0xc8] sm:$0xff] (!%p1267_p10)   ;;  %v3627_v15 = vld [vmem:[%s4406_s23 + $0xd0] sm:$0xff] (!%p1267_p10)  }
  0xc8   : > { %3354 = vmatprep.subr.bf16.mxu0 (!%p1267_p10), %v3618_v6  ;;  %v3620_v8 = vld [vmem:[%s4406_s23] sm:$0xff] (!%p1267_p10)   ;;  %3382 = vmatprep.subr.bf16.mxu1 (!%p1267_p10), %v3619_v7  ;;  %v3624_v12 = vld [vmem:[%s4406_s23 + $0x8] sm:$0xff] (!%p1267_p10)   ;;  %v3628_v16 = vld [vmem:[%s4406_s23 + $0x10] sm:$0xff] (!%p1267_p10)  }
  0xc9   : > { %v3621_v9 = vld [vmem:[%s4406_s23 + $0x80] sm:$0xff] (!%p1267_p10)   ;;  %3355 = vmatpush3.bf16.msra.mxu0 (!%p1267_p10), %v3620_v8  ;;  %v3625_v13 = vld [vmem:[%s4406_s23 + $0x88] sm:$0xff] (!%p1267_p10)   ;;  %v3629_v17 = vld [vmem:[%s4406_s23 + $0x90] sm:$0xff] (!%p1267_p10)  }
  0xca   : > { %3383 = vmatpush3.bf16.msra.mxu1 (!%p1267_p10), %v3621_v9  ;;  %3356 = vmatprep.subr.bf16.mxu0 (!%p1267_p10), %v3622_v10  ;;  %v3630_v18 = vld [vmem:[%s4406_s23 + $0x58] sm:$0xff] (!%p1267_p10)   ;;  %v3634_v22 = vld [vmem:[%s4406_s23 + $0x60] sm:$0xff] (!%p1267_p10)   ;;  %v3638_v26 = vld [vmem:[%s4406_s23 + $0x68] sm:$0xff] (!%p1267_p10)  }
  0xcb   : > { %3384 = vmatprep.subr.bf16.mxu1 %v3623_v11  ;;  %v3631_v19 = vld [vmem:[%s4406_s23 + $0xd8] sm:$0xff]   ;;  %v3635_v23 = vld [vmem:[%s4406_s23 + $0xe0] sm:$0xff]   ;;  %v3639_v27 = vld [vmem:[%s4406_s23 + $0xe8] sm:$0xff]   ;;  %s1316_s8 = scalar_select %p1315_p11, %s3778_s17, 1 }
  0xcc   : > { %v3632_v20 = vld [vmem:[%s4406_s23 + $0x18] sm:$0xff]   ;;  %v3636_v24 = vld [vmem:[%s4406_s23 + $0x20] sm:$0xff]   ;;  %v3640_v28 = vld [vmem:[%s4406_s23 + $0x28] sm:$0xff]   ;;  %s3351_s15 = sshll.u32 (%p3848_p6), %s3778_s17, 3 }
  0xcd   : > { %3357 = vmatpush3.bf16.msra.mxu0 %v3624_v12  ;;  %v3633_v21 = vld [vmem:[%s4406_s23 + $0x98] sm:$0xff]   ;;  %v3637_v25 = vld [vmem:[%s4406_s23 + $0xa0] sm:$0xff]   ;;  %v3641_v29 = vld [vmem:[%s4406_s23 + $0xa8] sm:$0xff]   ;;  %s1317_s11 = scalar_lea.vmem %s4657_s2, %s1316_s8  ;;  %s1320_s14 = scalar_lea.vmem %s4658_s3, %s1316_s8 }
  0xce   : > { %3385 = vmatpush3.bf16.msra.mxu1 %v3625_v13  ;;  %3358 = vmatprep.subr.bf16.mxu0 %v3626_v14  ;;  %v3642_v30 = vld [vmem:[%s4406_s23 + $0x70] sm:$0xff]   ;;  %v3646_v34 = vld [vmem:[%s4406_s23 + $0x78] sm:$0xff]   ;;  %v1358_v36 = vld [vmem:[%s4655_s0 + $0xc0] sm:$0xff]  ;;  %s3035_s26 = scalar_lea.vmem (%p3848_p6), %s4659_s4, %s3351_s15 }
  0xcf   : > { %3386 = vmatprep.subr.bf16.mxu1 %v3627_v15  ;;  %v3643_v31 = vld [vmem:[%s4406_s23 + $0xf0] sm:$0xff]   ;;  %v3647_v37 = vld [vmem:[%s4406_s23 + $0xf8] sm:$0xff]   ;;  %v1359_v39 = vld [vmem:[%s4655_s0 + $0xc8] sm:$0xff]  ;;  %v3207_v46 = vcombine.high %v1350_v35, %v1358_v36  ;;  %v3206_v54 = vcombine.low %v1350_v35, %v1358_v36 }
  0xd0   : > { %v3644_v32 = vld [vmem:[%s4406_s23 + $0x30] sm:$0xff]   ;;  %v3648_v40 = vld [vmem:[%s4406_s23 + $0x38] sm:$0xff]   ;;  %v3650_v44 = vld [vmem:[%s4406_s23 + $0x140] sm:$0xff]   ;;  %v3209_v48 = vcombine.high %v1351_v38, %v1359_v39  ;;  %v3208_v56 = vcombine.low %v1351_v38, %v1359_v39 }
  0xd1   : > { %3359 = vmatpush3.bf16.msra.mxu0 %v3628_v16  ;;  %v3645_v33 = vld [vmem:[%s4406_s23 + $0xb0] sm:$0xff]   ;;  %v3649_v41 = vld [vmem:[%s4406_s23 + $0xb8] sm:$0xff]   ;;  %v3651_v45 = vld [vmem:[%s4406_s23 + $0x1c0] sm:$0xff]  }
  0xd2   : > { %3387 = vmatpush3.bf16.msra.mxu1 %v3629_v17  ;;  %3360 = vmatprep.subr.bf16.mxu0 %v3630_v18  ;;  %v3652_v47 = vld [vmem:[%s4406_s23 + $0x100] sm:$0xff]   ;;  %v3654_v50 = vld [vmem:[%s4406_s23 + $0x148] sm:$0xff]   ;;  %v3658_v55 = vld [vmem:[%s4406_s23 + $0x150] sm:$0xff]  }
  0xd3   : > { %3388 = vmatprep.subr.bf16.mxu1 %v3631_v19  ;;  %v3653_v49 = vld [vmem:[%s4406_s23 + $0x180] sm:$0xff]   ;;  %v3655_v51 = vld [vmem:[%s4406_s23 + $0x1c8] sm:$0xff]   ;;  %v3659_v57 = vld [vmem:[%s4406_s23 + $0x1d0] sm:$0xff]  }
  0xd4   : > { %v3656_v52 = vld [vmem:[%s4406_s23 + $0x108] sm:$0xff]   ;;  %v3660_v58 = vld [vmem:[%s4406_s23 + $0x110] sm:$0xff]   ;;  %v3662_v60 = vld [vmem:[%s4406_s23 + $0x158] sm:$0xff]  }
  0xd5   : > { %3361 = vmatpush3.bf16.msra.mxu0 %v3632_v20  ;;  %v3657_v53 = vld [vmem:[%s4406_s23 + $0x188] sm:$0xff]   ;;  %v3661_v59 = vld [vmem:[%s4406_s23 + $0x190] sm:$0xff]   ;;  %v3663_v61 = vld [vmem:[%s4406_s23 + $0x1d8] sm:$0xff]  }
  0xd6   : > { %3389 = vmatpush3.bf16.msra.mxu1 %v3633_v21  ;;  %3362 = vmatprep.subr.bf16.mxu0 %v3634_v22  ;;  %v3664_v62 = vld [vmem:[%s4406_s23 + $0x118] sm:$0xff]   ;;  %v3666_v0 = vld [vmem:[%s4406_s23 + $0x160] sm:$0xff]   ;;  %v3670_v4 = vld [vmem:[%s4406_s23 + $0x168] sm:$0xff]  }
  0xd7   : > { %3390 = vmatprep.subr.bf16.mxu1 %v3635_v23  ;;  %v3665_v63 = vld [vmem:[%s4406_s23 + $0x198] sm:$0xff]   ;;  %v3667_v1 = vld [vmem:[%s4406_s23 + $0x1e0] sm:$0xff]   ;;  %v3671_v5 = vld [vmem:[%s4406_s23 + $0x1e8] sm:$0xff]  }
  0xd8   : > { %v3668_v2 = vld [vmem:[%s4406_s23 + $0x120] sm:$0xff]   ;;  %v3672_v6 = vld [vmem:[%s4406_s23 + $0x128] sm:$0xff]   ;;  %v3674_v8 = vld [vmem:[%s4406_s23 + $0x170] sm:$0xff]  }
  0xd9   : > { %3363 = vmatpush3.bf16.msra.mxu0 %v3636_v24  ;;  %v3669_v3 = vld [vmem:[%s4406_s23 + $0x1a0] sm:$0xff]   ;;  %v3673_v7 = vld [vmem:[%s4406_s23 + $0x1a8] sm:$0xff]   ;;  %v3675_v9 = vld [vmem:[%s4406_s23 + $0x1f0] sm:$0xff]  }
  0xda   : > { %3391 = vmatpush3.bf16.msra.mxu1 %v3637_v25  ;;  %3364 = vmatprep.subr.bf16.mxu0 %v3638_v26  ;;  %v3676_v10 = vld [vmem:[%s4406_s23 + $0x130] sm:$0xff]   ;;  %v3678_v12 = vld [vmem:[%s4406_s23 + $0x178] sm:$0xff]   ;;  %v3682_v24 = vld [vmem:[%s4406_s23 + $0x240] sm:$0xff]  }
  0xdb   : > { %3392 = vmatprep.subr.bf16.mxu1 %v3639_v27  ;;  %v3677_v11 = vld [vmem:[%s4406_s23 + $0x1b0] sm:$0xff]   ;;  %v3679_v14 = vld [vmem:[%s4406_s23 + $0x1f8] sm:$0xff]   ;;  %v3683_v25 = vld [vmem:[%s4406_s23 + $0x2c0] sm:$0xff]  }
  0xdc   : > { %v1336_v13 = vld [vmem:[%s4655_s0 + $0x10] sm:$0xff]  ;;  %v3680_v15 = vld [vmem:[%s4406_s23 + $0x138] sm:$0xff]   ;;  %v3684_v26 = vld [vmem:[%s4406_s23 + $0x200] sm:$0xff]  }
  0xdd   : > { %3365 = vmatpush3.bf16.msra.mxu0 %v3640_v28  ;;  %v3681_v16 = vld [vmem:[%s4406_s23 + $0x1b8] sm:$0xff]   ;;  %v1344_v17 = vld [vmem:[%s4655_s0 + $0x50] sm:$0xff]  ;;  %v3685_v27 = vld [vmem:[%s4406_s23 + $0x280] sm:$0xff]  }
  0xde   : > { %3393 = vmatpush3.bf16.msra.mxu1 %v3641_v29  ;;  %3366 = vmatprep.subr.bf16.mxu0 %v3642_v30  ;;  %v1337_v18 = vld [vmem:[%s4655_s0 + $0x18] sm:$0xff]  ;;  %v3194_v20 = vcombine.low %v1336_v13, %v1344_v17  ;;  %v3195_v21 = vcombine.high %v1336_v13, %v1344_v17  ;;  %v3686_v28 = vld [vmem:[%s4406_s23 + $0x248] sm:$0xff]   ;;  %v3690_v36 = vld [vmem:[%s4406_s23 + $0x250] sm:$0xff]  }
  0xdf   : > { %3394 = vmatprep.subr.bf16.mxu1 %v3643_v31  ;;  %v1345_v19 = vld [vmem:[%s4655_s0 + $0x58] sm:$0xff]  ;;  %v3687_v29 = vld [vmem:[%s4406_s23 + $0x2c8] sm:$0xff]   ;;  %v1362_v17 = vld [vmem:[%s4655_s0 + $0xe0] sm:$0xff] }
  0xe0   : > { %v3196_v22 = vcombine.low %v1337_v18, %v1345_v19  ;;  %v3197_v23 = vcombine.high %v1337_v18, %v1345_v19  ;;  %v3688_v30 = vld [vmem:[%s4406_s23 + $0x208] sm:$0xff]   ;;  %v1353_v38 = vld [vmem:[%s4655_s0 + $0x98] sm:$0xff] }
  0xe1   : > { %3367 = vmatpush3.bf16.msra.mxu0 %v3644_v32  ;;  %v3689_v31 = vld [vmem:[%s4406_s23 + $0x288] sm:$0xff]   ;;  %v1352_v32 = vld [vmem:[%s4655_s0 + $0x90] sm:$0xff]  ;;  %v1361_v39 = vld [vmem:[%s4655_s0 + $0xd8] sm:$0xff] }
  0xe2   : > { %3395 = vmatpush3.bf16.msra.mxu1 %v3645_v33  ;;  %3368 = vmatprep.subr.bf16.mxu0 %v3646_v34  ;;  %v1360_v33 = vld [vmem:[%s4655_s0 + $0xd0] sm:$0xff]  ;;  %v3719_v13 = vld [vmem:[%s4406_s23 + $0x3c8] sm:$0xff]  }
  0xe3   : > { %3396 = vmatprep.subr.bf16.mxu1 %v3647_v37  ;;  %v3211_v34 = vcombine.high %v1352_v32, %v1360_v33  ;;  %v3210_v35 = vcombine.low %v1352_v32, %v1360_v33  ;;  %v3691_v37 = vld [vmem:[%s4406_s23 + $0x2d0] sm:$0xff]   ;;  %v3730_v32 = vld [vmem:[%s4406_s23 + $0x360] sm:$0xff]  }
  0xe4   : > { %v3731_v33 = vld [vmem:[%s4406_s23 + $0x3e0] sm:$0xff]  }
  0xe5   : > { %3369 = vmatpush3.bf16.msra.mxu0 %v3648_v40  ;;  %v3213_v40 = vcombine.high %v1353_v38, %v1361_v39 }
  0xe6   : > { %3397 = vmatpush3.bf16.msra.mxu1 %v3649_v41  ;;  %3410 = vmatprep.subr.bf16.mxu0 %v3650_v44  ;;  %v3692_v41 = vld [vmem:[%s4406_s23 + $0x210] sm:$0xff]   ;;  %v3694_v44 = vld [vmem:[%s4406_s23 + $0x258] sm:$0xff]  }
  0xe7   : > { %3438 = vmatprep.subr.bf16.mxu1 %v3651_v45  ;;  %v3695_v45 = vld [vmem:[%s4406_s23 + $0x2d8] sm:$0xff]  }
  0xe8   : > { %2583 = vmatmul.mubr.bf16.vlgmr.msra.gmra.mrb[0].mxu0 %v3190_v42  ;;  %v3212_v42 = vcombine.low %v1353_v38, %v1361_v39  ;;  %v3736_v38 = vld [vmem:[%s4406_s23 + $0x328] sm:$0xff]  }
  0xe9   : > { %2632 = vmatmul.mubr.bf16.vlgmr.msra.gmra.mrb[0].mxu1 %v3192_v43  ;;  %3411 = vmatpush3.bf16.msra.mxu0 %v3652_v47  ;;  %v3693_v43 = vld [vmem:[%s4406_s23 + $0x290] sm:$0xff]   ;;  %v3697_v47 = vld [vmem:[%s4406_s23 + $0x298] sm:$0xff]   ;;  %v3737_v39 = vld [vmem:[%s4406_s23 + $0x3a8] sm:$0xff]  }
  0xea   : > { %3439 = vmatpush3.bf16.msra.mxu1 %v3653_v49  ;;  %2590 = vmatprep.mubr.bf16.mxu0 %v3207_v46  ;;  %v3696_v46 = vld [vmem:[%s4406_s23 + $0x218] sm:$0xff]   ;;  %v3699_v49 = vld [vmem:[%s4406_s23 + $0x2e0] sm:$0xff]  }
  0xeb   : > { %3412 = vmatprep.subr.bf16.mxu0 %v3654_v50  ;;  %2639 = vmatprep.mubr.bf16.mxu1 %v3209_v48  ;;  %v3698_v48 = vld [vmem:[%s4406_s23 + $0x260] sm:$0xff]  }
  0xec   : > { %3440 = vmatprep.subr.bf16.mxu1 %v3655_v51  ;;  %v3700_v50 = vld [vmem:[%s4406_s23 + $0x220] sm:$0xff]  }
  0xed   : > { %3413 = vmatpush3.bf16.msra.mxu0 %v3656_v52  ;;  %v3701_v51 = vld [vmem:[%s4406_s23 + $0x2a0] sm:$0xff]   ;;  %v3702_v52 = vld [vmem:[%s4406_s23 + $0x268] sm:$0xff]  }
  0xee   : > { %3441 = vmatpush3.bf16.msra.mxu1 %v3657_v53  ;;  %3414 = vmatprep.subr.bf16.mxu0 %v3658_v55  ;;  %v3703_v53 = vld [vmem:[%s4406_s23 + $0x2e8] sm:$0xff]  }
  0xef   : > { %3442 = vmatprep.subr.bf16.mxu1 %v3659_v57  ;;  %v3705_v55 = vld [vmem:[%s4406_s23 + $0x2a8] sm:$0xff]   ;;  %v3707_v57 = vld [vmem:[%s4406_s23 + $0x2f0] sm:$0xff]  }
  0xf0   : > { %2591 = vmatmul.mubr.bf16.gmra.mrb[4].mxu0 %v3206_v54  ;;  %v3704_v54 = vld [vmem:[%s4406_s23 + $0x228] sm:$0xff]  }
  0xf1   : > { %3415 = vmatpush3.bf16.msra.mxu0 %v3660_v58  ;;  %2640 = vmatmul.mubr.bf16.gmra.mrb[4].mxu1 %v3208_v56  ;;  %v3706_v56 = vld [vmem:[%s4406_s23 + $0x270] sm:$0xff]  }
  0xf2   : > { %3443 = vmatpush3.bf16.msra.mxu1 %v3661_v59  ;;  %3416 = vmatprep.subr.bf16.mxu0 %v3662_v60  ;;  %v3708_v58 = vld [vmem:[%s4406_s23 + $0x230] sm:$0xff]   ;;  %v3710_v60 = vld [vmem:[%s4406_s23 + $0x278] sm:$0xff]  }
  0xf3   : > { %3444 = vmatprep.subr.bf16.mxu1 %v3663_v61  ;;  %2680 = vmatprep.mubr.bf16.mxu0 %v3195_v21  ;;  %v3709_v59 = vld [vmem:[%s4406_s23 + $0x2b0] sm:$0xff]   ;;  %v3711_v61 = vld [vmem:[%s4406_s23 + $0x2f8] sm:$0xff]  }
  0xf4   : > { %2729 = vmatprep.mubr.bf16.mxu1 %v3197_v23  ;;  %v3723_v21 = vld [vmem:[%s4406_s23 + $0x3d0] sm:$0xff]   ;;  %v1363_v23 = vld [vmem:[%s4655_s0 + $0xe8] sm:$0xff] }
  0xf5   : > { %3417 = vmatpush3.bf16.msra.mxu0 %v3664_v62  ;;  %v3712_v62 = vld [vmem:[%s4406_s23 + $0x238] sm:$0xff]  }
  0xf6   : > { %3445 = vmatpush3.bf16.msra.mxu1 %v3665_v63  ;;  %3418 = vmatprep.subr.bf16.mxu0 %v3666_v0  ;;  %v3713_v63 = vld [vmem:[%s4406_s23 + $0x2b8] sm:$0xff]   ;;  %v1338_v0 = vld [vmem:[%s4655_s0 + $0x20] sm:$0xff] }
  0xf7   : > { %3446 = vmatprep.subr.bf16.mxu1 %v3667_v1  ;;  %v1346_v1 = vld [vmem:[%s4655_s0 + $0x60] sm:$0xff] }
  0xf9   : > { %3419 = vmatpush3.bf16.msra.mxu0 %v3668_v2  ;;  %v3198_v2 = vcombine.low %v1338_v0, %v1346_v1 }
  0xfa   : > { %3447 = vmatpush3.bf16.msra.mxu1 %v3669_v3  ;;  %3420 = vmatprep.subr.bf16.mxu0 %v3670_v4  ;;  %v3199_v3 = vcombine.high %v1338_v0, %v1346_v1  ;;  %v1339_v4 = vld [vmem:[%s4655_s0 + $0x28] sm:$0xff] }
  0xfb   : > { %3448 = vmatprep.subr.bf16.mxu1 %v3671_v5  ;;  %v1347_v5 = vld [vmem:[%s4655_s0 + $0x68] sm:$0xff] }
  0xfd   : > { %3421 = vmatpush3.bf16.msra.mxu0 %v3672_v6  ;;  %v3200_v6 = vcombine.low %v1339_v4, %v1347_v5 }
  0xfe   : > { %3449 = vmatpush3.bf16.msra.mxu1 %v3673_v7  ;;  %3422 = vmatprep.subr.bf16.mxu0 %v3674_v8  ;;  %v3201_v7 = vcombine.high %v1339_v4, %v1347_v5  ;;  %v3714_v8 = vld [vmem:[%s4406_s23 + $0x340] sm:$0xff]  }
  0xff   : > { %3450 = vmatprep.subr.bf16.mxu1 %v3675_v9  ;;  %v3715_v9 = vld [vmem:[%s4406_s23 + $0x3c0] sm:$0xff]  }
 0x101   : > { %3423 = vmatpush3.bf16.msra.mxu0 %v3676_v10  ;;  %v3716_v10 = vld [vmem:[%s4406_s23 + $0x300] sm:$0xff]  }
 0x102   : > { %3451 = vmatpush3.bf16.msra.mxu1 %v3677_v11  ;;  %3424 = vmatprep.subr.bf16.mxu0 %v3678_v12  ;;  %v3717_v11 = vld [vmem:[%s4406_s23 + $0x380] sm:$0xff]   ;;  %v3718_v12 = vld [vmem:[%s4406_s23 + $0x348] sm:$0xff]  }
 0x103   : > { %3452 = vmatprep.subr.bf16.mxu1 %v3679_v14  ;;  %v3720_v14 = vld [vmem:[%s4406_s23 + $0x308] sm:$0xff]  }
 0x105   : > { %3425 = vmatpush3.bf16.msra.mxu0 %v3680_v15  ;;  %v3721_v15 = vld [vmem:[%s4406_s23 + $0x388] sm:$0xff]  }
 0x106   : > { %3453 = vmatpush3.bf16.msra.mxu1 %v3681_v16  ;;  %3466 = vmatprep.subr.bf16.mxu0 %v3682_v24  ;;  %v1354_v16 = vld [vmem:[%s4655_s0 + $0xa0] sm:$0xff] }
 0x107   : > { %3494 = vmatprep.subr.bf16.mxu1 %v3683_v25  ;;  %v3215_v18 = vcombine.high %v1354_v16, %v1362_v17  ;;  %v3214_v19 = vcombine.low %v1354_v16, %v1362_v17  ;;  %v3724_v25 = vld [vmem:[%s4406_s23 + $0x310] sm:$0xff]  }
 0x108   : > { %2681 = vmatmul.mubr.bf16.vlgmr.msra.gmra.mrb[8].mxu0 %v3194_v20  ;;  %v3722_v20 = vld [vmem:[%s4406_s23 + $0x350] sm:$0xff]  }
 0x109   : > { %2730 = vmatmul.mubr.bf16.vlgmr.msra.gmra.mrb[8].mxu1 %v3196_v22  ;;  %3467 = vmatpush3.bf16.msra.mxu0 %v3684_v26  ;;  %v1355_v22 = vld [vmem:[%s4655_s0 + $0xa8] sm:$0xff] }
 0x10a   : > { %3495 = vmatpush3.bf16.msra.mxu1 %v3685_v27  ;;  %3468 = vmatprep.subr.bf16.mxu0 %v3686_v28  ;;  %v3217_v24 = vcombine.high %v1355_v22, %v1363_v23  ;;  %v3216_v26 = vcombine.low %v1355_v22, %v1363_v23  ;;  %v3725_v27 = vld [vmem:[%s4406_s23 + $0x390] sm:$0xff]   ;;  %v3726_v28 = vld [vmem:[%s4406_s23 + $0x358] sm:$0xff]  }
 0x10b   : > { %3496 = vmatprep.subr.bf16.mxu1 %v3687_v29  ;;  %2688 = vmatprep.mubr.bf16.mxu0 %v3211_v34  ;;  %v3727_v29 = vld [vmem:[%s4406_s23 + $0x3d8] sm:$0xff]   ;;  %v3732_v34 = vld [vmem:[%s4406_s23 + $0x320] sm:$0xff]  }
 0x10c   : > { %2737 = vmatprep.mubr.bf16.mxu1 %v3213_v40  ;;  %v3738_v40 = vld [vmem:[%s4406_s23 + $0x370] sm:$0xff]  }
 0x10d   : > { %3469 = vmatpush3.bf16.msra.mxu0 %v3688_v30  ;;  %v3728_v30 = vld [vmem:[%s4406_s23 + $0x318] sm:$0xff]  }
 0x10e   : > { %3497 = vmatpush3.bf16.msra.mxu1 %v3689_v31  ;;  %3470 = vmatprep.subr.bf16.mxu0 %v3690_v36  ;;  %v3729_v31 = vld [vmem:[%s4406_s23 + $0x398] sm:$0xff]   ;;  %v3734_v36 = vld [vmem:[%s4406_s23 + $0x368] sm:$0xff]  }
 0x10f   : > { %3498 = vmatprep.subr.bf16.mxu1 %v3691_v37  ;;  %v3735_v37 = vld [vmem:[%s4406_s23 + $0x3e8] sm:$0xff]  }
 0x110   : > { %2689 = vmatmul.mubr.bf16.gmra.mrb[12].mxu0 %v3210_v35  ;;  %v3733_v35 = vld [vmem:[%s4406_s23 + $0x3a0] sm:$0xff]  }
 0x111   : > { %3471 = vmatpush3.bf16.msra.mxu0 %v3692_v41  ;;  %2738 = vmatmul.mubr.bf16.gmra.mrb[12].mxu1 %v3212_v42  ;;  %v3739_v41 = vld [vmem:[%s4406_s23 + $0x3f0] sm:$0xff]  }
 0x112   : > { %3499 = vmatpush3.bf16.msra.mxu1 %v3693_v43  ;;  %3472 = vmatprep.subr.bf16.mxu0 %v3694_v44  ;;  %v3740_v42 = vld [vmem:[%s4406_s23 + $0x330] sm:$0xff]   ;;  %v3742_v44 = vld [vmem:[%s4406_s23 + $0x378] sm:$0xff]  }
 0x113   : > { %3500 = vmatprep.subr.bf16.mxu1 %v3695_v45  ;;  %2778 = vmatprep.mubr.bf16.mxu0 %v3199_v3  ;;  %v3741_v43 = vld [vmem:[%s4406_s23 + $0x3b0] sm:$0xff]   ;;  %v3743_v45 = vld [vmem:[%s4406_s23 + $0x3f8] sm:$0xff]  }
 0x114   : > { %2827 = vmatprep.mubr.bf16.mxu1 %v3201_v7 }
 0x115   : > { %3473 = vmatpush3.bf16.msra.mxu0 %v3696_v46  ;;  %v3744_v46 = vld [vmem:[%s4406_s23 + $0x338] sm:$0xff]  }
 0x116   : > { %3501 = vmatpush3.bf16.msra.mxu1 %v3697_v47  ;;  %3474 = vmatprep.subr.bf16.mxu0 %v3698_v48  ;;  %v3745_v47 = vld [vmem:[%s4406_s23 + $0x3b8] sm:$0xff]   ;;  %v1340_v48 = vld [vmem:[%s4655_s0 + $0x30] sm:$0xff] }
 0x117   : > { %3502 = vmatprep.subr.bf16.mxu1 %v3699_v49  ;;  %v1348_v49 = vld [vmem:[%s4655_s0 + $0x70] sm:$0xff] }
 0x119   : > { %3475 = vmatpush3.bf16.msra.mxu0 %v3700_v50  ;;  %v1341_v50 = vld [vmem:[%s4655_s0 + $0x38] sm:$0xff] }
 0x11a   : > { %3503 = vmatpush3.bf16.msra.mxu1 %v3701_v51  ;;  %3476 = vmatprep.subr.bf16.mxu0 %v3702_v52  ;;  %v3202_v51 = vcombine.low %v1340_v48, %v1348_v49  ;;  %v3203_v52 = vcombine.high %v1340_v48, %v1348_v49 }
 0x11b   : > { %3504 = vmatprep.subr.bf16.mxu1 %v3703_v53  ;;  %v1349_v53 = vld [vmem:[%s4655_s0 + $0x78] sm:$0xff] }
 0x11d   : > { %3477 = vmatpush3.bf16.msra.mxu0 %v3704_v54  ;;  %v1356_v54 = vld [vmem:[%s4655_s0 + $0xb0] sm:$0xff] }
 0x11e   : > { %3505 = vmatpush3.bf16.msra.mxu1 %v3705_v55  ;;  %3478 = vmatprep.subr.bf16.mxu0 %v3706_v56  ;;  %v1364_v55 = vld [vmem:[%s4655_s0 + $0xf0] sm:$0xff]  ;;  %v3204_v56 = vcombine.low %v1341_v50, %v1349_v53 }
 0x11f   : > { %3506 = vmatprep.subr.bf16.mxu1 %v3707_v57  ;;  %v3205_v57 = vcombine.high %v1341_v50, %v1349_v53 }
 0x121   : > { %3479 = vmatpush3.bf16.msra.mxu0 %v3708_v58  ;;  %v3219_v58 = vcombine.high %v1356_v54, %v1364_v55 }
 0x122   : > { %3507 = vmatpush3.bf16.msra.mxu1 %v3709_v59  ;;  %3480 = vmatprep.subr.bf16.mxu0 %v3710_v60  ;;  %v1357_v59 = vld [vmem:[%s4655_s0 + $0xb8] sm:$0xff] }
 0x123   : > { %3508 = vmatprep.subr.bf16.mxu1 %v3711_v61  ;;  %v1365_v60 = vld [vmem:[%s4655_s0 + $0xf8] sm:$0xff] }
 0x124   : > { %v3221_v61 = vcombine.high %v1357_v59, %v1365_v60 }
 0x125   : > { %3481 = vmatpush3.bf16.msra.mxu0 %v3712_v62  ;;  %v3218_v62 = vcombine.low %v1356_v54, %v1364_v55 }
 0x126   : > { %3509 = vmatpush3.bf16.msra.mxu1 %v3713_v63  ;;  %3522 = vmatprep.subr.bf16.mxu0 %v3714_v8  ;;  %v3220_v63 = vcombine.low %v1357_v59, %v1365_v60 }
 0x127   : > { %3550 = vmatprep.subr.bf16.mxu1 %v3715_v9 }
 0x128   : > { %2779 = vmatmul.mubr.bf16.vlgmr.msra.gmra.mrb[16].mxu0 %v3198_v2 }
 0x129   : > { %2828 = vmatmul.mubr.bf16.vlgmr.msra.gmra.mrb[16].mxu1 %v3200_v6  ;;  %3523 = vmatpush3.bf16.msra.mxu0 %v3716_v10 }
 0x12a   : > { %3551 = vmatpush3.bf16.msra.mxu1 %v3717_v11  ;;  %3524 = vmatprep.subr.bf16.mxu0 %v3718_v12 }
 0x12b   : > { %3552 = vmatprep.subr.bf16.mxu1 %v3719_v13  ;;  %2786 = vmatprep.mubr.bf16.mxu0 %v3215_v18 }
 0x12c   : > { %2835 = vmatprep.mubr.bf16.mxu1 %v3217_v24 }
 0x12d   : > { %3525 = vmatpush3.bf16.msra.mxu0 %v3720_v14 }
 0x12e   : > { %3553 = vmatpush3.bf16.msra.mxu1 %v3721_v15  ;;  %3526 = vmatprep.subr.bf16.mxu0 %v3722_v20 }
 0x12f   : > { %3554 = vmatprep.subr.bf16.mxu1 %v3723_v21 }
 0x130   : > { %2787 = vmatmul.mubr.bf16.gmra.mrb[20].mxu0 %v3214_v19 }
 0x131   : > { %3527 = vmatpush3.bf16.msra.mxu0 %v3724_v25  ;;  %2836 = vmatmul.mubr.bf16.gmra.mrb[20].mxu1 %v3216_v26 }
 0x132   : > { %3555 = vmatpush3.bf16.msra.mxu1 %v3725_v27  ;;  %3528 = vmatprep.subr.bf16.mxu0 %v3726_v28 }
 0x133   : > { %3556 = vmatprep.subr.bf16.mxu1 %v3727_v29  ;;  %2876 = vmatprep.mubr.bf16.mxu0 %v3203_v52 }
 0x134   : > { %2925 = vmatprep.mubr.bf16.mxu1 %v3205_v57 }
 0x135   : > { %3529 = vmatpush3.bf16.msra.mxu0 %v3728_v30 }
 0x136   : > { %3557 = vmatpush3.bf16.msra.mxu1 %v3729_v31  ;;  %3530 = vmatprep.subr.bf16.mxu0 %v3730_v32 }
 0x137   : > { %3558 = vmatprep.subr.bf16.mxu1 %v3731_v33 }
 0x139   : > { %3531 = vmatpush3.bf16.msra.mxu0 %v3732_v34 }
 0x13a   : > { %3559 = vmatpush3.bf16.msra.mxu1 %v3733_v35  ;;  %3532 = vmatprep.subr.bf16.mxu0 %v3734_v36 }
 0x13b   : > { %3560 = vmatprep.subr.bf16.mxu1 %v3735_v37 }
 0x13d   : > { %3533 = vmatpush3.bf16.msra.mxu0 %v3736_v38 }
 0x13e   : > { %3561 = vmatpush3.bf16.msra.mxu1 %v3737_v39  ;;  %3534 = vmatprep.subr.bf16.mxu0 %v3738_v40 }
 0x13f   : > { %3562 = vmatprep.subr.bf16.mxu1 %v3739_v41 }
 0x141   : > { %3535 = vmatpush3.bf16.msra.mxu0 %v3740_v42 }
 0x142   : > { %3563 = vmatpush3.bf16.msra.mxu1 %v3741_v43  ;;  %3536 = vmatprep.subr.bf16.mxu0 %v3742_v44 }
 0x143   : > { %3564 = vmatprep.subr.bf16.mxu1 %v3743_v45 }
 0x145   : > { %3537 = vmatpush3.bf16.msra.mxu0 %v3744_v46 }
 0x146   : > { %3565 = vmatpush3.bf16.msra.mxu1 %v3745_v47 }
 0x148   : > { %2877 = vmatmul.mubr.bf16.vlgmr.msra.gmra.mrb[24].mxu0 %v3202_v51 }
 0x149   : > { %2926 = vmatmul.mubr.bf16.vlgmr.msra.gmra.mrb[24].mxu1 %v3204_v56  ;;  %2884 = vmatprep.mubr.bf16.mxu0 %v3219_v58 }
 0x14a   : > { %2933 = vmatprep.mubr.bf16.mxu1 %v3221_v61 }
 0x150   : > { %2885 = vmatmul.mubr.bf16.gmra.mrb[28].mxu0 %v3218_v62 }
 0x151   : > { %2934 = vmatmul.mubr.bf16.gmra.mrb[28].mxu1 %v3220_v63 }
 0x1bb   : > { %v3370_v0 = vpop.f32.mrb[0].mxu0 }
 0x1bc   : > { %v3398_v1 = vpop.f32.mrb[0].mxu1  ;;  %v3371_v2 = vpop.f32.mrb[1].mxu0 }
 0x1bd   : > { %v3372_v3 = vadd.f32 %v3371_v2, %v3370_v0  ;;  %v3399_v4 = vpop.f32.mrb[1].mxu1  ;;  %v3373_v5 = vpop.f32.mrb[2].mxu0 }
 0x1be   : > { %v3400_v6 = vadd.f32 %v3399_v4, %v3398_v1  ;;  %v3401_v7 = vpop.f32.mrb[2].mxu1  ;;  %v3374_v8 = vpop.f32.mrb[3].mxu0 }
 0x1bf   : > { %v3375_v9 = vadd.f32 %v3374_v8, %v3373_v5  ;;  %v3402_v10 = vpop.f32.mrb[3].mxu1 }
 0x1c0   : > { %v2634_v11 = vadd.f32 %v3400_v6, %v3372_v3  ;;  %v3403_v12 = vadd.f32 %v3402_v10, %v3401_v7 }
 0x1c2   : > { %v2637_v13 = vadd.f32 %v3403_v12, %v3375_v9 }
 0x1c3   : > { %v3376_v14 = vpop.f32.mrb[4].mxu0 }
 0x1c4   : > { %v3404_v15 = vpop.f32.mrb[4].mxu1  ;;  %v3377_v16 = vpop.f32.mrb[5].mxu0 }
 0x1c5   : > { %v3378_v17 = vadd.f32 %v3377_v16, %v3376_v14  ;;  %v3405_v18 = vpop.f32.mrb[5].mxu1  ;;  %v3379_v19 = vpop.f32.mrb[6].mxu0 }
 0x1c6   : > { %v3406_v20 = vadd.f32 %v3405_v18, %v3404_v15  ;;  %v3407_v21 = vpop.f32.mrb[6].mxu1  ;;  %v3380_v22 = vpop.f32.mrb[7].mxu0 }
 0x1c7   : > { %v3381_v23 = vadd.f32 %v3380_v22, %v3379_v19  ;;  %v3408_v24 = vpop.f32.mrb[7].mxu1 }
 0x1c8   : > { %v2642_v25 = vadd.f32 %v3406_v20, %v3378_v17  ;;  %v3409_v26 = vadd.f32 %v3408_v24, %v3407_v21 }
 0x1ca   : > { %v2645_v27 = vadd.f32 %v3409_v26, %v3381_v23 }
 0x1db   : > { %v3426_v28 = vpop.f32.mrb[8].mxu0 }
 0x1dc   : > { %v3454_v29 = vpop.f32.mrb[8].mxu1  ;;  %v3427_v30 = vpop.f32.mrb[9].mxu0 }
 0x1dd   : > { %v3455_v31 = vpop.f32.mrb[9].mxu1  ;;  %v3428_v32 = vadd.f32 %v3427_v30, %v3426_v28  ;;  %v3429_v34 = vpop.f32.mrb[10].mxu0 }
 0x1de   : > { %v3456_v33 = vadd.f32 %v3455_v31, %v3454_v29  ;;  %v3457_v35 = vpop.f32.mrb[10].mxu1  ;;  %v3430_v36 = vpop.f32.mrb[11].mxu0 }
 0x1df   : > { %v3458_v37 = vpop.f32.mrb[11].mxu1  ;;  %v2683_v38 = vadd.f32 %v3428_v32, %v2634_v11  ;;  %v3431_v39 = vadd.f32 %v3430_v36, %v3429_v34 }
 0x1e0   : > { %v3459_v40 = vadd.f32 %v3458_v37, %v3457_v35 }
 0x1e1   : > { %v2732_v41 = vadd.f32 %v3456_v33, %v2683_v38  ;;  %v2686_v42 = vadd.f32 %v3431_v39, %v2637_v13 }
 0x1e3   : > { %v2735_v43 = vadd.f32 %v3459_v40, %v2686_v42  ;;  %v3432_v44 = vpop.f32.mrb[12].mxu0 }
 0x1e4   : > { %v3433_v45 = vpop.f32.mrb[13].mxu0  ;;  %v3460_v50 = vpop.f32.mrb[12].mxu1 }
 0x1e5   : > { %v3434_v46 = vadd.f32 %v3433_v45, %v3432_v44  ;;  %v3435_v47 = vpop.f32.mrb[14].mxu0  ;;  %v3461_v52 = vpop.f32.mrb[13].mxu1 }
 0x1e6   : > { %v3436_v48 = vpop.f32.mrb[15].mxu0  ;;  %v3462_v54 = vadd.f32 %v3461_v52, %v3460_v50  ;;  %v3463_v55 = vpop.f32.mrb[14].mxu1 }
 0x1e7   : > { %v2691_v49 = vadd.f32 %v3434_v46, %v2642_v25  ;;  %v3437_v51 = vadd.f32 %v3436_v48, %v3435_v47  ;;  %v3464_v56 = vpop.f32.mrb[15].mxu1 }
 0x1e8   : > { %v3465_v58 = vadd.f32 %v3464_v56, %v3463_v55 }
 0x1e9   : > { %v2694_v53 = vadd.f32 %v3437_v51, %v2645_v27  ;;  %v2740_v57 = vadd.f32 %v3462_v54, %v2691_v49 }
 0x1eb   : > { %v2743_v59 = vadd.f32 %v3465_v58, %v2694_v53 }
 0x1fb   : > { %v3482_v60 = vpop.f32.mrb[16].mxu0 }
 0x1fc   : > { %v3510_v61 = vpop.f32.mrb[16].mxu1  ;;  %v3483_v62 = vpop.f32.mrb[17].mxu0 }
 0x1fd   : > { %v3484_v63 = vadd.f32 %v3483_v62, %v3482_v60  ;;  %v3511_v0 = vpop.f32.mrb[17].mxu1  ;;  %v3485_v1 = vpop.f32.mrb[18].mxu0 }
 0x1fe   : > { %v3512_v2 = vadd.f32 %v3511_v0, %v3510_v61  ;;  %v3513_v3 = vpop.f32.mrb[18].mxu1  ;;  %v3486_v4 = vpop.f32.mrb[19].mxu0 }
 0x1ff   : > { %v2781_v5 = vadd.f32 %v3484_v63, %v2732_v41  ;;  %v3487_v6 = vadd.f32 %v3486_v4, %v3485_v1  ;;  %v3514_v7 = vpop.f32.mrb[19].mxu1 }
 0x200   : > { %v3515_v8 = vadd.f32 %v3514_v7, %v3513_v3 }
 0x201   : > { %v2830_v9 = vadd.f32 %v3512_v2, %v2781_v5  ;;  %v2784_v10 = vadd.f32 %v3487_v6, %v2735_v43 }
 0x203   : > { %v2833_v11 = vadd.f32 %v3515_v8, %v2784_v10  ;;  %v3488_v12 = vpop.f32.mrb[20].mxu0 }
 0x204   : > { %v3489_v13 = vpop.f32.mrb[21].mxu0  ;;  %v3516_v16 = vpop.f32.mrb[20].mxu1 }
 0x205   : > { %v3490_v14 = vadd.f32 %v3489_v13, %v3488_v12  ;;  %v3491_v15 = vpop.f32.mrb[22].mxu0  ;;  %v3517_v20 = vpop.f32.mrb[21].mxu1 }
 0x206   : > { %v3492_v17 = vpop.f32.mrb[23].mxu0  ;;  %v3518_v21 = vadd.f32 %v3517_v20, %v3516_v16  ;;  %v3519_v22 = vpop.f32.mrb[22].mxu1 }
 0x207   : > { %v2789_v18 = vadd.f32 %v3490_v14, %v2740_v57  ;;  %v3493_v19 = vadd.f32 %v3492_v17, %v3491_v15  ;;  %v3520_v24 = vpop.f32.mrb[23].mxu1 }
 0x208   : > { %v3521_v26 = vadd.f32 %v3520_v24, %v3519_v22  ;;  %v2992_v24 = vlaneseq }
 0x209   : > { %v2792_v23 = vadd.f32 %v3493_v19, %v2743_v59  ;;  %v2838_v25 = vadd.f32 %v3518_v21, %v2789_v18 }
 0x20b   : > { %v2841_v27 = vadd.f32 %v3521_v26, %v2792_v23  ;;  %v2984_v26 = vld [vmem:[%s1317_s11] sm:$0x1] }
 0x21b   : > { %v3538_v28 = vpop.f32.mrb[24].mxu0 }
 0x21c   : > { %v3566_v29 = vpop.f32.mrb[24].mxu1  ;;  %v3539_v30 = vpop.f32.mrb[25].mxu0 }
 0x21d   : > { %v3540_v31 = vadd.f32 %v3539_v30, %v3538_v28  ;;  %v3567_v32 = vpop.f32.mrb[25].mxu1  ;;  %v3541_v33 = vpop.f32.mrb[26].mxu0  ;;  %v2988_v30 = vld [vmem:[%s1320_s14] sm:$0x1] }
 0x21e   : > { %v3568_v34 = vadd.f32 %v3567_v32, %v3566_v29  ;;  %v3569_v35 = vpop.f32.mrb[26].mxu1  ;;  %v3542_v36 = vpop.f32.mrb[27].mxu0 }
 0x21f   : > { %v2879_v37 = vadd.f32 %v3540_v31, %v2830_v9  ;;  %v3543_v38 = vadd.f32 %v3542_v36, %v3541_v33  ;;  %v3570_v39 = vpop.f32.mrb[27].mxu1 }
 0x220   : > { %v3571_v40 = vadd.f32 %v3570_v39, %v3569_v35 }
 0x221   : > { %v2928_v41 = vadd.f32 %v3568_v34, %v2879_v37  ;;  %v2882_v42 = vadd.f32 %v3543_v38, %v2833_v11 }
 0x223   : > { %v2931_v43 = vadd.f32 %v3571_v40, %v2882_v42  ;;  %v3544_v44 = vpop.f32.mrb[28].mxu0  ;;  %v2967_v47 = vmul.f32 %v2928_v41, %v2928_v41 }
 0x224   : > { %v3572_v45 = vpop.f32.mrb[28].mxu1  ;;  %v3545_v46 = vpop.f32.mrb[29].mxu0 }
 0x225   : > { %v2957_v48 = vadd.f32 %v2931_v43, %v2928_v41  ;;  %v2968_v49 = vmul.f32 %v2931_v43, %v2931_v43  ;;  %v3546_v50 = vadd.f32 %v3545_v46, %v3544_v44  ;;  %v3573_v51 = vpop.f32.mrb[29].mxu1  ;;  %v3547_v52 = vpop.f32.mrb[30].mxu0 }
 0x226   : > { %v3574_v53 = vadd.f32 %v3573_v51, %v3572_v45  ;;  %v3575_v54 = vpop.f32.mrb[30].mxu1  ;;  %v3548_v55 = vpop.f32.mrb[31].mxu0 }
 0x227   : > { %v2971_v56 = vadd.f32 %v2968_v49, %v2967_v47  ;;  %v2887_v57 = vadd.f32 %v3546_v50, %v2838_v25  ;;  %v3549_v58 = vadd.f32 %v3548_v55, %v3547_v52  ;;  %v3576_v59 = vpop.f32.mrb[31].mxu1  ;;  %v2993_v25 = vshrl.u32 %v2992_v24, 7 }
 0x228   : > { %v3577_v60 = vadd.f32 %v3576_v59, %v3575_v54 }
 0x229   : > { %v2936_v61 = vadd.f32 %v3574_v53, %v2887_v57  ;;  %v2890_v62 = vadd.f32 %v3549_v58, %v2841_v27  ;;  %v2994_v27 = vsub.s32 0, %v2993_v25 }
 0x22b   : > { %v2958_v63 = vadd.f32 %v2957_v48, %v2936_v61  ;;  %v2969_v0 = vmul.f32 %v2936_v61, %v2936_v61  ;;  %v2939_v1 = vadd.f32 %v3577_v60, %v2890_v62 }
 0x22d   : > { %v2972_v2 = vadd.f32 %v2971_v56, %v2969_v0  ;;  %v2959_v3 = vadd.f32 %v2958_v63, %v2939_v1  ;;  %v2970_v4 = vmul.f32 %v2939_v1, %v2939_v1 }
 0x22f   : > { %v2960_v5 = vrot.slane %v2959_v3, 4  ;;  %v2973_v6 = vadd.f32 %v2972_v2, %v2970_v4 }
 0x231   : > { %v2961_v7 = vadd.f32 %v2960_v5, %v2959_v3  ;;  %v2974_v8 = vrot.slane %v2973_v6, 4 }
 0x233   : > { %v2962_v9 = vrot.slane %v2961_v7, 2  ;;  %v2975_v10 = vadd.f32 %v2974_v8, %v2973_v6 }
 0x235   : > { %v2963_v11 = vadd.f32 %v2962_v9, %v2961_v7  ;;  %v2976_v12 = vrot.slane %v2975_v10, 2 }
 0x237   : > { %v2964_v13 = vrot.slane %v2963_v11, 1  ;;  %v2977_v14 = vadd.f32 %v2976_v12, %v2975_v10 }
 0x239   : > { %v2965_v15 = vadd.f32 %v2964_v13, %v2963_v11  ;;  %v2978_v16 = vrot.slane %v2977_v14, 1 }
 0x23b   : > { %v2966_v17 = vmul.f32 0.03125, %v2965_v15  ;;  %v2979_v18 = vadd.f32 %v2978_v16, %v2977_v14 }
 0x23d   : > { %v2980_v19 = vmul.f32 0.03125, %v2979_v18  ;;  %v2981_v20 = vmul.f32 %v2966_v17, %v2966_v17 }
 0x23f   : > { %v2982_v21 = vsub.f32 %v2980_v19, %v2981_v20 }
 0x241   : > { %v2983_v22 = vmax.f32 %v2982_v21, 0.0 }
 0x243   : > { %v2985_v23 = vadd.f32 1e-05, %v2983_v22 }
 0x245   : > { %3746 = vrsqrt.f32 %v2985_v23 }
 0x24f   : > { %v3747_v28 = vpop.eup %3746 }
 0x250   : > { %v2987_v29 = vmul.f32 %v3747_v28, %v2984_v26 }
 0x252   : > { %v2989_v31 = vmul.f32 %v2987_v29, %v2966_v17  ;;  %v2995_v32 = vrot.slane %v2987_v29, %v2994_v27 }
 0x254   : > { %v2990_v33 = vsub.f32 %v2988_v30, %v2989_v31  ;;  %v2997_v34 = vmul.f32 %v2995_v32, %v2928_v41  ;;  %v2998_v35 = vmul.f32 %v2995_v32, %v2931_v43  ;;  %v2999_v36 = vmul.f32 %v2995_v32, %v2936_v61 }
 0x255   : > { %v3000_v37 = vmul.f32 %v2995_v32, %v2939_v1 }
 0x256   : > { %v3005_v38 = vrot.slane %v2990_v33, %v2994_v27 }
 0x258   : > { %v3007_v39 = vadd.f32 %v3005_v38, %v2997_v34  ;;  %v3008_v40 = vadd.f32 %v3005_v38, %v2998_v35  ;;  %v3009_v42 = vadd.f32 %v3005_v38, %v2999_v36  ;;  %v3010_v44 = vadd.f32 %v3005_v38, %v3000_v37 }
 0x259   : > { %3033 = sbr.rel (!%p3848_p6) target bundleno = 616 (0x268), region = 89 }
 0x25a   : > { %vm3011_vm0 = vcmp.ge.f32.partialorder %v3007_v39, 0.0  ;;  %vm3012_vm1 = vcmp.ge.f32.partialorder %v3008_v40, 0.0  ;;  %vm3013_vm2 = vcmp.ge.f32.partialorder %v3009_v42, 0.0  ;;  %vm3014_vm3 = vcmp.ge.f32.partialorder %v3010_v44, 0.0 }
 0x25b   : > { %v3015_v45 = vmul.f32 0.2, %v3007_v39  ;;  %v3016_v46 = vmul.f32 0.2, %v3008_v40  ;;  %v3017_v47 = vmul.f32 0.2, %v3009_v42 }
 0x25c   : > { %v3018_v48 = vmul.f32 0.2, %v3010_v44 }
 0x25d   : > { %v3019_v49 = vsel %vm3011_vm0, %v3007_v39, %v3015_v45  ;;  %v3020_v41 = vsel %vm3012_vm1, %v3008_v40, %v3016_v46  ;;  %v3021_v43 = vsel %vm3013_vm2, %v3009_v42, %v3017_v47 }
 0x25e   : > { %v3022_v50 = vsel %vm3014_vm3, %v3010_v44, %v3018_v48  ;;  %3023 = vst [vmem:[%s1307_s22] sm:$0xff] %v3019_v49  ;;  %3024 = vst [vmem:[%s1307_s22 + $0x8] sm:$0xff] %v3020_v41 }
 0x25f   : > { %3025 = vst [vmem:[%s1307_s22 + $0x10] sm:$0xff] %v3021_v43  ;;  %3026 = vst [vmem:[%s1307_s22 + $0x18] sm:$0xff] %v3022_v50 }
 0x265   : > { %v3069_v51 = vld [vmem:[%s1307_s22] sm:$0xff]  ;;  %v3071_v52 = vld [vmem:[%s1307_s22 + $0x8] sm:$0xff] }
 0x266   : > { %v3073_v53 = vld [vmem:[%s1307_s22 + $0x10] sm:$0xff]  ;;  %v3075_v54 = vld [vmem:[%s1307_s22 + $0x18] sm:$0xff]  ;;  %3070 = vst [vmem:[%s3035_s26] sm:$0xff] %v3069_v51  ;;  %3072 = vst [vmem:[%s3035_s26 + $0x10] sm:$0xff] %v3071_v52 }
 0x267   : > { %3074 = vst [vmem:[%s3035_s26 + $0x20] sm:$0xff] %v3073_v53  ;;  %3076 = vst [vmem:[%s3035_s26 + $0x30] sm:$0xff] %v3075_v54 }
 0x268 PF: > { %s14_s19 = sadd.s32 1, %s3786_s19   ;;  %s4661_s15 = smov %s3774_s16 }
 0x269   : > { %p11_p12 = scmp.ge.s32.totalorder %s14_s19, 4   ;;  %s4662_s16 = smov %s3853_s25 }
 0x26a   : > { %s4663_s17 = smov %s3782_s18  ;;  %s4664_s18 = smov %s4666_s20 }
 0x26b   :  { %13 = sbr.rel (!%p11_p12) target bundleno = 3 (0x3), region = 167 }

// kernel: discriminator32_forward.7
= control target key start
LH: loop header
LB: loop body
LE: loop exit
PB: predicated region body
PF: predicated region fallthrough
CT: control target
= control target key end

     0   :  { %v31_v0 = vlaneseq  ;;  %v563_v2 = vmov 1983009808   ;;  %vm487_vm0 = vcmask 1041408   ;;  %vm556_vm1 = vcmask 1024   ;;  %s740_s1 = inlined_call_operand.vmem [shape: f32[1,4096], index: 1, kind: input, shape index: {}]   ;;  %s741_s0 = inlined_call_operand.vmem [shape: f32[2,4096], index: 0, kind: input, shape index: {}]   ;;  %s742_s2 = inlined_call_operand.<no memory space> [shape: f32[1], index: 2, kind: input, shape index: {}]   ;;  %s743_s3 = inlined_call_operand.vmem [shape: f32[2,1], index: 3, kind: output, shape index: {}]  }
   0x1   :  { %v162_v3 = vunpack.c.l.s4 %v563_v2  ;;  %v23_v5 = vld [vmem:[%s740_s1] sm:$0xff]  ;;  %v24_v27 = vld [vmem:[%s740_s1 + $0x8] sm:$0xff]  ;;  %v25_v53 = vld [vmem:[%s740_s1 + $0x10] sm:$0xff] }
   0x2   :  { %v32_v1 = vshrl.u32 %v31_v0, 7  ;;  %v15_v31 = vld [vmem:[%s741_s0] sm:$0xff]  ;;  %v16_v43 = vld [vmem:[%s741_s0 + $0x8] sm:$0xff]  ;;  %v17_v61 = vld [vmem:[%s741_s0 + $0x10] sm:$0xff] }
   0x3   :  { %v163_v9 = vunpack.c.0.s8 %v162_v3 }
   0x4   :  { %v584_v4 = vsub.s32 0, %v32_v1  ;;  %v589_v6 = vsub.s32 1, %v32_v1  ;;  %v591_v7 = vsub.s32 2, %v32_v1  ;;  %v593_v8 = vsub.s32 3, %v32_v1 }
   0x5   :  { %v596_v11 = vsub.s32 4, %v32_v1  ;;  %v598_v12 = vsub.s32 5, %v32_v1  ;;  %v600_v13 = vsub.s32 6, %v32_v1  ;;  %v605_v17 = vsub.s32 7, %v32_v1 }
   0x6   :  { %v34_v10 = vrot.slane %v23_v5, %v584_v4  ;;  %v38_v14 = vrot.slane %v23_v5, %v589_v6  ;;  %v42_v15 = vrot.slane %v23_v5, %v591_v7  ;;  %v46_v16 = vrot.slane %v23_v5, %v593_v8 }
   0x7   :  { %v50_v18 = vrot.slane %v23_v5, %v596_v11  ;;  %v54_v19 = vrot.slane %v23_v5, %v598_v12  ;;  %v58_v20 = vrot.slane %v23_v5, %v600_v13  ;;  %v62_v21 = vrot.slane %v23_v5, %v605_v17 }
   0x8   :  { %v159_v22 = vcombine.low %v34_v10, %v38_v14  ;;  %v160_v23 = vcombine.low %v42_v15, %v46_v16  ;;  %v611_v24 = vsub.s32 %v163_v9, %v32_v1  ;;  %v66_v32 = vrot.slane %v24_v27, %v584_v4 }
   0x9   :  { %v176_v28 = vcombine.low %v50_v18, %v54_v19  ;;  %v177_v29 = vcombine.low %v58_v20, %v62_v21  ;;  %v70_v33 = vrot.slane %v24_v27, %v589_v6  ;;  %v74_v34 = vrot.slane %v24_v27, %v591_v7 }
   0xa   :  { %v167_v25 = vrot.slane %v159_v22, %v611_v24  ;;  %v174_v26 = vrot.slane %v160_v23, %v611_v24  ;;  %v78_v35 = vrot.slane %v24_v27, %v593_v8  ;;  %v82_v45 = vrot.slane %v24_v27, %v596_v11 }
   0xb   :  { %v184_v36 = vrot.slane %v176_v28, %v611_v24  ;;  %v191_v37 = vrot.slane %v177_v29, %v611_v24  ;;  %v193_v40 = vcombine.low %v66_v32, %v70_v33  ;;  %v86_v46 = vrot.slane %v24_v27, %v598_v12 }
   0xc   :  { %v175_v30 = vcombine.low %v167_v25, %v174_v26  ;;  %v194_v41 = vcombine.low %v74_v34, %v78_v35  ;;  %v90_v47 = vrot.slane %v24_v27, %v600_v13  ;;  %v94_v48 = vrot.slane %v24_v27, %v605_v17 }
   0xd   :  { %v192_v39 = vcombine.low %v184_v36, %v191_v37  ;;  %v201_v49 = vrot.slane %v193_v40, %v611_v24  ;;  %v210_v55 = vcombine.low %v82_v45, %v86_v46  ;;  %v98_v62 = vrot.slane %v25_v53, %v584_v4 }
   0xe   :  { %v303_v38 = vmul.f32 %v175_v30, %v15_v31  ;;  %v208_v50 = vrot.slane %v194_v41, %v611_v24  ;;  %v211_v56 = vcombine.low %v90_v47, %v94_v48  ;;  %v102_v0 = vrot.slane %v25_v53, %v589_v6  ;;  %v18_v31 = vld [vmem:[%s741_s0 + $0x18] sm:$0xff] }
   0xf   :  { %v304_v51 = vmul.f32 %v192_v39, %v16_v43  ;;  %v106_v1 = vrot.slane %v25_v53, %v591_v7  ;;  %v110_v5 = vrot.slane %v25_v53, %v593_v8  ;;  %v218_v9 = vrot.slane %v210_v55, %v611_v24  ;;  %v26_v47 = vld [vmem:[%s740_s1 + $0x18] sm:$0xff] }
  0x10   :  { %v319_v42 = vcombine.high %v303_v38, %v303_v38  ;;  %v326_v44 = vrot.slane %v303_v38, %v611_v24  ;;  %v209_v57 = vcombine.low %v201_v49, %v208_v50  ;;  %v225_v10 = vrot.slane %v211_v56, %v611_v24  ;;  %v19_v56 = vld [vmem:[%s741_s0 + $0x20] sm:$0xff] }
  0x11   :  { %v336_v59 = vcombine.high %v304_v51, %v304_v51  ;;  %v343_v60 = vrot.slane %v304_v51, %v611_v24  ;;  %v227_v23 = vcombine.low %v98_v62, %v102_v0  ;;  %v228_v25 = vcombine.low %v106_v1, %v110_v5 }
  0x12   :  { %v333_v52 = vrot.slane %v319_v42, %v611_v24  ;;  %v334_v54 = vcombine.high %v326_v44, %v326_v44  ;;  %v488_v63 = vsel %vm487_vm0, %v326_v44, 0.0  ;;  %v305_v15 = vmul.f32 %v209_v57, %v17_v61 }
  0x13   :  { %v350_v16 = vrot.slane %v336_v59, %v611_v24  ;;  %v351_v18 = vcombine.high %v343_v60, %v343_v60  ;;  %v495_v21 = vsel %vm487_vm0, %v343_v60, 0.0  ;;  %v226_v22 = vcombine.low %v218_v9, %v225_v10 }
  0x14   :  { %v335_v58 = vcombine.high %v333_v52, %v333_v52  ;;  %v489_v2 = vsel %vm487_vm0, %v334_v54, 0.0  ;;  %v491_v3 = vsel %vm487_vm0, %v333_v52, 0.0  ;;  %v353_v28 = vcombine.high %v305_v15, %v305_v15 }
  0x15   :  { %v490_v14 = vadd.f32 %v489_v2, %v488_v63  ;;  %v352_v27 = vcombine.high %v350_v16, %v350_v16  ;;  %v360_v29 = vrot.slane %v305_v15, %v611_v24  ;;  %v497_v30 = vsel %vm487_vm0, %v351_v18, 0.0 }
  0x16   :  { %v493_v19 = vsel %vm487_vm0, %v335_v58, 0.0  ;;  %v114_v33 = vrot.slane %v25_v53, %v596_v11  ;;  %v118_v34 = vrot.slane %v25_v53, %v598_v12  ;;  %v122_v35 = vrot.slane %v25_v53, %v600_v13 }
  0x17   :  { %v492_v20 = vadd.f32 %v491_v3, %v490_v14  ;;  %v499_v36 = vsel %vm487_vm0, %v350_v16, 0.0  ;;  %v126_v37 = vrot.slane %v25_v53, %v605_v17  ;;  %v235_v38 = vrot.slane %v227_v23, %v611_v24 }
  0x18   :  { %v242_v39 = vrot.slane %v228_v25, %v611_v24  ;;  %v306_v41 = vmul.f32 %v226_v22, %v18_v31  ;;  %v367_v42 = vrot.slane %v353_v28, %v611_v24  ;;  %v368_v43 = vcombine.high %v360_v29, %v360_v29 }
  0x19   :  { %v494_v26 = vadd.f32 %v493_v19, %v492_v20  ;;  %v501_v44 = vsel %vm487_vm0, %v352_v27, 0.0  ;;  %v503_v46 = vsel %vm487_vm0, %v360_v29, 0.0  ;;  %v244_v49 = vcombine.low %v114_v33, %v118_v34  ;;  %v20_v20 = vld [vmem:[%s741_s0 + $0x28] sm:$0xff] }
  0x1a   :  { %v243_v48 = vcombine.low %v235_v38, %v242_v39  ;;  %v245_v50 = vcombine.low %v122_v35, %v126_v37  ;;  %v369_v52 = vcombine.high %v367_v42, %v367_v42  ;;  %v370_v53 = vcombine.high %v306_v41, %v306_v41 }
  0x1b   :  { %v496_v32 = vadd.f32 %v495_v21, %v494_v26  ;;  %v377_v54 = vrot.slane %v306_v41, %v611_v24  ;;  %v505_v55 = vsel %vm487_vm0, %v368_v43, 0.0  ;;  %v130_v58 = vrot.slane %v26_v47, %v584_v4  ;;  %v21_v41 = vld [vmem:[%s741_s0 + $0x30] sm:$0xff] }
  0x1c   :  { %v134_v59 = vrot.slane %v26_v47, %v589_v6  ;;  %v138_v60 = vrot.slane %v26_v47, %v591_v7  ;;  %v507_v61 = vsel %vm487_vm0, %v367_v42, 0.0  ;;  %v142_v62 = vrot.slane %v26_v47, %v593_v8 }
  0x1d   :  { %v498_v40 = vadd.f32 %v497_v30, %v496_v32  ;;  %v252_v63 = vrot.slane %v244_v49, %v611_v24  ;;  %v259_v0 = vrot.slane %v245_v50, %v611_v24  ;;  %v307_v2 = vmul.f32 %v243_v48, %v19_v56 }
  0x1e   :  { %v384_v3 = vrot.slane %v370_v53, %v611_v24  ;;  %v385_v5 = vcombine.high %v377_v54, %v377_v54  ;;  %v509_v9 = vsel %vm487_vm0, %v369_v52, 0.0  ;;  %v511_v6 = vsel %vm487_vm0, %v377_v54, 0.0 }
  0x1f   :  { %v500_v45 = vadd.f32 %v499_v36, %v498_v40  ;;  %v260_v10 = vcombine.low %v252_v63, %v259_v0  ;;  %v261_v7 = vcombine.low %v130_v58, %v134_v59  ;;  %v262_v14 = vcombine.low %v138_v60, %v142_v62  ;;  %v22_v59 = vld [vmem:[%s741_s0 + $0x38] sm:$0xff] }
  0x20   :  { %v386_v16 = vcombine.high %v384_v3, %v384_v3  ;;  %v387_v8 = vcombine.high %v307_v2, %v307_v2  ;;  %v394_v18 = vrot.slane %v307_v2, %v611_v24  ;;  %v513_v19 = vsel %vm487_vm0, %v385_v5, 0.0 }
  0x21   :  { %v502_v51 = vadd.f32 %v501_v44, %v500_v45  ;;  %v146_v22 = vrot.slane %v26_v47, %v596_v11  ;;  %v150_v23 = vrot.slane %v26_v47, %v598_v12  ;;  %v154_v25 = vrot.slane %v26_v47, %v600_v13 }
  0x22   :  { %v515_v26 = vsel %vm487_vm0, %v384_v3, 0.0  ;;  %v158_v27 = vrot.slane %v26_v47, %v605_v17  ;;  %v269_v28 = vrot.slane %v261_v7, %v611_v24  ;;  %v276_v29 = vrot.slane %v262_v14, %v611_v24 }
  0x23   :  { %v504_v57 = vadd.f32 %v503_v46, %v502_v51  ;;  %v308_v31 = vmul.f32 %v260_v10, %v20_v20  ;;  %v401_v32 = vrot.slane %v387_v8, %v611_v24  ;;  %v402_v33 = vcombine.high %v394_v18, %v394_v18 }
  0x24   :  { %v517_v34 = vsel %vm487_vm0, %v386_v16, 0.0  ;;  %v519_v12 = vsel %vm487_vm0, %v394_v18, 0.0  ;;  %v277_v35 = vcombine.low %v269_v28, %v276_v29  ;;  %v278_v13 = vcombine.low %v146_v22, %v150_v23 }
  0x25   :  { %v506_v1 = vadd.f32 %v505_v55, %v504_v57  ;;  %v279_v36 = vcombine.low %v154_v25, %v158_v27  ;;  %v403_v38 = vcombine.high %v401_v32, %v401_v32  ;;  %v404_v17 = vcombine.high %v308_v31, %v308_v31 }
  0x26   :  { %v411_v39 = vrot.slane %v308_v31, %v611_v24  ;;  %v521_v40 = vsel %vm487_vm0, %v402_v33, 0.0  ;;  %v523_v43 = vsel %vm487_vm0, %v401_v32, 0.0  ;;  %v286_v44 = vrot.slane %v278_v13, %v611_v24 }
  0x27   :  { %v508_v4 = vadd.f32 %v507_v61, %v506_v1  ;;  %v293_v45 = vrot.slane %v279_v36, %v611_v24  ;;  %v309_v47 = vmul.f32 %v277_v35, %v21_v41  ;;  %v418_v48 = vrot.slane %v404_v17, %v611_v24 }
  0x28   :  { %v419_v49 = vcombine.high %v411_v39, %v411_v39  ;;  %v525_v50 = vsel %vm487_vm0, %v403_v38, 0.0  ;;  %v527_v52 = vsel %vm487_vm0, %v411_v39, 0.0 }
  0x29   :  { %v510_v15 = vadd.f32 %v509_v9, %v508_v4  ;;  %v294_v53 = vcombine.low %v286_v44, %v293_v45  ;;  %v420_v55 = vcombine.high %v418_v48, %v418_v48  ;;  %v421_v56 = vcombine.high %v309_v47, %v309_v47 }
  0x2a   :  { %v428_v57 = vrot.slane %v309_v47, %v611_v24  ;;  %v529_v58 = vsel %vm487_vm0, %v419_v49, 0.0  ;;  %v531_v61 = vsel %vm487_vm0, %v418_v48, 0.0 }
  0x2b   :  { %v512_v21 = vadd.f32 %v511_v6, %v510_v15  ;;  %v310_v63 = vmul.f32 %v294_v53, %v22_v59  ;;  %v435_v0 = vrot.slane %v421_v56, %v611_v24  ;;  %v533_v2 = vsel %vm487_vm0, %v420_v55, 0.0 }
  0x2c   :  { %v436_v1 = vcombine.high %v428_v57, %v428_v57  ;;  %v535_v5 = vsel %vm487_vm0, %v428_v57, 0.0 }
  0x2d   :  { %v514_v30 = vadd.f32 %v513_v19, %v512_v21  ;;  %v437_v4 = vcombine.high %v435_v0, %v435_v0  ;;  %v438_v6 = vcombine.high %v310_v63, %v310_v63  ;;  %v445_v10 = vrot.slane %v310_v63, %v611_v24 }
  0x2e   :  { %v537_v7 = vsel %vm487_vm0, %v436_v1, 0.0  ;;  %v539_v15 = vsel %vm487_vm0, %v435_v0, 0.0 }
  0x2f   :  { %v516_v11 = vadd.f32 %v515_v26, %v514_v30  ;;  %v452_v8 = vrot.slane %v438_v6, %v611_v24  ;;  %v453_v18 = vcombine.high %v445_v10, %v445_v10  ;;  %v541_v19 = vsel %vm487_vm0, %v437_v4, 0.0 }
  0x30   :  { %v543_v21 = vsel %vm487_vm0, %v445_v10, 0.0  ;;  %v554_v24 = vstv %s742_s2 }
  0x31   :  { %v518_v37 = vadd.f32 %v517_v34, %v516_v11  ;;  %v454_v23 = vcombine.high %v452_v8, %v452_v8  ;;  %v545_v25 = vsel %vm487_vm0, %v453_v18, 0.0  ;;  %v547_v27 = vsel %vm487_vm0, %v452_v8, 0.0 }
  0x33   :  { %v520_v42 = vadd.f32 %v519_v12, %v518_v37  ;;  %v549_v29 = vsel %vm487_vm0, %v454_v23, 0.0 }
  0x35   :  { %v522_v46 = vadd.f32 %v521_v40, %v520_v42 }
  0x37   :  { %v524_v51 = vadd.f32 %v523_v43, %v522_v46 }
  0x39   :  { %v526_v54 = vadd.f32 %v525_v50, %v524_v51 }
  0x3b   :  { %v528_v60 = vadd.f32 %v527_v52, %v526_v54 }
  0x3d   :  { %v530_v62 = vadd.f32 %v529_v58, %v528_v60 }
  0x3f   :  { %v532_v3 = vadd.f32 %v531_v61, %v530_v62 }
  0x41   :  { %v534_v9 = vadd.f32 %v533_v2, %v532_v3 }
  0x43   :  { %v536_v14 = vadd.f32 %v535_v5, %v534_v9 }
  0x45   :  { %v538_v16 = vadd.f32 %v537_v7, %v536_v14 }
  0x47   :  { %v540_v20 = vadd.f32 %v539_v15, %v538_v16 }
  0x49   :  { %v542_v22 = vadd.f32 %v541_v19, %v540_v20 }
  0x4b   :  { %v544_v26 = vadd.f32 %v543_v21, %v542_v22 }
  0x4d   :  { %v546_v28 = vadd.f32 %v545_v25, %v544_v26 }
  0x4f   :  { %v548_v30 = vadd.f32 %v547_v27, %v546_v28 }
  0x51   :  { %v550_v31 = vadd.f32 %v549_v29, %v548_v30 }
  0x53   :  { %551 = vadd.xlane.f32.xlu0 %v550_v31 }
  0xe0   :  { %v552_v32 = vpop.xlane.xlu0 %551 }
  0xe1   :  { %v555_v33 = vadd.f32 %v554_v24, %v552_v32 }
  0xe3   :  { %557 = vst.msk [vmem:[%s743_s3] sm:$0x3] %vm556_vm1, %v555_v33 }

</bundles_post_ra>
